<compile_context>
chip_gen: v5e
topology: v5e:2x2
jax: 0.10.0
libtpu: 0.0.40
codegen_flags: <defaults>
</compile_context>

<pallas_src>
import functools

import jax
import jax.numpy as jnp
from jax.experimental import pallas as pl
from jax.experimental.pallas import tpu as pltpu

EPS = 1e-5  # PyTorch BatchNorm1d default eps
_VMEM_LIMIT = 48 * 1024 * 1024  # safe on v5e/v6e (128 MiB) and v7x (64 MiB physical)


def _cparams(semantics):
    return pltpu.CompilerParams(dimension_semantics=semantics,
                                vmem_limit_bytes=_VMEM_LIMIT)


# ---------------------------------------------------------------------------
# Kernels
# ---------------------------------------------------------------------------
def conv_stats_kernel(x_ref, w_ref, y_ref, sum_ref, sumsq_ref):
    """y = W @ x (bf16 MXU, f32 accum); accumulate per-(n, channel) sum / sumsq.

    Conv bias is intentionally dropped: training-mode BN's mean subtraction
    cancels it exactly (mathematically identical output).
    """
    @pl.when(pl.program_id(1) == 0)   # stats block is per-n; init at first L-tile
    def _():
        sum_ref[...] = jnp.zeros_like(sum_ref)
        sumsq_ref[...] = jnp.zeros_like(sumsq_ref)

    y = jnp.dot(w_ref[...], x_ref[...].astype(jnp.bfloat16),
                preferred_element_type=jnp.float32)
    y_ref[...] = y.astype(y_ref.dtype)             # bf16 intermediate to HBM
    sum_ref[...] += jnp.sum(y, axis=1, keepdims=True)
    sumsq_ref[...] += jnp.sum(y * y, axis=1, keepdims=True)


def bnrelu_conv_stats_kernel(yp_ref, sc_ref, sh_ref, w_ref,
                             y_ref, sum_ref, sumsq_ref, *,
                             tl, l_valid, need_mask):
    """h = relu(yp*scale + shift); y = W @ h (bf16 MXU); accumulate layer-2 stats."""
    @pl.when(pl.program_id(1) == 0)
    def _():
        sum_ref[...] = jnp.zeros_like(sum_ref)
        sumsq_ref[...] = jnp.zeros_like(sumsq_ref)

    h = jnp.maximum(yp_ref[...].astype(jnp.float32) * sc_ref[...] + sh_ref[...], 0.0)
    if need_mask:
        # Zero the padded tail columns so they don't contaminate layer-2 stats.
        col = pl.program_id(1) * tl + jax.lax.broadcasted_iota(jnp.int32, h.shape, 1)
        h = jnp.where(col < l_valid, h, 0.0)
    y = jnp.dot(w_ref[...], h.astype(jnp.bfloat16),
                preferred_element_type=jnp.float32)
    y_ref[...] = y
    sum_ref[...] += jnp.sum(y, axis=1, keepdims=True)
    sumsq_ref[...] += jnp.sum(y * y, axis=1, keepdims=True)


def bnrelu_kernel(y_ref, sc_ref, sh_ref, o_ref):
    """Folded BatchNorm affine + ReLU."""
    o_ref[...] = jnp.maximum(y_ref[...] * sc_ref[...] + sh_ref[...], 0.0)


# ---------------------------------------------------------------------------
# Wrappers
# ---------------------------------------------------------------------------
def _pick_tiling(L):
    """Return (TL, L_pad): lane tile and (possibly padded) length, both static."""
    for tl in (2048, 1024, 512, 256, 128):
        if L % tl == 0:
            return tl, L
    if L < 128:
        return L, L                       # tiny L: full-extent lane tile
    l_pad = ((L + 127) // 128) * 128      # pad + in-kernel mask for the tail
    for tl in (2048, 1024, 512, 256, 128):
        if l_pad % tl == 0:
            return tl, l_pad
    return 128, l_pad


def _stats_out(N, Cout, L, y_dtype):
    return [
        jax.ShapeDtypeStruct((N, Cout, L), y_dtype),    # pre-BN conv output
        jax.ShapeDtypeStruct((N, Cout, 1), jnp.float32),  # per-(n, ch) sum
        jax.ShapeDtypeStruct((N, Cout, 1), jnp.float32),  # per-(n, ch) sum of squares
    ]


def _conv_stats(x, w_bf16, tl):
    """Pass A (layer 1). x: (N, Cin, L) native dtype; w: (Cout, Cin) bf16."""
    N, Cin, L = x.shape
    Cout = w_bf16.shape[0]
    grid = (N, L // tl)
    return pl.pallas_call(
        conv_stats_kernel,
        grid=grid,
        in_specs=[
            pl.BlockSpec((None, Cin, tl), lambda n, l: (n, 0, l)),
            pl.BlockSpec((Cout, Cin), lambda n, l: (0, 0)),
        ],
        out_specs=[
            pl.BlockSpec((None, Cout, tl), lambda n, l: (n, 0, l)),
            pl.BlockSpec((None, Cout, 1), lambda n, l: (n, 0, 0)),
            pl.BlockSpec((None, Cout, 1), lambda n, l: (n, 0, 0)),
        ],
        out_shape=_stats_out(N, Cout, L, jnp.bfloat16),
        compiler_params=_cparams(("parallel", "arbitrary")),
    )(x, w_bf16)


def _bnrelu_conv_stats(y_prev, scale, shift, w_bf16, tl, l_valid):
    """Fused pass: layer-1 BN+ReLU, conv4 matmul, layer-2 stats."""
    N, Cin, L = y_prev.shape
    Cout = w_bf16.shape[0]
    grid = (N, L // tl)
    kernel = functools.partial(bnrelu_conv_stats_kernel,
                               tl=tl, l_valid=l_valid, need_mask=(L != l_valid))
    return pl.pallas_call(
        kernel,
        grid=grid,
        in_specs=[
            pl.BlockSpec((None, Cin, tl), lambda n, l: (n, 0, l)),
            pl.BlockSpec((Cin, 1), lambda n, l: (0, 0)),
            pl.BlockSpec((Cin, 1), lambda n, l: (0, 0)),
            pl.BlockSpec((Cout, Cin), lambda n, l: (0, 0)),
        ],
        out_specs=[
            pl.BlockSpec((None, Cout, tl), lambda n, l: (n, 0, l)),
            pl.BlockSpec((None, Cout, 1), lambda n, l: (n, 0, 0)),
            pl.BlockSpec((None, Cout, 1), lambda n, l: (n, 0, 0)),
        ],
        out_shape=_stats_out(N, Cout, L, jnp.float32),
        compiler_params=_cparams(("parallel", "arbitrary")),
    )(y_prev, scale, shift, w_bf16)


def _bnrelu(y, scale, shift, tl):
    """Final pass: folded affine + ReLU, fully parallel grid."""
    N, C, L = y.shape
    grid = (N, L // tl)
    return pl.pallas_call(
        bnrelu_kernel,
        grid=grid,
        in_specs=[
            pl.BlockSpec((None, C, tl), lambda n, l: (n, 0, l)),
            pl.BlockSpec((C, 1), lambda n, l: (0, 0)),
            pl.BlockSpec((C, 1), lambda n, l: (0, 0)),
        ],
        out_specs=pl.BlockSpec((None, C, tl), lambda n, l: (n, 0, l)),
        out_shape=jax.ShapeDtypeStruct((N, C, L), jnp.float32),
        compiler_params=_cparams(("parallel", "parallel")),
    )(y, scale, shift)


def _fold_bn(ch_sum, ch_sumsq, gamma, beta, count):
    """Reduce per-N stats and fold batch stats + BN affine into scale/shift."""
    s = jnp.sum(ch_sum, axis=0)      # (C, 1)
    ss = jnp.sum(ch_sumsq, axis=0)   # (C, 1)
    mu = s / count
    var = jnp.maximum(ss / count - mu * mu, 0.0)  # biased, training-mode variance
    scale = gamma.reshape(-1, 1).astype(jnp.float32) * jax.lax.rsqrt(var + EPS)
    shift = beta.reshape(-1, 1).astype(jnp.float32) - scale * mu
    return scale, shift


@jax.jit
def mlp512_32_forward(x, w3, b3, g3, be3, w4, b4, g4, be4):
    """x: (N, 512, L) NCL layout. Returns (N, 32, L) float32.

    b3/b4 are accepted for signature parity with the PyTorch module, but are not
    needed: training-mode BatchNorm cancels a 1x1-conv bias exactly.
    """
    del b3, b4
    N, _, L = x.shape
    count = jnp.float32(N * L)

    tl, l_pad = _pick_tiling(L)
    if l_pad != L:
        x = jnp.pad(x, ((0, 0), (0, 0), (0, l_pad - L)))

    w3_bf = w3.reshape(w3.shape[0], w3.shape[1]).astype(jnp.bfloat16)
    w4_bf = w4.reshape(w4.shape[0], w4.shape[1]).astype(jnp.bfloat16)

    # Layer 1: conv3 + batch stats (bf16 MXU, bf16 intermediate).
    y1, s1, ss1 = _conv_stats(x, w3_bf, tl)
    sc1, sh1 = _fold_bn(s1, ss1, g3, be3, count)

    # Layer-1 normalize+ReLU fused with conv4 + layer-2 stats.
    y2, s2, ss2 = _bnrelu_conv_stats(y1, sc1, sh1, w4_bf, tl, L)
    sc2, sh2 = _fold_bn(s2, ss2, g4, be4, count)

    # Layer 2 normalize + ReLU.
    out = _bnrelu(y2, sc2, sh2, tl)
    if l_pad != L:
        out = out[:, :, :L]
    return out


# ---------------------------------------------------------------------------
# Pure-JAX f32 reference (includes the conv biases)
# ---------------------------------------------------------------------------
def _ref_forward(x, w3, b3, g3, be3, w4, b4, g4, be4):
    def layer(h, w, b, g, be):
        w2 = w.reshape(w.shape[0], w.shape[1])
        y = jnp.einsum("ncl,oc->nol", h, w2) + b.reshape(1, -1, 1)
        mu = jnp.mean(y, axis=(0, 2), keepdims=True)
        var = jnp.var(y, axis=(0, 2), keepdims=True)  # biased
        yh = (y - mu) * jax.lax.rsqrt(var + EPS)
        return jnp.maximum(g.reshape(1, -1, 1) * yh + be.reshape(1, -1, 1), 0.0)

    h = layer(x, w3, b3, g3, be3)
    return layer(h, w4, b4, g4, be4)


if __name__ == "__main__":
    key = jax.random.PRNGKey(0)
    ks = jax.random.split(key, 9)

    N, C0, C1, C2, L = 2, 512, 256, 32, 8

    x = jax.random.normal(ks[0], (N, C0, L), dtype=jnp.float32)
    w3 = jax.random.normal(ks[1], (C1, C0, 1), dtype=jnp.float32) * (1.0 / C0) ** 0.5
    b3 = jax.random.normal(ks[2], (C1,), dtype=jnp.float32) * 0.01
    g3 = 1.0 + 0.1 * jax.random.normal(ks[3], (C1,), dtype=jnp.float32)
    be3 = 0.1 * jax.random.normal(ks[4], (C1,), dtype=jnp.float32)
    w4 = jax.random.normal(ks[5], (C2, C1, 1), dtype=jnp.float32) * (1.0 / C1) ** 0.5
    b4 = jax.random.normal(ks[6], (C2,), dtype=jnp.float32) * 0.01
    g4 = 1.0 + 0.1 * jax.random.normal(ks[7], (C2,), dtype=jnp.float32)
    be4 = 0.1 * jax.random.normal(ks[8], (C2,), dtype=jnp.float32)

    out = mlp512_32_forward(x, w3, b3, g3, be3, w4, b4, g4, be4)
    out = jax.block_until_ready(out)
    assert out.shape == (N, C2, L), out.shape

    # Tolerance loosened vs. the pure-f32 version: bf16 MXU operands and bf16 y1
    # intermediate are a deliberate precision/perf tradeoff (~1e-2 level errors).
    ref = _ref_forward(x, w3, b3, g3, be3, w4, b4, g4, be4)
    max_err = float(jnp.max(jnp.abs(out - ref)))
    assert max_err < 5e-2, f"mismatch vs reference: {max_err}"

    print("KERNEL_OK")
</pallas_src>

<mosaic_0001>
module attributes {stable_mosaic.version = 11 : i64} {
  func.func @conv_stats_kernel(%arg0: i32, %arg1: i32, %arg2: memref<1x512x8xf32, #tpu.memory_space<vmem>>, %arg3: memref<256x512xbf16, #tpu.memory_space<vmem>>, %arg4: memref<1x256x8xbf16, #tpu.memory_space<vmem>>, %arg5: memref<1x256x1xf32, #tpu.memory_space<vmem>>, %arg6: memref<1x256x1xf32, #tpu.memory_space<vmem>>) attributes {dimension_semantics = [#tpu.dimension_semantics<parallel>, #tpu.dimension_semantics<arbitrary>], iteration_bounds = array<i64: 2, 1>, scalar_prefetch = 0 : i64, scratch_operands = 0 : i64, tpu.core_type = #tpu.core_type<tc>, window_params = [{transform_indices = @transform_0, window_bounds = array<i64: 1, 512, 8>}, {pipeline_mode = #tpu.pipeline_mode<synchronous>, transform_indices = @transform_1, window_bounds = array<i64: 256, 512>}, {transform_indices = @transform_2, window_bounds = array<i64: 1, 256, 8>}, {transform_indices = @transform_3, window_bounds = array<i64: 1, 256, 1>}, {transform_indices = @transform_4, window_bounds = array<i64: 1, 256, 1>}]} {
    %c0_i32 = arith.constant 0 : i32
    %0 = arith.cmpi eq, %arg1, %c0_i32 : i32
    %1 = arith.extui %0 : i1 to i32
    %c0_i32_0 = arith.constant 0 : i32
    %2 = arith.cmpi ne, %1, %c0_i32_0 : i32
    scf.if %2 {
      %cst_22 = arith.constant 0.000000e+00 : f32
      %29 = vector.broadcast %cst_22 : f32 to vector<256x1xf32>
      %c0_23 = arith.constant 0 : index
      %c0_24 = arith.constant 0 : index
      %c0_25 = arith.constant 0 : index
      %30 = vector.load %arg5[%c0_23, %c0_24, %c0_25] : memref<1x256x1xf32, #tpu.memory_space<vmem>>, vector<1x256x1xf32>
      %31 = vector.shape_cast %30 : vector<1x256x1xf32> to vector<256x1xf32>
      %32 = vector.shape_cast %29 : vector<256x1xf32> to vector<1x256x1xf32>
      tpu.vector_store %arg5[%c0_23, %c0_24, %c0_25], %32 {strides = array<i32>} : memref<1x256x1xf32, #tpu.memory_space<vmem>>, vector<1x256x1xf32>,
      %cst_26 = arith.constant 0.000000e+00 : f32
      %33 = vector.broadcast %cst_26 : f32 to vector<256x1xf32>
      %c0_27 = arith.constant 0 : index
      %c0_28 = arith.constant 0 : index
      %c0_29 = arith.constant 0 : index
      %34 = vector.load %arg6[%c0_27, %c0_28, %c0_29] : memref<1x256x1xf32, #tpu.memory_space<vmem>>, vector<1x256x1xf32>
      %35 = vector.shape_cast %34 : vector<1x256x1xf32> to vector<256x1xf32>
      %36 = vector.shape_cast %33 : vector<256x1xf32> to vector<1x256x1xf32>
      tpu.vector_store %arg6[%c0_27, %c0_28, %c0_29], %36 {strides = array<i32>} : memref<1x256x1xf32, #tpu.memory_space<vmem>>, vector<1x256x1xf32>,
    } else {
    }
    %c0 = arith.constant 0 : index
    %c0_1 = arith.constant 0 : index
    %3 = vector.load %arg3[%c0, %c0_1] : memref<256x512xbf16, #tpu.memory_space<vmem>>, vector<256x512xbf16>
    %c0_2 = arith.constant 0 : index
    %c0_3 = arith.constant 0 : index
    %c0_4 = arith.constant 0 : index
    %4 = vector.load %arg2[%c0_2, %c0_3, %c0_4] : memref<1x512x8xf32, #tpu.memory_space<vmem>>, vector<1x512x8xf32>
    %5 = vector.shape_cast %4 : vector<1x512x8xf32> to vector<512x8xf32>
    %6 = arith.truncf %5 : vector<512x8xf32> to vector<512x8xbf16>
    %cst = arith.constant dense<0.000000e+00> : vector<256x8xf32>
    %7 = tpu.matmul %3, %6, %cst {dimension_numbers = #tpu.dot_dimension_numbers<[1], [0], [0], [1], [0, 0, 1, 1], [], []>} : vector<256x512xbf16>, vector<512x8xbf16>, vector<256x8xf32> -> vector<256x8xf32>
    %8 = arith.truncf %7 : vector<256x8xf32> to vector<256x8xbf16>
    %c0_5 = arith.constant 0 : index
    %c0_6 = arith.constant 0 : index
    %c0_7 = arith.constant 0 : index
    %9 = vector.load %arg4[%c0_5, %c0_6, %c0_7] : memref<1x256x8xbf16, #tpu.memory_space<vmem>>, vector<1x256x8xbf16>
    %10 = vector.shape_cast %9 : vector<1x256x8xbf16> to vector<256x8xbf16>
    %11 = vector.shape_cast %8 : vector<256x8xbf16> to vector<1x256x8xbf16>
    tpu.vector_store %arg4[%c0_5, %c0_6, %c0_7], %11 {strides = array<i32>} : memref<1x256x8xbf16, #tpu.memory_space<vmem>>, vector<1x256x8xbf16>,
    %c0_8 = arith.constant 0 : index
    %c0_9 = arith.constant 0 : index
    %c0_10 = arith.constant 0 : index
    %12 = vector.load %arg5[%c0_8, %c0_9, %c0_10] : memref<1x256x1xf32, #tpu.memory_space<vmem>>, vector<1x256x1xf32>
    %13 = vector.shape_cast %12 : vector<1x256x1xf32> to vector<256x1xf32>
    %cst_11 = arith.constant dense<0.000000e+00> : vector<256xf32>
    %14 = vector.multi_reduction <add>, %7, %cst_11 [1] : vector<256x8xf32> to vector<256xf32>
    %15 = vector.shape_cast %14 : vector<256xf32> to vector<256x1xf32>
    %16 = arith.addf %13, %15 : vector<256x1xf32>
    %c0_12 = arith.constant 0 : index
    %c0_13 = arith.constant 0 : index
    %c0_14 = arith.constant 0 : index
    %17 = vector.load %arg5[%c0_12, %c0_13, %c0_14] : memref<1x256x1xf32, #tpu.memory_space<vmem>>, vector<1x256x1xf32>
    %18 = vector.shape_cast %17 : vector<1x256x1xf32> to vector<256x1xf32>
    %19 = vector.shape_cast %16 : vector<256x1xf32> to vector<1x256x1xf32>
    tpu.vector_store %arg5[%c0_12, %c0_13, %c0_14], %19 {strides = array<i32>} : memref<1x256x1xf32, #tpu.memory_space<vmem>>, vector<1x256x1xf32>,
    %c0_15 = arith.constant 0 : index
    %c0_16 = arith.constant 0 : index
    %c0_17 = arith.constant 0 : index
    %20 = vector.load %arg6[%c0_15, %c0_16, %c0_17] : memref<1x256x1xf32, #tpu.memory_space<vmem>>, vector<1x256x1xf32>
    %21 = vector.shape_cast %20 : vector<1x256x1xf32> to vector<256x1xf32>
    %22 = arith.mulf %7, %7 : vector<256x8xf32>
    %cst_18 = arith.constant dense<0.000000e+00> : vector<256xf32>
    %23 = vector.multi_reduction <add>, %22, %cst_18 [1] : vector<256x8xf32> to vector<256xf32>
    %24 = vector.shape_cast %23 : vector<256xf32> to vector<256x1xf32>
    %25 = arith.addf %21, %24 : vector<256x1xf32>
    %c0_19 = arith.constant 0 : index
    %c0_20 = arith.constant 0 : index
    %c0_21 = arith.constant 0 : index
    %26 = vector.load %arg6[%c0_19, %c0_20, %c0_21] : memref<1x256x1xf32, #tpu.memory_space<vmem>>, vector<1x256x1xf32>
    %27 = vector.shape_cast %26 : vector<1x256x1xf32> to vector<256x1xf32>
    %28 = vector.shape_cast %25 : vector<256x1xf32> to vector<1x256x1xf32>
    tpu.vector_store %arg6[%c0_19, %c0_20, %c0_21], %28 {strides = array<i32>} : memref<1x256x1xf32, #tpu.memory_space<vmem>>, vector<1x256x1xf32>,
    return
  }
  func.func @transform_0(%arg0: i32, %arg1: i32) -> (i32, i32, i32) {
    %c0_i32 = arith.constant 0 : i32
    %c0_i32_0 = arith.constant 0 : i32
    return %arg0, %c0_i32, %arg1 : i32, i32, i32
  }
  func.func @transform_1(%arg0: i32, %arg1: i32) -> (i32, i32) {
    %c0_i32 = arith.constant 0 : i32
    %c0_i32_0 = arith.constant 0 : i32
    %c0_i32_1 = arith.constant 0 : i32
    return %c0_i32, %c0_i32_0 : i32, i32
  }
  func.func @transform_2(%arg0: i32, %arg1: i32) -> (i32, i32, i32) {
    %c0_i32 = arith.constant 0 : i32
    %c0_i32_0 = arith.constant 0 : i32
    return %arg0, %c0_i32, %arg1 : i32, i32, i32
  }
  func.func @transform_3(%arg0: i32, %arg1: i32) -> (i32, i32, i32) {
    %c0_i32 = arith.constant 0 : i32
    %c0_i32_0 = arith.constant 0 : i32
    %c0_i32_1 = arith.constant 0 : i32
    return %arg0, %c0_i32, %c0_i32_0 : i32, i32, i32
  }
  func.func @transform_4(%arg0: i32, %arg1: i32) -> (i32, i32, i32) {
    %c0_i32 = arith.constant 0 : i32
    %c0_i32_0 = arith.constant 0 : i32
    %c0_i32_1 = arith.constant 0 : i32
    return %arg0, %c0_i32, %c0_i32_0 : i32, i32, i32
  }
}

module attributes {stable_mosaic.version = 11 : i64} {
  func.func @bnrelu_conv_stats_kernel(%arg0: i32, %arg1: i32, %arg2: memref<1x256x8xbf16, #tpu.memory_space<vmem>>, %arg3: memref<256x1xf32, #tpu.memory_space<vmem>>, %arg4: memref<256x1xf32, #tpu.memory_space<vmem>>, %arg5: memref<32x256xbf16, #tpu.memory_space<vmem>>, %arg6: memref<1x32x8xf32, #tpu.memory_space<vmem>>, %arg7: memref<1x32x1xf32, #tpu.memory_space<vmem>>, %arg8: memref<1x32x1xf32, #tpu.memory_space<vmem>>) attributes {dimension_semantics = [#tpu.dimension_semantics<parallel>, #tpu.dimension_semantics<arbitrary>], iteration_bounds = array<i64: 2, 1>, scalar_prefetch = 0 : i64, scratch_operands = 0 : i64, tpu.core_type = #tpu.core_type<tc>, window_params = [{transform_indices = @transform_0, window_bounds = array<i64: 1, 256, 8>}, {pipeline_mode = #tpu.pipeline_mode<synchronous>, transform_indices = @transform_1, window_bounds = array<i64: 256, 1>}, {pipeline_mode = #tpu.pipeline_mode<synchronous>, transform_indices = @transform_2, window_bounds = array<i64: 256, 1>}, {pipeline_mode = #tpu.pipeline_mode<synchronous>, transform_indices = @transform_3, window_bounds = array<i64: 32, 256>}, {transform_indices = @transform_4, window_bounds = array<i64: 1, 32, 8>}, {transform_indices = @transform_5, window_bounds = array<i64: 1, 32, 1>}, {transform_indices = @transform_6, window_bounds = array<i64: 1, 32, 1>}]} {
    %c0_i32 = arith.constant 0 : i32
    %0 = arith.cmpi eq, %arg1, %c0_i32 : i32
    %1 = arith.extui %0 : i1 to i32
    %c0_i32_0 = arith.constant 0 : i32
    %2 = arith.cmpi ne, %1, %c0_i32_0 : i32
    scf.if %2 {
      %cst_27 = arith.constant 0.000000e+00 : f32
      %37 = vector.broadcast %cst_27 : f32 to vector<32x1xf32>
      %c0_28 = arith.constant 0 : index
      %c0_29 = arith.constant 0 : index
      %c0_30 = arith.constant 0 : index
      %38 = vector.load %arg7[%c0_28, %c0_29, %c0_30] : memref<1x32x1xf32, #tpu.memory_space<vmem>>, vector<1x32x1xf32>
      %39 = vector.shape_cast %38 : vector<1x32x1xf32> to vector<32x1xf32>
      %40 = vector.shape_cast %37 : vector<32x1xf32> to vector<1x32x1xf32>
      tpu.vector_store %arg7[%c0_28, %c0_29, %c0_30], %40 {strides = array<i32>} : memref<1x32x1xf32, #tpu.memory_space<vmem>>, vector<1x32x1xf32>,
      %cst_31 = arith.constant 0.000000e+00 : f32
      %41 = vector.broadcast %cst_31 : f32 to vector<32x1xf32>
      %c0_32 = arith.constant 0 : index
      %c0_33 = arith.constant 0 : index
      %c0_34 = arith.constant 0 : index
      %42 = vector.load %arg8[%c0_32, %c0_33, %c0_34] : memref<1x32x1xf32, #tpu.memory_space<vmem>>, vector<1x32x1xf32>
      %43 = vector.shape_cast %42 : vector<1x32x1xf32> to vector<32x1xf32>
      %44 = vector.shape_cast %41 : vector<32x1xf32> to vector<1x32x1xf32>
      tpu.vector_store %arg8[%c0_32, %c0_33, %c0_34], %44 {strides = array<i32>} : memref<1x32x1xf32, #tpu.memory_space<vmem>>, vector<1x32x1xf32>,
    } else {
    }
    %c0 = arith.constant 0 : index
    %c0_1 = arith.constant 0 : index
    %c0_2 = arith.constant 0 : index
    %3 = vector.load %arg2[%c0, %c0_1, %c0_2] : memref<1x256x8xbf16, #tpu.memory_space<vmem>>, vector<1x256x8xbf16>
    %4 = vector.shape_cast %3 : vector<1x256x8xbf16> to vector<256x8xbf16>
    %5 = arith.extf %4 : vector<256x8xbf16> to vector<256x8xf32>
    %c0_3 = arith.constant 0 : index
    %c0_4 = arith.constant 0 : index
    %6 = vector.load %arg3[%c0_3, %c0_4] : memref<256x1xf32, #tpu.memory_space<vmem>>, vector<256x1xf32>
    %7 = vector.broadcast %6 : vector<256x1xf32> to vector<256x8xf32>
    %8 = arith.mulf %5, %7 : vector<256x8xf32>
    %c0_5 = arith.constant 0 : index
    %c0_6 = arith.constant 0 : index
    %9 = vector.load %arg4[%c0_5, %c0_6] : memref<256x1xf32, #tpu.memory_space<vmem>>, vector<256x1xf32>
    %10 = vector.broadcast %9 : vector<256x1xf32> to vector<256x8xf32>
    %11 = arith.addf %8, %10 : vector<256x8xf32>
    %cst = arith.constant 0.000000e+00 : f32
    %12 = vector.broadcast %cst : f32 to vector<256x8xf32>
    %13 = arith.maximumf %11, %12 : vector<256x8xf32>
    %c0_7 = arith.constant 0 : index
    %c0_8 = arith.constant 0 : index
    %14 = vector.load %arg5[%c0_7, %c0_8] : memref<32x256xbf16, #tpu.memory_space<vmem>>, vector<32x256xbf16>
    %15 = arith.truncf %13 : vector<256x8xf32> to vector<256x8xbf16>
    %cst_9 = arith.constant dense<0.000000e+00> : vector<32x8xf32>
    %16 = tpu.matmul %14, %15, %cst_9 {dimension_numbers = #tpu.dot_dimension_numbers<[1], [0], [0], [1], [0, 0, 1, 1], [], []>} : vector<32x256xbf16>, vector<256x8xbf16>, vector<32x8xf32> -> vector<32x8xf32>
    %c0_10 = arith.constant 0 : index
    %c0_11 = arith.constant 0 : index
    %c0_12 = arith.constant 0 : index
    %17 = vector.load %arg6[%c0_10, %c0_11, %c0_12] : memref<1x32x8xf32, #tpu.memory_space<vmem>>, vector<1x32x8xf32>
    %18 = vector.shape_cast %17 : vector<1x32x8xf32> to vector<32x8xf32>
    %19 = vector.shape_cast %16 : vector<32x8xf32> to vector<1x32x8xf32>
    tpu.vector_store %arg6[%c0_10, %c0_11, %c0_12], %19 {strides = array<i32>} : memref<1x32x8xf32, #tpu.memory_space<vmem>>, vector<1x32x8xf32>,
    %c0_13 = arith.constant 0 : index
    %c0_14 = arith.constant 0 : index
    %c0_15 = arith.constant 0 : index
    %20 = vector.load %arg7[%c0_13, %c0_14, %c0_15] : memref<1x32x1xf32, #tpu.memory_space<vmem>>, vector<1x32x1xf32>
    %21 = vector.shape_cast %20 : vector<1x32x1xf32> to vector<32x1xf32>
    %cst_16 = arith.constant dense<0.000000e+00> : vector<32xf32>
    %22 = vector.multi_reduction <add>, %16, %cst_16 [1] : vector<32x8xf32> to vector<32xf32>
    %23 = vector.shape_cast %22 : vector<32xf32> to vector<32x1xf32>
    %24 = arith.addf %21, %23 : vector<32x1xf32>
    %c0_17 = arith.constant 0 : index
    %c0_18 = arith.constant 0 : index
    %c0_19 = arith.constant 0 : index
    %25 = vector.load %arg7[%c0_17, %c0_18, %c0_19] : memref<1x32x1xf32, #tpu.memory_space<vmem>>, vector<1x32x1xf32>
    %26 = vector.shape_cast %25 : vector<1x32x1xf32> to vector<32x1xf32>
    %27 = vector.shape_cast %24 : vector<32x1xf32> to vector<1x32x1xf32>
    tpu.vector_store %arg7[%c0_17, %c0_18, %c0_19], %27 {strides = array<i32>} : memref<1x32x1xf32, #tpu.memory_space<vmem>>, vector<1x32x1xf32>,
    %c0_20 = arith.constant 0 : index
    %c0_21 = arith.constant 0 : index
    %c0_22 = arith.constant 0 : index
    %28 = vector.load %arg8[%c0_20, %c0_21, %c0_22] : memref<1x32x1xf32, #tpu.memory_space<vmem>>, vector<1x32x1xf32>
    %29 = vector.shape_cast %28 : vector<1x32x1xf32> to vector<32x1xf32>
    %30 = arith.mulf %16, %16 : vector<32x8xf32>
    %cst_23 = arith.constant dense<0.000000e+00> : vector<32xf32>
    %31 = vector.multi_reduction <add>, %30, %cst_23 [1] : vector<32x8xf32> to vector<32xf32>
    %32 = vector.shape_cast %31 : vector<32xf32> to vector<32x1xf32>
    %33 = arith.addf %29, %32 : vector<32x1xf32>
    %c0_24 = arith.constant 0 : index
    %c0_25 = arith.constant 0 : index
    %c0_26 = arith.constant 0 : index
    %34 = vector.load %arg8[%c0_24, %c0_25, %c0_26] : memref<1x32x1xf32, #tpu.memory_space<vmem>>, vector<1x32x1xf32>
    %35 = vector.shape_cast %34 : vector<1x32x1xf32> to vector<32x1xf32>
    %36 = vector.shape_cast %33 : vector<32x1xf32> to vector<1x32x1xf32>
    tpu.vector_store %arg8[%c0_24, %c0_25, %c0_26], %36 {strides = array<i32>} : memref<1x32x1xf32, #tpu.memory_space<vmem>>, vector<1x32x1xf32>,
    return
  }
  func.func @transform_0(%arg0: i32, %arg1: i32) -> (i32, i32, i32) {
    %c0_i32 = arith.constant 0 : i32
    %c0_i32_0 = arith.constant 0 : i32
    return %arg0, %c0_i32, %arg1 : i32, i32, i32
  }
  func.func @transform_1(%arg0: i32, %arg1: i32) -> (i32, i32) {
    %c0_i32 = arith.constant 0 : i32
    %c0_i32_0 = arith.constant 0 : i32
    %c0_i32_1 = arith.constant 0 : i32
    return %c0_i32, %c0_i32_0 : i32, i32
  }
  func.func @transform_2(%arg0: i32, %arg1: i32) -> (i32, i32) {
    %c0_i32 = arith.constant 0 : i32
    %c0_i32_0 = arith.constant 0 : i32
    %c0_i32_1 = arith.constant 0 : i32
    return %c0_i32, %c0_i32_0 : i32, i32
  }
  func.func @transform_3(%arg0: i32, %arg1: i32) -> (i32, i32) {
    %c0_i32 = arith.constant 0 : i32
    %c0_i32_0 = arith.constant 0 : i32
    %c0_i32_1 = arith.constant 0 : i32
    return %c0_i32, %c0_i32_0 : i32, i32
  }
  func.func @transform_4(%arg0: i32, %arg1: i32) -> (i32, i32, i32) {
    %c0_i32 = arith.constant 0 : i32
    %c0_i32_0 = arith.constant 0 : i32
    return %arg0, %c0_i32, %arg1 : i32, i32, i32
  }
  func.func @transform_5(%arg0: i32, %arg1: i32) -> (i32, i32, i32) {
    %c0_i32 = arith.constant 0 : i32
    %c0_i32_0 = arith.constant 0 : i32
    %c0_i32_1 = arith.constant 0 : i32
    return %arg0, %c0_i32, %c0_i32_0 : i32, i32, i32
  }
  func.func @transform_6(%arg0: i32, %arg1: i32) -> (i32, i32, i32) {
    %c0_i32 = arith.constant 0 : i32
    %c0_i32_0 = arith.constant 0 : i32
    %c0_i32_1 = arith.constant 0 : i32
    return %arg0, %c0_i32, %c0_i32_0 : i32, i32, i32
  }
}

module attributes {stable_mosaic.version = 11 : i64} {
  func.func @bnrelu_kernel(%arg0: i32, %arg1: i32, %arg2: memref<1x32x8xf32, #tpu.memory_space<vmem>>, %arg3: memref<32x1xf32, #tpu.memory_space<vmem>>, %arg4: memref<32x1xf32, #tpu.memory_space<vmem>>, %arg5: memref<1x32x8xf32, #tpu.memory_space<vmem>>) attributes {dimension_semantics = [#tpu.dimension_semantics<parallel>, #tpu.dimension_semantics<parallel>], iteration_bounds = array<i64: 2, 1>, scalar_prefetch = 0 : i64, scratch_operands = 0 : i64, tpu.core_type = #tpu.core_type<tc>, window_params = [{transform_indices = @transform_0, window_bounds = array<i64: 1, 32, 8>}, {pipeline_mode = #tpu.pipeline_mode<synchronous>, transform_indices = @transform_1, window_bounds = array<i64: 32, 1>}, {pipeline_mode = #tpu.pipeline_mode<synchronous>, transform_indices = @transform_2, window_bounds = array<i64: 32, 1>}, {transform_indices = @transform_3, window_bounds = array<i64: 1, 32, 8>}]} {
    %c0 = arith.constant 0 : index
    %c0_0 = arith.constant 0 : index
    %c0_1 = arith.constant 0 : index
    %0 = vector.load %arg2[%c0, %c0_0, %c0_1] : memref<1x32x8xf32, #tpu.memory_space<vmem>>, vector<1x32x8xf32>
    %1 = vector.shape_cast %0 : vector<1x32x8xf32> to vector<32x8xf32>
    %c0_2 = arith.constant 0 : index
    %c0_3 = arith.constant 0 : index
    %2 = vector.load %arg3[%c0_2, %c0_3] : memref<32x1xf32, #tpu.memory_space<vmem>>, vector<32x1xf32>
    %3 = vector.broadcast %2 : vector<32x1xf32> to vector<32x8xf32>
    %4 = arith.mulf %1, %3 : vector<32x8xf32>
    %c0_4 = arith.constant 0 : index
    %c0_5 = arith.constant 0 : index
    %5 = vector.load %arg4[%c0_4, %c0_5] : memref<32x1xf32, #tpu.memory_space<vmem>>, vector<32x1xf32>
    %6 = vector.broadcast %5 : vector<32x1xf32> to vector<32x8xf32>
    %7 = arith.addf %4, %6 : vector<32x8xf32>
    %cst = arith.constant 0.000000e+00 : f32
    %8 = vector.broadcast %cst : f32 to vector<32x8xf32>
    %9 = arith.maximumf %7, %8 : vector<32x8xf32>
    %c0_6 = arith.constant 0 : index
    %c0_7 = arith.constant 0 : index
    %c0_8 = arith.constant 0 : index
    %10 = vector.load %arg5[%c0_6, %c0_7, %c0_8] : memref<1x32x8xf32, #tpu.memory_space<vmem>>, vector<1x32x8xf32>
    %11 = vector.shape_cast %10 : vector<1x32x8xf32> to vector<32x8xf32>
    %12 = vector.shape_cast %9 : vector<32x8xf32> to vector<1x32x8xf32>
    tpu.vector_store %arg5[%c0_6, %c0_7, %c0_8], %12 {strides = array<i32>} : memref<1x32x8xf32, #tpu.memory_space<vmem>>, vector<1x32x8xf32>,
    return
  }
  func.func @transform_0(%arg0: i32, %arg1: i32) -> (i32, i32, i32) {
    %c0_i32 = arith.constant 0 : i32
    %c0_i32_0 = arith.constant 0 : i32
    return %arg0, %c0_i32, %arg1 : i32, i32, i32
  }
  func.func @transform_1(%arg0: i32, %arg1: i32) -> (i32, i32) {
    %c0_i32 = arith.constant 0 : i32
    %c0_i32_0 = arith.constant 0 : i32
    %c0_i32_1 = arith.constant 0 : i32
    return %c0_i32, %c0_i32_0 : i32, i32
  }
  func.func @transform_2(%arg0: i32, %arg1: i32) -> (i32, i32) {
    %c0_i32 = arith.constant 0 : i32
    %c0_i32_0 = arith.constant 0 : i32
    %c0_i32_1 = arith.constant 0 : i32
    return %c0_i32, %c0_i32_0 : i32, i32
  }
  func.func @transform_3(%arg0: i32, %arg1: i32) -> (i32, i32, i32) {
    %c0_i32 = arith.constant 0 : i32
    %c0_i32_0 = arith.constant 0 : i32
    return %arg0, %c0_i32, %arg1 : i32, i32, i32
  }
}

</mosaic_0001>

<bundles_post_ra>
// kernel: mul.6
= control target key start
LH: loop header
LB: loop body
LE: loop exit
PB: predicated region body
PF: predicated region fallthrough
CT: control target
= control target key end

     0   :  { %s56_s0 = inlined_call_operand.vmem [shape: f32[256,1], index: 0, kind: input, shape index: {}, may-alias: {0,1}]   ;;  %s57_s1 = inlined_call_operand.vmem [shape: f32[256,1], index: 1, kind: input, shape index: {}, may-alias: {0,1}]   ;;  %s58_s2 = inlined_call_operand.vmem [shape: f32[256,1], index: 2, kind: output, shape index: {}]  }
   0x1   :  { %v3_v0 = vld [vmem:[%s56_s0] sm:$0x1]  ;;  %v20_v2 = vld [vmem:[%s56_s0 + $0x1] sm:$0x1] }
   0x2   :  { %v4_v1 = vld [vmem:[%s57_s1] sm:$0x1]  ;;  %v21_v4 = vld [vmem:[%s57_s1 + $0x1] sm:$0x1] }
   0x3   :  { %v7_v3 = vmul.f32 %v4_v1, %v3_v0  ;;  %v16_v5 = vmul.f32 %v21_v4, %v20_v2 }
   0x5   :  { %9 = vst [vmem:[%s58_s2] sm:$0x1] %v7_v3 }
   0x6   :  { %22 = vst [vmem:[%s58_s2 + $0x1] sm:$0x1] %v16_v5 }

// kernel: mlp512_32_forward.4
= control target key start
LH: loop header
LB: loop body
LE: loop exit
PB: predicated region body
PF: predicated region fallthrough
CT: control target
= control target key end

     0   :  { %s1374_s21 = smov 0   ;;  %s1376_s22 = smov 0   ;;  %s1789_s0 = inlined_call_operand.vmem [shape: bf16[2,256,8], index: 0, kind: input, shape index: {}]   ;;  %s1790_s1 = inlined_call_operand.vmem [shape: f32[256,1], index: 1, kind: input, shape index: {}]   ;;  %s1791_s2 = inlined_call_operand.vmem [shape: f32[256,1], index: 2, kind: input, shape index: {}]   ;;  %s1792_s3 = inlined_call_operand.vmem [shape: bf16[32,256], index: 3, kind: input, shape index: {}]   ;;  %s1793_s4 = inlined_call_operand.vmem [shape: f32[2,32,8], index: 4, kind: output, shape index: {0}]   ;;  %s1794_s5 = inlined_call_operand.vmem [shape: f32[2,32,1], index: 5, kind: output, shape index: {1}]   ;;  %s1795_s6 = inlined_call_operand.vmem [shape: f32[2,32,1], index: 6, kind: output, shape index: {2}]  }
   0x1   :  { %s1378_s23 = smov 0  }
   0x2 LB: > { %s29_s24 = sadd.s32 1, %s1331_s22  ;;  %p1154_p0 = scmp.ge.s32.totalorder %s1335_s23, 1  ;;  %s1335_s23 = sphi %s1378_s23, %s17_s23   ;;  %s1331_s22 = sphi %s1376_s22, %s1797_s22   ;;  %s1327_s21 = sphi %s1374_s21, %s1796_s21  }
   0x3   : > { %p31_p1 = scmp.ge.s32.totalorder %s29_s24, 2  ;;  %p236_p2 = scmp.lt.s32.totalorder %s1335_s23, 3 }
   0x5   : > { %s1799_s24 = smov (%p31_p1, %s29_s24), 0  ;;  %p237_p3 = pnand %p1154_p0, %p236_p2 }
   0x6   : > { %p282_p4 = scmp.lt.s32.totalorder (!%p237_p3), %s1327_s21, 1 }
   0x7   : > { %240 = sbr.rel (%p237_p3) target bundleno = 579 (0x243), region = 36 }
   0xc   : > { %v389_v0 = vld [vmem:[%s1790_s1 + $0x20] sm:$0xff]  ;;  %v387_v1 = vld [vmem:[%s1790_s1 + $0x10] sm:$0xff]  ;;  %v1337_v3 = vmov 0   ;;  %v390_v4 = vld [vmem:[%s1790_s1 + $0x28] sm:$0xff]  ;;  %s1801_s21 = smov (!%p282_p4, %s1327_s21), 1  ;;  %vm312_vm0 = vcmask 7168  }
   0xd   : > { %v385_v2 = vld [vmem:[%s1790_s1] sm:$0xff]  ;;  %1312 = vset.pattern.permute.xlu2 %v1337_v3  ;;  %1311 = vset.pattern.permute.xlu1 %v1337_v3  ;;  %v388_v5 = vld [vmem:[%s1790_s1 + $0x18] sm:$0xff]  ;;  %v386_v6 = vld [vmem:[%s1790_s1 + $0x8] sm:$0xff]  ;;  %s1181_s9 = sshll.u32 %s1801_s21, 7  ;;  %vm943_vm1 = vcmask 64512  }
   0xe   : > { %1310 = vset.pattern.permute.xlu0 %v1337_v3  ;;  %439 = vperm.xlu2 %1312, %v389_v0   ;;  %v393_v7 = vld [vmem:[%s1790_s1 + $0x40] sm:$0xff]  ;;  %v392_v8 = vld [vmem:[%s1790_s1 + $0x38] sm:$0xff]  ;;  %v391_v9 = vld [vmem:[%s1790_s1 + $0x30] sm:$0xff]  ;;  %s1636_s12 = scalar_lea.vmem %s1789_s0, %s1181_s9  ;;  %s1182_s9 = sshll.u32 %s1801_s21, 5 }
   0xf   : > { %429 = vperm.xlu1 %1311, %v387_v1   ;;  %419 = vperm.xlu0 %1310, %v385_v2   ;;  %v396_v10 = vld [vmem:[%s1790_s1 + $0x58] sm:$0xff]  ;;  %v395_v11 = vld [vmem:[%s1790_s1 + $0x50] sm:$0xff]  ;;  %v394_v12 = vld [vmem:[%s1790_s1 + $0x48] sm:$0xff]  ;;  %s1719_s15 = scalar_lea.vmem %s1795_s6, %s1182_s9  ;;  %s1728_s17 = scalar_lea.vmem %s1793_s4, %s1182_s9 }
  0x10   : > { %v399_v13 = vld [vmem:[%s1790_s1 + $0x70] sm:$0xff]  ;;  %v398_v14 = vld [vmem:[%s1790_s1 + $0x68] sm:$0xff]  ;;  %v397_v15 = vld [vmem:[%s1790_s1 + $0x60] sm:$0xff] }
  0x11   : > { %v402_v16 = vld [vmem:[%s1790_s1 + $0x88] sm:$0xff]  ;;  %v401_v17 = vld [vmem:[%s1790_s1 + $0x80] sm:$0xff]  ;;  %v400_v18 = vld [vmem:[%s1790_s1 + $0x78] sm:$0xff] }
  0x12   : > { %v405_v19 = vld [vmem:[%s1790_s1 + $0xa0] sm:$0xff]  ;;  %v404_v20 = vld [vmem:[%s1790_s1 + $0x98] sm:$0xff]  ;;  %v403_v21 = vld [vmem:[%s1790_s1 + $0x90] sm:$0xff] }
  0x13   : > { %v408_v22 = vld [vmem:[%s1790_s1 + $0xb8] sm:$0xff]  ;;  %v407_v23 = vld [vmem:[%s1790_s1 + $0xb0] sm:$0xff]  ;;  %v406_v24 = vld [vmem:[%s1790_s1 + $0xa8] sm:$0xff] }
  0x14   : > { %v415_v25 = vld [vmem:[%s1790_s1 + $0xf0] sm:$0xff]  ;;  %v410_v26 = vld [vmem:[%s1790_s1 + $0xc8] sm:$0xff]  ;;  %v409_v27 = vld [vmem:[%s1790_s1 + $0xc0] sm:$0xff] }
  0x15   : > { %v624_v28 = vld [vmem:[%s1791_s2 + $0x78] sm:$0xff]  ;;  %v623_v29 = vld [vmem:[%s1791_s2 + $0x70] sm:$0xff]  ;;  %v413_v31 = vld [vmem:[%s1790_s1 + $0xe0] sm:$0xff] }
  0x16   : > { %444 = vperm.xlu2 %1312, %v390_v4   ;;  %v416_v30 = vld [vmem:[%s1790_s1 + $0xf8] sm:$0xff]  ;;  %v639_v33 = vld [vmem:[%s1791_s2 + $0xf0] sm:$0xff]  ;;  %v622_v34 = vld [vmem:[%s1791_s2 + $0x68] sm:$0xff] }
  0x17   : > { %434 = vperm.xlu1 %1311, %v388_v5   ;;  %424 = vperm.xlu0 %1310, %v386_v6   ;;  %v640_v32 = vld [vmem:[%s1791_s2 + $0xf8] sm:$0xff]  ;;  %v621_v35 = vld [vmem:[%s1791_s2 + $0x60] sm:$0xff]  ;;  %v414_v36 = vld [vmem:[%s1790_s1 + $0xe8] sm:$0xff] }
  0x18   : > { %v411_v38 = vld [vmem:[%s1790_s1 + $0xd0] sm:$0xff]  ;;  %v638_v39 = vld [vmem:[%s1791_s2 + $0xe8] sm:$0xff]  ;;  %v637_v40 = vld [vmem:[%s1791_s2 + $0xe0] sm:$0xff] }
  0x19   : > { %v620_v42 = vld [vmem:[%s1791_s2 + $0x58] sm:$0xff]  ;;  %v619_v43 = vld [vmem:[%s1791_s2 + $0x50] sm:$0xff]  ;;  %v617_v46 = vld [vmem:[%s1791_s2 + $0x40] sm:$0xff] }
  0x1a   : > { %v412_v44 = vld [vmem:[%s1790_s1 + $0xd8] sm:$0xff]  ;;  %v635_v48 = vld [vmem:[%s1791_s2 + $0xd0] sm:$0xff]  ;;  %v634_v52 = vld [vmem:[%s1791_s2 + $0xc8] sm:$0xff] }
  0x1b   : > { %v636_v47 = vld [vmem:[%s1791_s2 + $0xd8] sm:$0xff]  ;;  %v633_v53 = vld [vmem:[%s1791_s2 + $0xc0] sm:$0xff]  ;;  %v618_v54 = vld [vmem:[%s1791_s2 + $0x48] sm:$0xff] }
  0x1c   : > { %v631_v58 = vld [vmem:[%s1791_s2 + $0xb0] sm:$0xff]  ;;  %v616_v59 = vld [vmem:[%s1791_s2 + $0x38] sm:$0xff]  ;;  %v614_v0 = vld [vmem:[%s1791_s2 + $0x28] sm:$0xff] }
  0x1d   : > { %v615_v60 = vld [vmem:[%s1791_s2 + $0x30] sm:$0xff]  ;;  %v613_v1 = vld [vmem:[%s1791_s2 + $0x20] sm:$0xff]  ;;  %v632_v2 = vld [vmem:[%s1791_s2 + $0xb8] sm:$0xff] }
  0x1e   : > { %459 = vperm.xlu2 %1312, %v393_v7   ;;  %v611_v6 = vld [vmem:[%s1791_s2 + $0x10] sm:$0xff]  ;;  %v630_v7 = vld [vmem:[%s1791_s2 + $0xa8] sm:$0xff] }
  0x1f   : > { %454 = vperm.xlu1 %1311, %v392_v8   ;;  %449 = vperm.xlu0 %1310, %v391_v9   ;;  %v629_v8 = vld [vmem:[%s1791_s2 + $0xa0] sm:$0xff] }
  0x26   : > { %474 = vperm.xlu2 %1312, %v396_v10  }
  0x27   : > { %469 = vperm.xlu1 %1311, %v395_v11   ;;  %464 = vperm.xlu0 %1310, %v394_v12   ;;  %v628_v12 = vld [vmem:[%s1791_s2 + $0x98] sm:$0xff] }
  0x2e   : > { %489 = vperm.xlu2 %1312, %v399_v13   ;;  %v627_v13 = vld [vmem:[%s1791_s2 + $0x90] sm:$0xff] }
  0x2f   : > { %484 = vperm.xlu1 %1311, %v398_v14   ;;  %479 = vperm.xlu0 %1310, %v397_v15   ;;  %v612_v14 = vld [vmem:[%s1791_s2 + $0x18] sm:$0xff] }
  0x36   : > { %504 = vperm.xlu2 %1312, %v402_v16  }
  0x37   : > { %499 = vperm.xlu1 %1311, %v401_v17   ;;  %494 = vperm.xlu0 %1310, %v400_v18   ;;  %v625_v18 = vld [vmem:[%s1791_s2 + $0x80] sm:$0xff] }
  0x3e   : > { %519 = vperm.xlu2 %1312, %v405_v19   ;;  %v610_v19 = vld [vmem:[%s1791_s2 + $0x8] sm:$0xff] }
  0x3f   : > { %514 = vperm.xlu1 %1311, %v404_v20   ;;  %509 = vperm.xlu0 %1310, %v403_v21   ;;  %v609_v20 = vld [vmem:[%s1791_s2] sm:$0xff] }
  0x46   : > { %534 = vperm.xlu2 %1312, %v408_v22  }
  0x47   : > { %529 = vperm.xlu1 %1311, %v407_v23   ;;  %524 = vperm.xlu0 %1310, %v406_v24   ;;  %v626_v24 = vld [vmem:[%s1791_s2 + $0x88] sm:$0xff] }
  0x4e   : > { %569 = vperm.xlu2 %1312, %v415_v25  }
  0x4f   : > { %544 = vperm.xlu1 %1311, %v410_v26   ;;  %539 = vperm.xlu0 %1310, %v409_v27  }
  0x56   : > { %718 = vperm.xlu2 %1312, %v624_v28   ;;  %v1259_v28 = vld [vmem:[%s1636_s12 + $0x38] sm:$0xff]  }
  0x57   : > { %713 = vperm.xlu1 %1311, %v623_v29   ;;  %574 = vperm.xlu0 %1310, %v416_v30  }
  0x5e   : > { %559 = vperm.xlu2 %1312, %v413_v31   ;;  %v1220_v31 = vunpack.c.h.bf16 %v1259_v28 }
  0x5f   : > { %798 = vperm.xlu1 %1311, %v640_v32   ;;  %793 = vperm.xlu0 %1310, %v639_v33   ;;  %v1219_v32 = vunpack.c.l.bf16 %v1259_v28 }
  0x66   : > { %708 = vperm.xlu2 %1312, %v622_v34  }
  0x67   : > { %703 = vperm.xlu1 %1311, %v621_v35   ;;  %564 = vperm.xlu0 %1310, %v414_v36  }
  0x68   : > { %v1502_v37 = vpop.permute.xlu2 %439 }
  0x6e   : > { %549 = vperm.xlu2 %1312, %v411_v38   ;;  %v1267_v38 = vld [vmem:[%s1636_s12 + $0x78] sm:$0xff]  }
  0x6f   : > { %788 = vperm.xlu1 %1311, %v638_v39   ;;  %783 = vperm.xlu0 %1310, %v637_v40  }
  0x70   : > { %v1513_v41 = vpop.permute.xlu2 %444 }
  0x76   : > { %698 = vperm.xlu2 %1312, %v620_v42  }
  0x77   : > { %693 = vperm.xlu1 %1311, %v619_v43   ;;  %554 = vperm.xlu0 %1310, %v412_v44   ;;  %v1251_v43 = vunpack.c.l.bf16 %v1267_v38 }
  0x78   : > { %v1524_v45 = vpop.permute.xlu2 %459 }
  0x7e   : > { %683 = vperm.xlu2 %1312, %v617_v46  }
  0x7f   : > { %778 = vperm.xlu1 %1311, %v636_v47   ;;  %773 = vperm.xlu0 %1310, %v635_v48   ;;  %v1252_v47 = vunpack.c.h.bf16 %v1267_v38 }
  0x80   : > { %v1535_v49 = vpop.permute.xlu2 %474 }
  0x81   : > { %v1537_v50 = vpop.permute.xlu1 %429  ;;  %v1539_v51 = vpop.permute.xlu0 %419 }
  0x86   : > { %768 = vperm.xlu2 %1312, %v634_v52  }
  0x87   : > { %763 = vperm.xlu1 %1311, %v633_v53   ;;  %688 = vperm.xlu0 %1310, %v618_v54   ;;  %v1258_v53 = vld [vmem:[%s1636_s12 + $0x30] sm:$0xff]  }
  0x88   : > { %v1550_v55 = vpop.permute.xlu2 %489 }
  0x89   : > { %v1552_v56 = vpop.permute.xlu1 %434  ;;  %v1554_v57 = vpop.permute.xlu0 %424  ;;  %v591_v35 = vmul.f32 %v1219_v32, %v1550_v55 }
  0x8e   : > { %753 = vperm.xlu2 %1312, %v631_v58  }
  0x8f   : > { %678 = vperm.xlu1 %1311, %v616_v59   ;;  %673 = vperm.xlu0 %1310, %v615_v60   ;;  %v1216_v60 = vunpack.c.h.bf16 %v1258_v53 }
  0x90   : > { %v1565_v61 = vpop.permute.xlu2 %504 }
  0x91   : > { %v1567_v62 = vpop.permute.xlu1 %454  ;;  %v1569_v63 = vpop.permute.xlu0 %449 }
  0x96   : > { %668 = vperm.xlu2 %1312, %v614_v0  }
  0x97   : > { %663 = vperm.xlu1 %1311, %v613_v1   ;;  %758 = vperm.xlu0 %1310, %v632_v2   ;;  %v1215_v2 = vunpack.c.l.bf16 %v1258_v53  ;;  %v1265_v53 = vld [vmem:[%s1636_s12 + $0x68] sm:$0xff]  }
  0x98   : > { %v1580_v3 = vpop.permute.xlu2 %519 }
  0x99   : > { %v1582_v4 = vpop.permute.xlu1 %469  ;;  %v1584_v5 = vpop.permute.xlu0 %464 }
  0x9e   : > { %653 = vperm.xlu2 %1312, %v611_v6  }
  0x9f   : > { %748 = vperm.xlu1 %1311, %v630_v7   ;;  %743 = vperm.xlu0 %1310, %v629_v8  }
  0xa0   : > { %v1595_v9 = vpop.permute.xlu2 %534 }
  0xa1   : > { %v485_v10 = vpop.permute.xlu1 %484  ;;  %v480_v11 = vpop.permute.xlu0 %479 }
  0xa2   : > { %v590_v8 = vmul.f32 %v1216_v60, %v485_v10 }
  0xa6   : > { %738 = vperm.xlu2 %1312, %v628_v12  }
  0xa7   : > { %733 = vperm.xlu1 %1311, %v627_v13   ;;  %658 = vperm.xlu0 %1310, %v612_v14   ;;  %v589_v13 = vmul.f32 %v1215_v2, %v480_v11  ;;  %v1244_v2 = vunpack.c.h.bf16 %v1265_v53 }
  0xa8   : > { %v570_v15 = vpop.permute.xlu2 %569 }
  0xa9   : > { %v1606_v16 = vpop.permute.xlu1 %499  ;;  %v495_v17 = vpop.permute.xlu0 %494  ;;  %v607_v54 = vmul.f32 %v1251_v43, %v570_v15  ;;  %v1266_v15 = vld [vmem:[%s1636_s12 + $0x70] sm:$0xff]  }
  0xaa   : > { %v592_v34 = vmul.f32 %v1220_v31, %v495_v17  ;;  %v1248_v31 = vunpack.c.h.bf16 %v1266_v15 }
  0xae   : > { %723 = vperm.xlu2 %1312, %v625_v18  }
  0xaf   : > { %648 = vperm.xlu1 %1311, %v610_v19   ;;  %643 = vperm.xlu0 %1310, %v609_v20  }
  0xb0   : > { %v719_v21 = vpop.permute.xlu2 %718 }
  0xb1   : > { %v1617_v22 = vpop.permute.xlu1 %514  ;;  %v1619_v23 = vpop.permute.xlu0 %509  ;;  %v816_v36 = vadd.f32 %v719_v21, %v592_v34  ;;  %v1247_v21 = vunpack.c.l.bf16 %v1266_v15  ;;  %v1257_v34 = vld [vmem:[%s1636_s12 + $0x28] sm:$0xff]  }
  0xb3   : > { %v848_v44 = vmax.f32 %v816_v36, 0.0 }
  0xb7   : > { %728 = vperm.xlu0 %1310, %v626_v24  }
  0xb8   : > { %v560_v27 = vpop.permute.xlu2 %559 }
  0xb9   : > { %v1628_v25 = vpop.permute.xlu1 %529  ;;  %v1630_v26 = vpop.permute.xlu0 %524 }
  0xc0   : > { %v709_v33 = vpop.permute.xlu2 %708 }
  0xc1   : > { %v1639_v29 = vpop.permute.xlu1 %544  ;;  %v1641_v30 = vpop.permute.xlu0 %539  ;;  %v814_v14 = vadd.f32 %v709_v33, %v590_v8  ;;  %v1212_v33 = vunpack.c.h.bf16 %v1257_v34 }
  0xc3   : > { %v846_v24 = vmax.f32 %v814_v14, 0.0 }
  0xc8   : > { %v1645_v48 = vpop.permute.xlu2 %549 }
  0xc9   : > { %v714_v39 = vpop.permute.xlu1 %713  ;;  %v575_v40 = vpop.permute.xlu0 %574 }
  0xca   : > { %v815_v42 = vadd.f32 %v714_v39, %v591_v35  ;;  %v608_v58 = vmul.f32 %v1252_v47, %v575_v40  ;;  %v605_v35 = vmul.f32 %v1247_v21, %v560_v27 }
  0xcc   : > { %v847_v46 = vmax.f32 %v815_v42, 0.0  ;;  %v1211_v42 = vunpack.c.l.bf16 %v1257_v34 }
  0xce   : > { %v876_v52 = vpack.c.bf16 %v848_v44, %v847_v46  ;;  %v588_v46 = vmul.f32 %v1212_v33, %v1535_v49  ;;  %v587_v27 = vmul.f32 %v1211_v42, %v1582_v4  ;;  %v1264_v49 = vld [vmem:[%s1636_s12 + $0x60] sm:$0xff]  }
  0xd0   : > { %905 = vmatpush.bf16.msra.mxu0 %v876_v52  ;;  %1268 = vmatpush.bf16.msra.mxu2 %v876_v52  ;;  %v699_v17 = vpop.permute.xlu2 %698 }
  0xd1   : > { %v799_v59 = vpop.permute.xlu1 %798  ;;  %v794_v55 = vpop.permute.xlu0 %793  ;;  %v812_v52 = vadd.f32 %v699_v17, %v588_v46  ;;  %v1240_v17 = vunpack.c.h.bf16 %v1264_v49 }
  0xd2   : > { %v832_v0 = vadd.f32 %v799_v59, %v608_v58  ;;  %v831_v1 = vadd.f32 %v794_v55, %v607_v54  ;;  %v1243_v55 = vunpack.c.l.bf16 %v1265_v53 }
  0xd3   : > { %v844_v60 = vmax.f32 %v812_v52, 0.0  ;;  %v1254_v52 = vld [vmem:[%s1636_s12 + $0x10] sm:$0xff]  }
  0xd4   : > { %v864_v6 = vmax.f32 %v832_v0, 0.0  ;;  %v863_v7 = vmax.f32 %v831_v1, 0.0  ;;  %v603_v8 = vmul.f32 %v1243_v55, %v1645_v48  ;;  %v1200_v55 = vunpack.c.h.bf16 %v1254_v52 }
  0xd6   : > { %v884_v12 = vpack.c.bf16 %v864_v6, %v863_v7  ;;  %v1256_v7 = vld [vmem:[%s1636_s12 + $0x20] sm:$0xff]  }
  0xd7   : > { %v1207_v14 = vunpack.c.l.bf16 %v1256_v7 }
  0xd8   : > { %924 = vmatpush.bf16.msra.mxu1 %v884_v12  ;;  %1276 = vmatpush.bf16.msra.mxu3 %v884_v12  ;;  %v684_v38 = vpop.permute.xlu2 %683 }
  0xd9   : > { %v704_v18 = vpop.permute.xlu1 %703  ;;  %v565_v19 = vpop.permute.xlu0 %564 }
  0xda   : > { %v813_v20 = vadd.f32 %v704_v18, %v589_v13  ;;  %v606_v36 = vmul.f32 %v1248_v31, %v565_v19  ;;  %v1208_v19 = vunpack.c.h.bf16 %v1256_v7  ;;  %v602_v31 = vmul.f32 %v1240_v17, %v1639_v29 }
  0xdc   : > { %v845_v28 = vmax.f32 %v813_v20, 0.0  ;;  %v1239_v20 = vunpack.c.l.bf16 %v1264_v49  ;;  %v586_v34 = vmul.f32 %v1208_v19, %v1584_v5 }
  0xde   : > { %v875_v32 = vpack.c.bf16 %v846_v24, %v845_v28  ;;  %v585_v28 = vmul.f32 %v1207_v14, %v1524_v45 }
  0xe0   : > { %906 = vmatpush.bf16.msra.mxu0 %v875_v32  ;;  %1269 = vmatpush.bf16.msra.mxu2 %v875_v32  ;;  %v769_v0 = vpop.permute.xlu2 %768 }
  0xe1   : > { %v789_v10 = vpop.permute.xlu1 %788  ;;  %v784_v11 = vpop.permute.xlu0 %783 }
  0xe2   : > { %v830_v39 = vadd.f32 %v789_v10, %v606_v36  ;;  %v829_v40 = vadd.f32 %v784_v11, %v605_v35  ;;  %v1255_v35 = vld [vmem:[%s1636_s12 + $0x18] sm:$0xff]   ;;  %v601_v36 = vmul.f32 %v1239_v20, %v1641_v30  ;;  %v809_v10 = vadd.f32 %v684_v38, %v585_v28 }
  0xe3   : > { %v826_v11 = vadd.f32 %v769_v0, %v602_v31  ;;  %v1204_v45 = vunpack.c.h.bf16 %v1255_v35 }
  0xe4   : > { %v862_v43 = vmax.f32 %v830_v39, 0.0  ;;  %v861_v44 = vmax.f32 %v829_v40, 0.0  ;;  %v841_v29 = vmax.f32 %v809_v10, 0.0 }
  0xe5   : > { %v584_v30 = vmul.f32 %v1204_v45, %v1567_v62  ;;  %v582_v62 = vmul.f32 %v1200_v55, %v1513_v41 }
  0xe6   : > { %v883_v47 = vpack.c.bf16 %v862_v43, %v861_v44  ;;  %v1203_v43 = vunpack.c.l.bf16 %v1255_v35  ;;  %v858_v44 = vmax.f32 %v826_v11, 0.0 }
  0xe8   : > { %925 = vmatpush.bf16.msra.mxu1 %v883_v47  ;;  %1277 = vmatpush.bf16.msra.mxu3 %v883_v47  ;;  %v754_v32 = vpop.permute.xlu2 %753  ;;  %v583_v38 = vmul.f32 %v1203_v43, %v1569_v63 }
  0xe9   : > { %v694_v54 = vpop.permute.xlu1 %693  ;;  %v555_v58 = vpop.permute.xlu0 %554 }
  0xea   : > { %v811_v59 = vadd.f32 %v694_v54, %v587_v27  ;;  %v604_v12 = vmul.f32 %v1244_v2, %v555_v58  ;;  %v1263_v54 = vld [vmem:[%s1636_s12 + $0x58] sm:$0xff]   ;;  %v1199_v2 = vunpack.c.l.bf16 %v1254_v52 }
  0xec   : > { %v843_v1 = vmax.f32 %v811_v59, 0.0 }
  0xee   : > { %v874_v6 = vpack.c.bf16 %v844_v60, %v843_v1  ;;  %v1235_v60 = vunpack.c.l.bf16 %v1263_v54 }
  0xf0   : > { %907 = vmatpush.bf16.msra.mxu0 %v874_v6  ;;  %1270 = vmatpush.bf16.msra.mxu2 %v874_v6  ;;  %v669_v53 = vpop.permute.xlu2 %668  ;;  %v1236_v6 = vunpack.c.h.bf16 %v1263_v54  ;;  %v599_v63 = vmul.f32 %v1235_v60, %v1628_v25 }
  0xf1   : > { %v779_v4 = vpop.permute.xlu1 %778  ;;  %v774_v13 = vpop.permute.xlu0 %773  ;;  %v806_v17 = vadd.f32 %v669_v53, %v582_v62 }
  0xf2   : > { %v828_v15 = vadd.f32 %v779_v4, %v604_v12  ;;  %v827_v18 = vadd.f32 %v774_v13, %v603_v8  ;;  %v581_v12 = vmul.f32 %v1199_v2, %v1502_v37  ;;  %v1262_v4 = vld [vmem:[%s1636_s12 + $0x50] sm:$0xff]   ;;  %v600_v13 = vmul.f32 %v1236_v6, %v1595_v9  ;;  %v1253_v9 = vld [vmem:[%s1636_s12 + $0x8] sm:$0xff]  }
  0xf3   : > { %v823_v14 = vadd.f32 %v754_v32, %v599_v63  ;;  %v1232_v41 = vunpack.c.h.bf16 %v1262_v4  ;;  %v838_v28 = vmax.f32 %v806_v17, 0.0  ;;  %v1261_v32 = vld [vmem:[%s1636_s12 + $0x48] sm:$0xff]   ;;  %v1196_v45 = vunpack.c.h.bf16 %v1253_v9  ;;  %v1173_v17 = vld [vmem:[%s1792_s3 + $0x10] sm:$0xf] }
  0xf4   : > { %v860_v21 = vmax.f32 %v828_v15, 0.0  ;;  %v859_v24 = vmax.f32 %v827_v18, 0.0  ;;  %v1227_v43 = vunpack.c.l.bf16 %v1261_v32 }
  0xf5   : > { %v855_v25 = vmax.f32 %v823_v14, 0.0 }
  0xf6   : > { %v882_v48 = vpack.c.bf16 %v860_v21, %v859_v24  ;;  %v1231_v21 = vunpack.c.l.bf16 %v1262_v4  ;;  %v595_v52 = vmul.f32 %v1227_v43, %v1619_v23  ;;  %v1165_v4 = vld [vmem:[%s1792_s3] sm:$0xf] }
  0xf8   : > { %926 = vmatpush.bf16.msra.mxu1 %v882_v48  ;;  %1278 = vmatpush.bf16.msra.mxu3 %v882_v48  ;;  %v654_v24 = vpop.permute.xlu2 %653  ;;  %v597_v35 = vmul.f32 %v1231_v21, %v1580_v3 }
  0xf9   : > { %v764_v33 = vpop.permute.xlu1 %763  ;;  %v689_v39 = vpop.permute.xlu0 %688 }
  0xfa   : > { %v825_v40 = vadd.f32 %v764_v33, %v601_v36  ;;  %v810_v42 = vadd.f32 %v689_v39, %v586_v34  ;;  %v598_v36 = vmul.f32 %v1232_v41, %v1630_v26  ;;  %v1195_v33 = vunpack.c.l.bf16 %v1253_v9  ;;  %v1175_v9 = vld [vmem:[%s1792_s3 + $0x18] sm:$0xf0] }
  0xfb   : > { %v1228_v39 = vunpack.c.h.bf16 %v1261_v32 }
  0xfc   : > { %v857_v46 = vmax.f32 %v825_v40, 0.0  ;;  %v842_v47 = vmax.f32 %v810_v42, 0.0  ;;  %v579_v3 = vmul.f32 %v1195_v33, %v1537_v50 }
  0xfd   : > { %v596_v26 = vmul.f32 %v1228_v39, %v1617_v22 }
  0xfe   : > { %v873_v5 = vpack.c.bf16 %v842_v47, %v841_v29  ;;  %v881_v27 = vpack.c.bf16 %v858_v44, %v857_v46 }
 0x100   : > { %908 = vmatpush.bf16.msra.mxu0 %v873_v5  ;;  %1271 = vmatpush.bf16.msra.mxu2 %v873_v5  ;;  %v739_v46 = vpop.permute.xlu2 %738  ;;  %v580_v5 = vmul.f32 %v1196_v45, %v1552_v56 }
 0x101   : > { %927 = vmatpush.bf16.msra.mxu1 %v881_v27  ;;  %1279 = vmatpush.bf16.msra.mxu3 %v881_v27  ;;  %v679_v58 = vpop.permute.xlu1 %678  ;;  %v674_v59 = vpop.permute.xlu0 %673  ;;  %v1190_v27 = vld [vmem:[%s1636_s12] sm:$0xff]  }
 0x102   : > { %v808_v0 = vadd.f32 %v679_v58, %v584_v30  ;;  %v807_v1 = vadd.f32 %v674_v59, %v583_v38  ;;  %v803_v30 = vadd.f32 %v654_v24, %v579_v3  ;;  %v820_v38 = vadd.f32 %v739_v46, %v596_v26 }
 0x103   : > { %v1191_v55 = vunpack.c.l.bf16 %v1190_v27  ;;  %v1192_v60 = vunpack.c.h.bf16 %v1190_v27 }
 0x104   : > { %v840_v7 = vmax.f32 %v808_v0, 0.0  ;;  %v839_v49 = vmax.f32 %v807_v1, 0.0  ;;  %v835_v50 = vmax.f32 %v803_v30, 0.0  ;;  %v852_v0 = vmax.f32 %v820_v38, 0.0 }
 0x105   : > { %v577_v6 = vmul.f32 %v1191_v55, %v1539_v51  ;;  %v578_v23 = vmul.f32 %v1192_v60, %v1554_v57  ;;  %v1186_v51 = vld [vmem:[%s1792_s3 + $0x4] sm:$0xf0] }
 0x106   : > { %v872_v8 = vpack.c.bf16 %v840_v7, %v839_v49  ;;  %v1260_v7 = vld [vmem:[%s1636_s12 + $0x40] sm:$0xff]   ;;  %v1166_v21 = vor.u32 %v1186_v51, %v1165_v4  ;;  %s1712_s12 = scalar_lea.vmem %s1794_s5, %s1182_s9 }
 0x107   : > { %v1223_v63 = vunpack.c.l.bf16 %v1260_v7 }
 0x108   : > { %909 = vmatpush.bf16.msra.mxu0 %v872_v8  ;;  %1272 = vmatpush.bf16.msra.mxu2 %v872_v8 }
 0x109   : > { %v664_v15 = vpop.permute.xlu1 %663  ;;  %v759_v18 = vpop.permute.xlu0 %758 }
 0x10a   : > { %v805_v19 = vadd.f32 %v664_v15, %v581_v12  ;;  %v824_v20 = vadd.f32 %v759_v18, %v600_v13  ;;  %v1224_v13 = vunpack.c.h.bf16 %v1260_v7  ;;  %v1188_v15 = vld [vmem:[%s1792_s3 + $0x14] sm:$0xf0]  ;;  %v724_v18 = vpop.permute.xlu2 %723 }
 0x10b   : > { %v1174_v41 = vor.u32 %v1188_v15, %v1173_v17 }
 0x10c   : > { %v837_v31 = vmax.f32 %v805_v19, 0.0  ;;  %v856_v37 = vmax.f32 %v824_v20, 0.0  ;;  %v593_v19 = vmul.f32 %v1223_v63, %v1606_v16  ;;  %v594_v24 = vmul.f32 %v1224_v13, %v1565_v61  ;;  %v1167_v16 = vld [vmem:[%s1792_s3 + $0x8] sm:$0xf0]  ;;  %v1187_v61 = vld [vmem:[%s1792_s3 + $0x14] sm:$0xf] }
 0x10e   : > { %v871_v48 = vpack.c.bf16 %v838_v28, %v837_v31  ;;  %v880_v34 = vpack.c.bf16 %v856_v37, %v855_v25  ;;  %v817_v25 = vadd.f32 %v724_v18, %v593_v19  ;;  %v1185_v37 = vld [vmem:[%s1792_s3 + $0x4] sm:$0xf] }
 0x110   : > { %910 = vmatpush.bf16.msra.mxu0 %v871_v48  ;;  %1273 = vmatpush.bf16.msra.mxu2 %v871_v48  ;;  %v849_v48 = vmax.f32 %v817_v25, 0.0 }
 0x111   : > { %928 = vmatpush.bf16.msra.mxu1 %v880_v34  ;;  %1280 = vmatpush.bf16.msra.mxu3 %v880_v34  ;;  %v749_v10 = vpop.permute.xlu1 %748  ;;  %v744_v11 = vpop.permute.xlu0 %743 }
 0x112   : > { %v822_v40 = vadd.f32 %v749_v10, %v598_v36  ;;  %v821_v42 = vadd.f32 %v744_v11, %v597_v35  ;;  %v1170_v35 = vor.u32 %v1185_v37, %v1167_v16  ;;  %v1178_v36 = vor.u32 %v1187_v61, %v1175_v9 }
 0x113   : > { %v1338_v10 = vmov 0.0  }
 0x114   : > { %v854_v29 = vmax.f32 %v822_v40, 0.0  ;;  %v853_v44 = vmax.f32 %v821_v42, 0.0  ;;  %313 = vst.msk [vmem:[%s1712_s12] sm:$0xff] %vm312_vm0, %v1338_v10 }
 0x115   : > { %314 = vst.msk [vmem:[%s1712_s12 + $0x8] sm:$0xff] %vm312_vm0, %v1338_v10 }
 0x116   : > { %v879_v47 = vpack.c.bf16 %v854_v29, %v853_v44  ;;  %315 = vst.msk [vmem:[%s1712_s12 + $0x10] sm:$0xff] %vm312_vm0, %v1338_v10 }
 0x117   : > { %316 = vst.msk [vmem:[%s1712_s12 + $0x18] sm:$0xff] %vm312_vm0, %v1338_v10 }
 0x118   : > { %929 = vmatpush.bf16.msra.mxu1 %v879_v47  ;;  %1281 = vmatpush.bf16.msra.mxu3 %v879_v47  ;;  %317 = vst.msk [vmem:[%s1719_s15] sm:$0xff] %vm312_vm0, %v1338_v10 }
 0x119   : > { %v734_v53 = vpop.permute.xlu1 %733  ;;  %v659_v54 = vpop.permute.xlu0 %658  ;;  %318 = vst.msk [vmem:[%s1719_s15 + $0x8] sm:$0xff] %vm312_vm0, %v1338_v10 }
 0x11a   : > { %v819_v58 = vadd.f32 %v734_v53, %v595_v52  ;;  %v804_v59 = vadd.f32 %v659_v54, %v580_v5  ;;  %319 = vst.msk [vmem:[%s1719_s15 + $0x10] sm:$0xff] %vm312_vm0, %v1338_v10 }
 0x11b   : > { %320 = vst.msk [vmem:[%s1719_s15 + $0x18] sm:$0xff] %vm312_vm0, %v1338_v10 }
 0x11c   : > { %v851_v22 = vmax.f32 %v819_v58, 0.0  ;;  %v836_v1 = vmax.f32 %v804_v59, 0.0 }
 0x11e   : > { %v870_v2 = vpack.c.bf16 %v836_v1, %v835_v50  ;;  %v878_v56 = vpack.c.bf16 %v852_v0, %v851_v22  ;;  %v948_v50 = vld [vmem:[%s1712_s12] sm:$0xff]  ;;  %v950_v1 = vld [vmem:[%s1712_s12 + $0x10] sm:$0xff]  ;;  %v951_v51 = vld [vmem:[%s1712_s12 + $0x18] sm:$0xff] }
 0x120   : > { %911 = vmatpush.bf16.msra.mxu0 %v870_v2  ;;  %1274 = vmatpush.bf16.msra.mxu2 %v870_v2  ;;  %v974_v18 = vld [vmem:[%s1719_s15 + $0x8] sm:$0xff] }
 0x121   : > { %930 = vmatpush.bf16.msra.mxu1 %v878_v56  ;;  %1282 = vmatpush.bf16.msra.mxu3 %v878_v56  ;;  %v649_v49 = vpop.permute.xlu1 %648  ;;  %v644_v62 = vpop.permute.xlu0 %643  ;;  %v973_v56 = vld [vmem:[%s1719_s15] sm:$0xff] }
 0x122   : > { %v802_v8 = vadd.f32 %v649_v49, %v578_v23  ;;  %v801_v12 = vadd.f32 %v644_v62, %v577_v6  ;;  %v949_v6 = vld [vmem:[%s1712_s12 + $0x8] sm:$0xff]  ;;  %v976_v4 = vld [vmem:[%s1719_s15 + $0x18] sm:$0xff] }
 0x124   : > { %v834_v57 = vmax.f32 %v802_v8, 0.0  ;;  %v833_v14 = vmax.f32 %v801_v12, 0.0  ;;  %v975_v8 = vld [vmem:[%s1719_s15 + $0x10] sm:$0xff] }
 0x126   : > { %v869_v20 = vpack.c.bf16 %v834_v57, %v833_v14 }
 0x128   : > { %912 = vmatpush.bf16.msra.mxu0 %v869_v20  ;;  %1275 = vmatpush.bf16.msra.mxu2 %v869_v20 }
 0x129   : > { %v729_v28 = vpop.permute.xlu0 %728 }
 0x12a   : > { %v818_v31 = vadd.f32 %v729_v28, %v594_v24 }
 0x12b   : > { %913 = vmatmul.bf16.vlgmr.msra.gmra.mxu0 %v1166_v21  ;;  %918 = vmatmul.bf16.vlgmr.msra.gmra.mxu2 %v1174_v41 }
 0x12c   : > { %v850_v34 = vmax.f32 %v818_v31, 0.0 }
 0x12e   : > { %v877_v32 = vpack.c.bf16 %v850_v34, %v849_v48 }
 0x130   : > { %931 = vmatpush.bf16.msra.mxu1 %v877_v32  ;;  %1283 = vmatpush.bf16.msra.mxu3 %v877_v32 }
 0x133   : > { %932 = vmatmul.bf16.vlgmr.msra.gmra.mxu1 %v1170_v35  ;;  %937 = vmatmul.bf16.vlgmr.msra.gmra.mxu3 %v1178_v36 }
 0x1a8   : > { %v914_v11 = vpop.f32.mrf.mxu0 }
 0x1ae   : > { %v919_v42 = vpop.f32.mrf.mxu2 }
 0x1b0   : > { %v933_v33 = vpop.f32.mrf.mxu1  ;;  %v916_v44 = vpop.f32.mrf.mxu0 }
 0x1b1   : > { %v934_v39 = vadd.f32 %v933_v33, %v914_v11 }
 0x1b3   : > { %944 = vst.msk [vmem:[%s1728_s17] sm:$0xff] %vm943_vm1, %v934_v39  ;;  %v952_v40 = vsel %vm943_vm1, %v934_v39, 0.0  ;;  %v977_v29 = vmul.f32 %v934_v39, %v934_v39 }
 0x1b4   : > { %953 = vadd.xlane.f32.xlu1 %v952_v40 }
 0x1b5   : > { %v981_v47 = vsel %vm943_vm1, %v977_v29, 0.0 }
 0x1b6   : > { %v938_v45 = vpop.f32.mrf.mxu3  ;;  %v921_v52 = vpop.f32.mrf.mxu2 }
 0x1b7   : > { %v939_v43 = vadd.f32 %v938_v45, %v919_v42 }
 0x1b8   : > { %v935_v46 = vpop.f32.mrf.mxu1 }
 0x1b9   : > { %946 = vst.msk [vmem:[%s1728_s17 + $0x10] sm:$0xff] %vm943_vm1, %v939_v43  ;;  %v936_v3 = vadd.f32 %v935_v46, %v916_v44  ;;  %v958_v26 = vsel %vm943_vm1, %v939_v43, 0.0  ;;  %v979_v27 = vmul.f32 %v939_v43, %v939_v43 }
 0x1ba   : > { %959 = vadd.xlane.f32.xlu0 %v958_v26 }
 0x1bb   : > { %945 = vst.msk [vmem:[%s1728_s17 + $0x8] sm:$0xff] %vm943_vm1, %v936_v3  ;;  %v955_v5 = vsel %vm943_vm1, %v936_v3, 0.0  ;;  %v987_v53 = vsel %vm943_vm1, %v979_v27, 0.0  ;;  %v978_v55 = vmul.f32 %v936_v3, %v936_v3 }
 0x1bc   : > { %982 = vadd.xlane.f32.xlu1 %v981_v47  ;;  %956 = vadd.xlane.f32.xlu2 %v955_v5 }
 0x1bd   : > { %v984_v60 = vsel %vm943_vm1, %v978_v55, 0.0 }
 0x1be   : > { %v940_v30 = vpop.f32.mrf.mxu3 }
 0x1bf   : > { %v941_v38 = vadd.f32 %v940_v30, %v921_v52 }
 0x1c1   : > { %947 = vst.msk [vmem:[%s1728_s17 + $0x18] sm:$0xff] %vm943_vm1, %v941_v38  ;;  %v980_v54 = vmul.f32 %v941_v38, %v941_v38  ;;  %v961_v59 = vsel %vm943_vm1, %v941_v38, 0.0 }
 0x1c2   : > { %988 = vadd.xlane.f32.xlu0 %v987_v53 }
 0x1c3   : > { %v990_v58 = vsel %vm943_vm1, %v980_v54, 0.0 }
 0x1c4   : > { %991 = vadd.xlane.f32.xlu1 %v990_v58  ;;  %962 = vadd.xlane.f32.xlu2 %v961_v59 }
 0x1cc   : > { %985 = vadd.xlane.f32.xlu2 %v984_v60 }
 0x227   : > { %v954_v0 = vpop.xlane.xlu1 %953 }
 0x228   : > { %v964_v22 = vadd.f32 %v954_v0, %v948_v50 }
 0x22a   : > { %969 = vst.msk [vmem:[%s1712_s12] sm:$0xff] %vm312_vm0, %v964_v22 }
 0x22d   : > { %v960_v2 = vpop.xlane.xlu0 %959 }
 0x22e   : > { %v966_v23 = vadd.f32 %v960_v2, %v950_v1 }
 0x22f   : > { %v983_v7 = vpop.xlane.xlu1 %982  ;;  %v957_v49 = vpop.xlane.xlu2 %956 }
 0x230   : > { %971 = vst.msk [vmem:[%s1712_s12 + $0x10] sm:$0xff] %vm312_vm0, %v966_v23  ;;  %v993_v62 = vadd.f32 %v983_v7, %v973_v56  ;;  %v965_v63 = vadd.f32 %v957_v49, %v949_v6 }
 0x232   : > { %997 = vst.msk [vmem:[%s1719_s15] sm:$0xff] %vm312_vm0, %v993_v62 }
 0x233   : > { %970 = vst.msk [vmem:[%s1712_s12 + $0x8] sm:$0xff] %vm312_vm0, %v965_v63 }
 0x235   : > { %v989_v12 = vpop.xlane.xlu0 %988 }
 0x236   : > { %v995_v13 = vadd.f32 %v989_v12, %v975_v8 }
 0x237   : > { %v992_v57 = vpop.xlane.xlu1 %991  ;;  %v963_v14 = vpop.xlane.xlu2 %962 }
 0x238   : > { %999 = vst.msk [vmem:[%s1719_s15 + $0x10] sm:$0xff] %vm312_vm0, %v995_v13  ;;  %v996_v17 = vadd.f32 %v992_v57, %v976_v4  ;;  %v967_v15 = vadd.f32 %v963_v14, %v951_v51 }
 0x23a   : > { %1000 = vst.msk [vmem:[%s1719_s15 + $0x18] sm:$0xff] %vm312_vm0, %v996_v17 }
 0x23b   : > { %972 = vst.msk [vmem:[%s1712_s12 + $0x18] sm:$0xff] %vm312_vm0, %v967_v15 }
 0x23f   : > { %v986_v19 = vpop.xlane.xlu2 %985 }
 0x240   : > { %v994_v20 = vadd.f32 %v986_v19, %v974_v18 }
 0x242   : > { %998 = vst.msk [vmem:[%s1719_s15 + $0x8] sm:$0xff] %vm312_vm0, %v994_v20 }
 0x243 PF: > { %s17_s23 = sadd.s32 1, %s1335_s23   ;;  %s1796_s21 = smov %s1331_s22 }
 0x244   : > { %p14_p5 = scmp.ge.s32.totalorder %s17_s23, 4   ;;  %s1797_s22 = smov %s1799_s24 }
 0x246   :  { %16 = sbr.rel (!%p14_p5) target bundleno = 2 (0x2), region = 94 }

// kernel: mlp512_32_forward.5
= control target key start
LH: loop header
LB: loop body
LE: loop exit
PB: predicated region body
PF: predicated region fallthrough
CT: control target
= control target key end

     0   :  { %s440_s12 = smov 0   ;;  %s442_s13 = smov 0   ;;  %s505_s0 = inlined_call_operand.vmem [shape: f32[2,32,8], index: 0, kind: input, shape index: {}]   ;;  %s506_s1 = inlined_call_operand.vmem [shape: f32[32,1], index: 1, kind: input, shape index: {}]   ;;  %s507_s2 = inlined_call_operand.vmem [shape: f32[32,1], index: 2, kind: input, shape index: {}]   ;;  %s508_s3 = inlined_call_operand.vmem [shape: f32[2,32,8], index: 3, kind: output, shape index: {}]  }
   0x1   :  { %s444_s14 = smov 0  }
   0x2 LB: > { %s25_s15 = sadd.s32 1, %s413_s13  ;;  %p358_p0 = scmp.ge.s32.totalorder %s417_s14, 1  ;;  %s417_s14 = sphi %s444_s14, %s13_s14   ;;  %s413_s13 = sphi %s442_s13, %s510_s13   ;;  %s409_s12 = sphi %s440_s12, %s509_s12  }
   0x3   : > { %p27_p1 = scmp.ge.s32.totalorder %s25_s15, 2  ;;  %p156_p2 = scmp.lt.s32.totalorder %s417_s14, 3 }
   0x5   : > { %s512_s15 = smov (%p27_p1, %s25_s15), 0  ;;  %p157_p3 = pnand %p358_p0, %p156_p2 }
   0x6   : > { %p186_p4 = scmp.lt.s32.totalorder (!%p157_p3), %s409_s12, 1 }
   0x7   : > { %160 = sbr.rel (%p157_p3) target bundleno = 151 (0x97), region = 32 }
   0xc   : > { %v208_v0 = vld [vmem:[%s506_s1 + $0x10] sm:$0xff]  ;;  %v206_v1 = vld [vmem:[%s506_s1] sm:$0xff]  ;;  %v419_v2 = vmov 0   ;;  %v209_v4 = vld [vmem:[%s506_s1 + $0x18] sm:$0xff]  ;;  %s514_s12 = smov (!%p186_p4, %s409_s12), 1  ;;  %vm266_vm0 = vcmask 64512  }
   0xd   : > { %393 = vset.pattern.permute.xlu1 %v419_v2  ;;  %392 = vset.pattern.permute.xlu0 %v419_v2  ;;  %v234_v3 = vld [vmem:[%s507_s2] sm:$0xff]  ;;  %v207_v5 = vld [vmem:[%s506_s1 + $0x8] sm:$0xff]  ;;  %v237_v7 = vld [vmem:[%s507_s2 + $0x18] sm:$0xff]  ;;  %s365_s5 = sshll.u32 %s514_s12, 5 }
   0xe   : > { %222 = vperm.xlu1 %393, %v208_v0   ;;  %212 = vperm.xlu0 %392, %v206_v1   ;;  %v235_v6 = vld [vmem:[%s507_s2 + $0x8] sm:$0xff]  ;;  %v236_v8 = vld [vmem:[%s507_s2 + $0x10] sm:$0xff]  ;;  %s193_s8 = scalar_lea.vmem %s505_s0, %s365_s5  ;;  %s201_s11 = scalar_lea.vmem %s508_s3, %s365_s5 }
   0xf   : > { %394 = vset.pattern.permute.xlu2 %v419_v2  ;;  %v202_v9 = vld [vmem:[%s193_s8] sm:$0xff]  ;;  %v203_v16 = vld [vmem:[%s193_s8 + $0x8] sm:$0xff]  ;;  %v204_v22 = vld [vmem:[%s193_s8 + $0x10] sm:$0xff] }
  0x10   : > { %240 = vperm.xlu2 %394, %v234_v3   ;;  %v205_v23 = vld [vmem:[%s193_s8 + $0x18] sm:$0xff] }
  0x16   : > { %227 = vperm.xlu1 %393, %v209_v4   ;;  %217 = vperm.xlu0 %392, %v207_v5  }
  0x18   : > { %245 = vperm.xlu2 %394, %v235_v6  }
  0x1e   : > { %255 = vperm.xlu1 %393, %v237_v7   ;;  %250 = vperm.xlu0 %392, %v236_v8  }
  0x6a   : > { %v241_v10 = vpop.permute.xlu2 %240 }
  0x72   : > { %v246_v20 = vpop.permute.xlu2 %245 }
  0x80   : > { %v223_v11 = vpop.permute.xlu1 %222  ;;  %v213_v12 = vpop.permute.xlu0 %212 }
  0x81   : > { %v230_v13 = vmul.f32 %v213_v12, %v202_v9  ;;  %v232_v25 = vmul.f32 %v223_v11, %v204_v22 }
  0x83   : > { %v258_v14 = vadd.f32 %v241_v10, %v230_v13 }
  0x85   : > { %v262_v15 = vmax.f32 %v258_v14, 0.0 }
  0x87   : > { %267 = vst.msk [vmem:[%s201_s11] sm:$0xff] %vm266_vm0, %v262_v15 }
  0x88   : > { %v228_v17 = vpop.permute.xlu1 %227  ;;  %v218_v18 = vpop.permute.xlu0 %217 }
  0x89   : > { %v231_v19 = vmul.f32 %v218_v18, %v203_v16  ;;  %v233_v26 = vmul.f32 %v228_v17, %v205_v23 }
  0x8b   : > { %v259_v21 = vadd.f32 %v246_v20, %v231_v19 }
  0x8d   : > { %v263_v24 = vmax.f32 %v259_v21, 0.0 }
  0x8f   : > { %268 = vst.msk [vmem:[%s201_s11 + $0x8] sm:$0xff] %vm266_vm0, %v263_v24 }
  0x90   : > { %v256_v27 = vpop.permute.xlu1 %255  ;;  %v251_v28 = vpop.permute.xlu0 %250 }
  0x91   : > { %v261_v29 = vadd.f32 %v256_v27, %v233_v26  ;;  %v260_v30 = vadd.f32 %v251_v28, %v232_v25 }
  0x93   : > { %v265_v31 = vmax.f32 %v261_v29, 0.0  ;;  %v264_v32 = vmax.f32 %v260_v30, 0.0 }
  0x95   : > { %270 = vst.msk [vmem:[%s201_s11 + $0x18] sm:$0xff] %vm266_vm0, %v265_v31 }
  0x96   : > { %269 = vst.msk [vmem:[%s201_s11 + $0x10] sm:$0xff] %vm266_vm0, %v264_v32 }
  0x97 PF: > { %s13_s14 = sadd.s32 1, %s417_s14   ;;  %s509_s12 = smov %s413_s13 }
  0x98   : > { %p10_p5 = scmp.ge.s32.totalorder %s13_s14, 4   ;;  %s510_s13 = smov %s512_s15 }
  0x9a   :  { %12 = sbr.rel (!%p10_p5) target bundleno = 2 (0x2), region = 62 }

// kernel: mlp512_32_forward.3
= control target key start
LH: loop header
LB: loop body
LE: loop exit
PB: predicated region body
PF: predicated region fallthrough
CT: control target
= control target key end

     0   :  { %s2205_s15 = smov 0   ;;  %s2207_s16 = smov 0   ;;  %s3228_s0 = inlined_call_operand.vmem [shape: f32[2,512,8], index: 0, kind: input, shape index: {}]   ;;  %s3229_s1 = inlined_call_operand.vmem [shape: bf16[256,512], index: 1, kind: input, shape index: {}]   ;;  %s3230_s2 = inlined_call_operand.vmem [shape: bf16[2,256,8], index: 2, kind: output, shape index: {0}]   ;;  %s3231_s3 = inlined_call_operand.vmem [shape: f32[2,256,1], index: 3, kind: output, shape index: {1}]   ;;  %s3232_s4 = inlined_call_operand.vmem [shape: f32[2,256,1], index: 4, kind: output, shape index: {2}]  }
   0x1   :  { %s2209_s17 = smov 0  }
   0x2 LB: > { %s27_s18 = sadd.s32 1, %s2173_s16  ;;  %p1795_p0 = scmp.ge.s32.totalorder %s2177_s17, 1  ;;  %s2177_s17 = sphi %s2209_s17, %s15_s17   ;;  %s2173_s16 = sphi %s2207_s16, %s3234_s16   ;;  %s2169_s15 = sphi %s2205_s15, %s3233_s15  }
   0x3   : > { %p29_p1 = scmp.ge.s32.totalorder %s27_s18, 2  ;;  %p186_p2 = scmp.lt.s32.totalorder %s2177_s17, 3 }
   0x5   : > { %s3236_s18 = smov (%p29_p1, %s27_s18), 0  ;;  %p187_p3 = pnand %p1795_p0, %p186_p2 }
   0x6   : > { %p228_p4 = scmp.lt.s32.totalorder (!%p187_p3), %s2169_s15, 1 }
   0x7   : > { %190 = sbr.rel (%p187_p3) target bundleno = 563 (0x233), region = 28 }
   0xc   : > { %s3238_s15 = smov (!%p228_p4, %s2169_s15), 1  ;;  %vm1256_vm0 = vcmask 64512   ;;  %vm1191_vm1 = vcmask 60416   ;;  %vm258_vm2 = vcmask 7168  }
   0xd   : > { %s2062_s19 = sshll.u32 %s3238_s15, 9  ;;  %s2063_s9 = sshll.u32 %s3238_s15, 7 }
   0xe   : > { %s2229_s22 = scalar_lea.vmem %s3228_s0, %s2062_s19  ;;  %s2515_s12 = scalar_lea.vmem %s3230_s2, %s2063_s9 }
   0xf   : > { %v401_v0 = vld [vmem:[%s2229_s22 + $0x70] sm:$0xff]  ;;  %v402_v1 = vld [vmem:[%s2229_s22 + $0x78] sm:$0xff]  ;;  %v399_v11 = vld [vmem:[%s2229_s22 + $0x60] sm:$0xff]  ;;  %s2064_s8 = sshll.u32 %s3238_s15, 8 }
  0x10   : > { %v417_v2 = vld [vmem:[%s2229_s22 + $0xf0] sm:$0xff]  ;;  %v458_v3 = vpack.c.bf16 %v402_v1, %v401_v0  ;;  %v418_v4 = vld [vmem:[%s2229_s22 + $0xf8] sm:$0xff]  ;;  %v400_v13 = vld [vmem:[%s2229_s22 + $0x68] sm:$0xff]  ;;  %s2683_s11 = scalar_lea.vmem %s3231_s3, %s2064_s8  ;;  %s2848_s6 = scalar_lea.vmem %s3232_s4, %s2064_s8 }
  0x11   : > { %v433_v5 = vld [vmem:[%s2229_s22 + $0x170] sm:$0xff]  ;;  %v434_v6 = vld [vmem:[%s2229_s22 + $0x178] sm:$0xff]  ;;  %v466_v7 = vpack.c.bf16 %v418_v4, %v417_v2  ;;  %v415_v14 = vld [vmem:[%s2229_s22 + $0xe0] sm:$0xff]  ;;  %v457_v16 = vpack.c.bf16 %v400_v13, %v399_v11 }
  0x12   : > { %v474_v8 = vpack.c.bf16 %v434_v6, %v433_v5  ;;  %v449_v9 = vld [vmem:[%s2229_s22 + $0x1f0] sm:$0xff]  ;;  %v450_v10 = vld [vmem:[%s2229_s22 + $0x1f8] sm:$0xff]  ;;  %803 = vmatpush.bf16.msra.mxu0 %v458_v3  ;;  %v416_v15 = vld [vmem:[%s2229_s22 + $0xe8] sm:$0xff] }
  0x13   : > { %v482_v12 = vpack.c.bf16 %v450_v10, %v449_v9  ;;  %892 = vmatpush.bf16.msra.mxu1 %v466_v7  ;;  %v465_v17 = vpack.c.bf16 %v416_v15, %v415_v14  ;;  %v431_v18 = vld [vmem:[%s2229_s22 + $0x160] sm:$0xff]  ;;  %v432_v19 = vld [vmem:[%s2229_s22 + $0x168] sm:$0xff]  ;;  %v397_v23 = vld [vmem:[%s2229_s22 + $0x50] sm:$0xff] }
  0x14   : > { %981 = vmatpush.bf16.msra.mxu2 %v474_v8  ;;  %v447_v20 = vld [vmem:[%s2229_s22 + $0x1e0] sm:$0xff]  ;;  %v473_v21 = vpack.c.bf16 %v432_v19, %v431_v18  ;;  %v448_v22 = vld [vmem:[%s2229_s22 + $0x1e8] sm:$0xff]  ;;  %v398_v24 = vld [vmem:[%s2229_s22 + $0x58] sm:$0xff] }
  0x15   : > { %1070 = vmatpush.bf16.msra.mxu3 %v482_v12  ;;  %v481_v25 = vpack.c.bf16 %v448_v22, %v447_v20  ;;  %v413_v26 = vld [vmem:[%s2229_s22 + $0xd0] sm:$0xff]  ;;  %v414_v27 = vld [vmem:[%s2229_s22 + $0xd8] sm:$0xff]  ;;  %v456_v29 = vpack.c.bf16 %v398_v24, %v397_v23  ;;  %v395_v35 = vld [vmem:[%s2229_s22 + $0x40] sm:$0xff] }
  0x16   : > { %v429_v28 = vld [vmem:[%s2229_s22 + $0x150] sm:$0xff]  ;;  %804 = vmatpush.bf16.msra.mxu0 %v457_v16  ;;  %v430_v30 = vld [vmem:[%s2229_s22 + $0x158] sm:$0xff]  ;;  %v464_v33 = vpack.c.bf16 %v414_v27, %v413_v26  ;;  %v396_v36 = vld [vmem:[%s2229_s22 + $0x48] sm:$0xff] }
  0x17   : > { %v445_v31 = vld [vmem:[%s2229_s22 + $0x1d0] sm:$0xff]  ;;  %v446_v32 = vld [vmem:[%s2229_s22 + $0x1d8] sm:$0xff]  ;;  %893 = vmatpush.bf16.msra.mxu1 %v465_v17  ;;  %v472_v34 = vpack.c.bf16 %v430_v30, %v429_v28  ;;  %v411_v37 = vld [vmem:[%s2229_s22 + $0xc0] sm:$0xff]  ;;  %v455_v44 = vpack.c.bf16 %v396_v36, %v395_v35 }
  0x18   : > { %982 = vmatpush.bf16.msra.mxu2 %v473_v21  ;;  %v480_v38 = vpack.c.bf16 %v446_v32, %v445_v31  ;;  %v412_v39 = vld [vmem:[%s2229_s22 + $0xc8] sm:$0xff]  ;;  %v427_v40 = vld [vmem:[%s2229_s22 + $0x140] sm:$0xff]  ;;  %v393_v47 = vld [vmem:[%s2229_s22 + $0x30] sm:$0xff] }
  0x19   : > { %1071 = vmatpush.bf16.msra.mxu3 %v481_v25  ;;  %v428_v41 = vld [vmem:[%s2229_s22 + $0x148] sm:$0xff]  ;;  %v443_v42 = vld [vmem:[%s2229_s22 + $0x1c0] sm:$0xff]  ;;  %v463_v45 = vpack.c.bf16 %v412_v39, %v411_v37  ;;  %v394_v48 = vld [vmem:[%s2229_s22 + $0x38] sm:$0xff] }
  0x1a   : > { %v444_v43 = vld [vmem:[%s2229_s22 + $0x1c8] sm:$0xff]  ;;  %805 = vmatpush.bf16.msra.mxu0 %v456_v29  ;;  %v471_v46 = vpack.c.bf16 %v428_v41, %v427_v40  ;;  %v409_v49 = vld [vmem:[%s2229_s22 + $0xb0] sm:$0xff]  ;;  %v410_v51 = vld [vmem:[%s2229_s22 + $0xb8] sm:$0xff]  ;;  %v454_v56 = vpack.c.bf16 %v394_v48, %v393_v47 }
  0x1b   : > { %894 = vmatpush.bf16.msra.mxu1 %v464_v33  ;;  %v479_v50 = vpack.c.bf16 %v444_v43, %v443_v42  ;;  %v425_v52 = vld [vmem:[%s2229_s22 + $0x130] sm:$0xff]  ;;  %v426_v53 = vld [vmem:[%s2229_s22 + $0x138] sm:$0xff]  ;;  %v462_v57 = vpack.c.bf16 %v410_v51, %v409_v49  ;;  %v391_v59 = vld [vmem:[%s2229_s22 + $0x20] sm:$0xff] }
  0x1c   : > { %983 = vmatpush.bf16.msra.mxu2 %v472_v34  ;;  %v441_v54 = vld [vmem:[%s2229_s22 + $0x1b0] sm:$0xff]  ;;  %v442_v55 = vld [vmem:[%s2229_s22 + $0x1b8] sm:$0xff]  ;;  %v470_v58 = vpack.c.bf16 %v426_v53, %v425_v52  ;;  %v392_v60 = vld [vmem:[%s2229_s22 + $0x28] sm:$0xff] }
  0x1d   : > { %1072 = vmatpush.bf16.msra.mxu3 %v480_v38  ;;  %v407_v61 = vld [vmem:[%s2229_s22 + $0xa0] sm:$0xff]  ;;  %v478_v62 = vpack.c.bf16 %v442_v55, %v441_v54  ;;  %v408_v63 = vld [vmem:[%s2229_s22 + $0xa8] sm:$0xff]  ;;  %v453_v4 = vpack.c.bf16 %v392_v60, %v391_v59  ;;  %v389_v7 = vld [vmem:[%s2229_s22 + $0x10] sm:$0xff] }
  0x1e   : > { %806 = vmatpush.bf16.msra.mxu0 %v455_v44  ;;  %v423_v0 = vld [vmem:[%s2229_s22 + $0x120] sm:$0xff]  ;;  %v424_v1 = vld [vmem:[%s2229_s22 + $0x128] sm:$0xff]  ;;  %v461_v5 = vpack.c.bf16 %v408_v63, %v407_v61  ;;  %v390_v8 = vld [vmem:[%s2229_s22 + $0x18] sm:$0xff] }
  0x1f   : > { %895 = vmatpush.bf16.msra.mxu1 %v463_v45  ;;  %v439_v2 = vld [vmem:[%s2229_s22 + $0x1a0] sm:$0xff]  ;;  %v440_v3 = vld [vmem:[%s2229_s22 + $0x1a8] sm:$0xff]  ;;  %v469_v6 = vpack.c.bf16 %v424_v1, %v423_v0  ;;  %v405_v9 = vld [vmem:[%s2229_s22 + $0x90] sm:$0xff]  ;;  %v452_v16 = vpack.c.bf16 %v390_v8, %v389_v7 }
  0x20   : > { %984 = vmatpush.bf16.msra.mxu2 %v471_v46  ;;  %v477_v10 = vpack.c.bf16 %v440_v3, %v439_v2  ;;  %v406_v11 = vld [vmem:[%s2229_s22 + $0x98] sm:$0xff]  ;;  %v421_v12 = vld [vmem:[%s2229_s22 + $0x110] sm:$0xff]  ;;  %v387_v19 = vld [vmem:[%s2229_s22] sm:$0xff] }
  0x21   : > { %1073 = vmatpush.bf16.msra.mxu3 %v479_v50  ;;  %v422_v13 = vld [vmem:[%s2229_s22 + $0x118] sm:$0xff]  ;;  %v437_v14 = vld [vmem:[%s2229_s22 + $0x190] sm:$0xff]  ;;  %v460_v17 = vpack.c.bf16 %v406_v11, %v405_v9  ;;  %v388_v20 = vld [vmem:[%s2229_s22 + $0x8] sm:$0xff] }
  0x22   : > { %807 = vmatpush.bf16.msra.mxu0 %v454_v56  ;;  %v438_v15 = vld [vmem:[%s2229_s22 + $0x198] sm:$0xff]  ;;  %v468_v18 = vpack.c.bf16 %v422_v13, %v421_v12  ;;  %v403_v21 = vld [vmem:[%s2229_s22 + $0x80] sm:$0xff]  ;;  %v404_v23 = vld [vmem:[%s2229_s22 + $0x88] sm:$0xff]  ;;  %v451_v28 = vpack.c.bf16 %v388_v20, %v387_v19 }
  0x23   : > { %896 = vmatpush.bf16.msra.mxu1 %v462_v57  ;;  %v476_v22 = vpack.c.bf16 %v438_v15, %v437_v14  ;;  %v419_v24 = vld [vmem:[%s2229_s22 + $0x100] sm:$0xff]  ;;  %v420_v25 = vld [vmem:[%s2229_s22 + $0x108] sm:$0xff]  ;;  %v2068_v30 = vld [vmem:[%s3229_s1 + $0xc] sm:$0xf0]  ;;  %v459_v32 = vpack.c.bf16 %v404_v23, %v403_v21 }
  0x24   : > { %985 = vmatpush.bf16.msra.mxu2 %v470_v58  ;;  %v435_v26 = vld [vmem:[%s2229_s22 + $0x180] sm:$0xff]  ;;  %v436_v27 = vld [vmem:[%s2229_s22 + $0x188] sm:$0xff]  ;;  %v467_v33 = vpack.c.bf16 %v420_v25, %v419_v24  ;;  %v1808_v34 = vld [vmem:[%s3229_s1 + $0x10] sm:$0xf0] }
  0x25   : > { %1074 = vmatpush.bf16.msra.mxu3 %v478_v62  ;;  %v1806_v29 = vld [vmem:[%s3229_s1] sm:$0xf]  ;;  %v2066_v31 = vld [vmem:[%s3229_s1 + $0x4] sm:$0xf]  ;;  %v1814_v35 = vld [vmem:[%s3229_s1 + $0x8] sm:$0xf]  ;;  %v475_v37 = vpack.c.bf16 %v436_v27, %v435_v26 }
  0x26   : > { %808 = vmatpush.bf16.msra.mxu0 %v453_v4  ;;  %v2069_v36 = vld [vmem:[%s3229_s1 + $0x14] sm:$0xf0]  ;;  %v2067_v38 = vld [vmem:[%s3229_s1 + $0xc] sm:$0xf]  ;;  %v1816_v39 = vld [vmem:[%s3229_s1 + $0x18] sm:$0xf0]  ;;  %v1807_v40 = vor.u32 %v2068_v30, %v1806_v29  ;;  %v1811_v41 = vor.u32 %v2066_v31, %v1808_v34 }
  0x27   : > { %897 = vmatpush.bf16.msra.mxu1 %v461_v5  ;;  %v1815_v42 = vor.u32 %v2069_v36, %v1814_v35  ;;  %v1819_v43 = vor.u32 %v2067_v38, %v1816_v39  ;;  %v1822_v44 = vld [vmem:[%s3229_s1 + $0x20] sm:$0xf]  ;;  %v2072_v45 = vld [vmem:[%s3229_s1 + $0x2c] sm:$0xf0]  ;;  %v2070_v46 = vld [vmem:[%s3229_s1 + $0x24] sm:$0xf] }
  0x28   : > { %986 = vmatpush.bf16.msra.mxu2 %v469_v6  ;;  %v1824_v47 = vld [vmem:[%s3229_s1 + $0x30] sm:$0xf0]  ;;  %v1830_v48 = vld [vmem:[%s3229_s1 + $0x28] sm:$0xf]  ;;  %v2073_v49 = vld [vmem:[%s3229_s1 + $0x34] sm:$0xf0]  ;;  %v1823_v52 = vor.u32 %v2072_v45, %v1822_v44 }
  0x29   : > { %1075 = vmatpush.bf16.msra.mxu3 %v477_v10  ;;  %v2071_v50 = vld [vmem:[%s3229_s1 + $0x2c] sm:$0xf]  ;;  %v1832_v51 = vld [vmem:[%s3229_s1 + $0x38] sm:$0xf0]  ;;  %v1827_v53 = vor.u32 %v2070_v46, %v1824_v47  ;;  %v1831_v54 = vor.u32 %v2073_v49, %v1830_v48  ;;  %v1838_v56 = vld [vmem:[%s3229_s1 + $0x40] sm:$0xf] }
  0x2a   : > { %809 = vmatpush.bf16.msra.mxu0 %v452_v16  ;;  %v1835_v55 = vor.u32 %v2071_v50, %v1832_v51  ;;  %v2076_v57 = vld [vmem:[%s3229_s1 + $0x4c] sm:$0xf0]  ;;  %v2074_v58 = vld [vmem:[%s3229_s1 + $0x44] sm:$0xf]  ;;  %v1840_v59 = vld [vmem:[%s3229_s1 + $0x50] sm:$0xf0] }
  0x2b   : > { %898 = vmatpush.bf16.msra.mxu1 %v460_v17  ;;  %v1846_v60 = vld [vmem:[%s3229_s1 + $0x48] sm:$0xf]  ;;  %v2077_v61 = vld [vmem:[%s3229_s1 + $0x54] sm:$0xf0]  ;;  %v2075_v62 = vld [vmem:[%s3229_s1 + $0x4c] sm:$0xf]  ;;  %v1839_v0 = vor.u32 %v2076_v57, %v1838_v56  ;;  %v1843_v1 = vor.u32 %v2074_v58, %v1840_v59 }
  0x2c   : > { %987 = vmatpush.bf16.msra.mxu2 %v468_v18  ;;  %v1848_v63 = vld [vmem:[%s3229_s1 + $0x58] sm:$0xf0]  ;;  %v1847_v2 = vor.u32 %v2077_v61, %v1846_v60  ;;  %v1854_v4 = vld [vmem:[%s3229_s1 + $0x60] sm:$0xf]  ;;  %v2080_v5 = vld [vmem:[%s3229_s1 + $0x6c] sm:$0xf0] }
  0x2d   : > { %1076 = vmatpush.bf16.msra.mxu3 %v476_v22  ;;  %v1851_v3 = vor.u32 %v2075_v62, %v1848_v63  ;;  %v2078_v6 = vld [vmem:[%s3229_s1 + $0x64] sm:$0xf]  ;;  %v1856_v7 = vld [vmem:[%s3229_s1 + $0x70] sm:$0xf0]  ;;  %v1862_v8 = vld [vmem:[%s3229_s1 + $0x68] sm:$0xf]  ;;  %v1855_v12 = vor.u32 %v2080_v5, %v1854_v4 }
  0x2e   : > { %810 = vmatpush.bf16.msra.mxu0 %v451_v28  ;;  %v2081_v9 = vld [vmem:[%s3229_s1 + $0x74] sm:$0xf0]  ;;  %v2079_v10 = vld [vmem:[%s3229_s1 + $0x6c] sm:$0xf]  ;;  %v1864_v11 = vld [vmem:[%s3229_s1 + $0x78] sm:$0xf0]  ;;  %v1859_v13 = vor.u32 %v2078_v6, %v1856_v7 }
  0x2f   : > { %899 = vmatpush.bf16.msra.mxu1 %v459_v32  ;;  %v1863_v14 = vor.u32 %v2081_v9, %v1862_v8  ;;  %v1867_v15 = vor.u32 %v2079_v10, %v1864_v11  ;;  %v1870_v16 = vld [vmem:[%s3229_s1 + $0x80] sm:$0xf]  ;;  %v2084_v17 = vld [vmem:[%s3229_s1 + $0x8c] sm:$0xf0]  ;;  %v2082_v18 = vld [vmem:[%s3229_s1 + $0x84] sm:$0xf] }
  0x30   : > { %988 = vmatpush.bf16.msra.mxu2 %v467_v33  ;;  %v1872_v19 = vld [vmem:[%s3229_s1 + $0x90] sm:$0xf0]  ;;  %v1878_v20 = vld [vmem:[%s3229_s1 + $0x88] sm:$0xf]  ;;  %v2085_v21 = vld [vmem:[%s3229_s1 + $0x94] sm:$0xf0]  ;;  %v1871_v24 = vor.u32 %v2084_v17, %v1870_v16 }
  0x31   : > { %1077 = vmatpush.bf16.msra.mxu3 %v475_v37  ;;  %811 = vmatmul.bf16.vlgmr.msra.gmra.mxu0 %v1807_v40  ;;  %v2083_v22 = vld [vmem:[%s3229_s1 + $0x8c] sm:$0xf]  ;;  %v1880_v23 = vld [vmem:[%s3229_s1 + $0x98] sm:$0xf0]  ;;  %v1875_v25 = vor.u32 %v2082_v18, %v1872_v19  ;;  %v1879_v26 = vor.u32 %v2085_v21, %v1878_v20  ;;  %v1886_v28 = vld [vmem:[%s3229_s1 + $0xa0] sm:$0xf] }
  0x32   : > { %900 = vmatmul.bf16.vlgmr.msra.gmra.mxu1 %v1811_v41  ;;  %v1883_v27 = vor.u32 %v2083_v22, %v1880_v23  ;;  %v2088_v29 = vld [vmem:[%s3229_s1 + $0xac] sm:$0xf0]  ;;  %v2086_v30 = vld [vmem:[%s3229_s1 + $0xa4] sm:$0xf]  ;;  %v1888_v31 = vld [vmem:[%s3229_s1 + $0xb0] sm:$0xf0] }
  0x33   : > { %989 = vmatmul.bf16.vlgmr.msra.gmra.mxu2 %v1815_v42  ;;  %v1894_v32 = vld [vmem:[%s3229_s1 + $0xa8] sm:$0xf]  ;;  %v2089_v33 = vld [vmem:[%s3229_s1 + $0xb4] sm:$0xf0]  ;;  %v2087_v34 = vld [vmem:[%s3229_s1 + $0xac] sm:$0xf]  ;;  %v1887_v36 = vor.u32 %v2088_v29, %v1886_v28  ;;  %v1891_v37 = vor.u32 %v2086_v30, %v1888_v31 }
  0x34   : > { %1078 = vmatmul.bf16.vlgmr.msra.gmra.mxu3 %v1819_v43  ;;  %v1896_v35 = vld [vmem:[%s3229_s1 + $0xb8] sm:$0xf0]  ;;  %v1895_v38 = vor.u32 %v2089_v33, %v1894_v32  ;;  %v1902_v40 = vld [vmem:[%s3229_s1 + $0xc0] sm:$0xf]  ;;  %v2092_v41 = vld [vmem:[%s3229_s1 + $0xcc] sm:$0xf0] }
  0x35   : > { %v1899_v39 = vor.u32 %v2087_v34, %v1896_v35  ;;  %v2090_v42 = vld [vmem:[%s3229_s1 + $0xc4] sm:$0xf]  ;;  %v1904_v43 = vld [vmem:[%s3229_s1 + $0xd0] sm:$0xf0]  ;;  %v1910_v44 = vld [vmem:[%s3229_s1 + $0xc8] sm:$0xf]  ;;  %v1903_v48 = vor.u32 %v2092_v41, %v1902_v40 }
  0x36   : > { %v2093_v45 = vld [vmem:[%s3229_s1 + $0xd4] sm:$0xf0]  ;;  %v2091_v46 = vld [vmem:[%s3229_s1 + $0xcc] sm:$0xf]  ;;  %v1912_v47 = vld [vmem:[%s3229_s1 + $0xd8] sm:$0xf0]  ;;  %v1907_v49 = vor.u32 %v2090_v42, %v1904_v43 }
  0x37   : > { %v1911_v50 = vor.u32 %v2093_v45, %v1910_v44  ;;  %v1915_v51 = vor.u32 %v2091_v46, %v1912_v47  ;;  %v1926_v56 = vld [vmem:[%s3229_s1 + $0xe8] sm:$0xf]  ;;  %v2097_v57 = vld [vmem:[%s3229_s1 + $0xf4] sm:$0xf0]  ;;  %v2095_v58 = vld [vmem:[%s3229_s1 + $0xec] sm:$0xf] }
  0x38   : > { %v1928_v59 = vld [vmem:[%s3229_s1 + $0xf8] sm:$0xf0]  ;;  %v1927_v62 = vor.u32 %v2097_v57, %v1926_v56  ;;  %v1942_v4 = vld [vmem:[%s3229_s1 + $0x108] sm:$0xf]  ;;  %v2101_v5 = vld [vmem:[%s3229_s1 + $0x114] sm:$0xf0] }
  0x39   : > { %v1931_v63 = vor.u32 %v2095_v58, %v1928_v59  ;;  %v2099_v6 = vld [vmem:[%s3229_s1 + $0x10c] sm:$0xf]  ;;  %v1944_v7 = vld [vmem:[%s3229_s1 + $0x118] sm:$0xf0]  ;;  %v1943_v11 = vor.u32 %v2101_v5, %v1942_v4  ;;  %v1950_v21 = vld [vmem:[%s3229_s1 + $0x120] sm:$0xf] }
  0x3a   : > { %v2104_v22 = vld [vmem:[%s3229_s1 + $0x12c] sm:$0xf0]  ;;  %v1958_v28 = vld [vmem:[%s3229_s1 + $0x128] sm:$0xf]  ;;  %v2105_v29 = vld [vmem:[%s3229_s1 + $0x134] sm:$0xf0] }
  0x3b   : > { %v2103_v30 = vld [vmem:[%s3229_s1 + $0x12c] sm:$0xf]  ;;  %v1960_v33 = vld [vmem:[%s3229_s1 + $0x138] sm:$0xf0]  ;;  %v1951_v35 = vor.u32 %v2104_v22, %v1950_v21  ;;  %v1959_v40 = vor.u32 %v2105_v29, %v1958_v28  ;;  %v2108_v58 = vld [vmem:[%s3229_s1 + $0x14c] sm:$0xf0] }
  0x3c   : > { %v1963_v42 = vor.u32 %v2103_v30, %v1960_v33  ;;  %v2106_v59 = vld [vmem:[%s3229_s1 + $0x144] sm:$0xf]  ;;  %v1984_v30 = vld [vmem:[%s3229_s1 + $0x170] sm:$0xf0]  ;;  %v2111_v33 = vld [vmem:[%s3229_s1 + $0x16c] sm:$0xf] }
  0x3d   : > { %v2110_v29 = vld [vmem:[%s3229_s1 + $0x164] sm:$0xf] }
  0x41   : > { %816 = vmatmul.bf16.gmra.mxu0 %v1823_v52  ;;  %v1918_v52 = vld [vmem:[%s3229_s1 + $0xe0] sm:$0xf] }
  0x42   : > { %905 = vmatmul.bf16.gmra.mxu1 %v1827_v53  ;;  %v2096_v53 = vld [vmem:[%s3229_s1 + $0xec] sm:$0xf0] }
  0x43   : > { %994 = vmatmul.bf16.gmra.mxu2 %v1831_v54  ;;  %v2094_v54 = vld [vmem:[%s3229_s1 + $0xe4] sm:$0xf]  ;;  %v1919_v60 = vor.u32 %v2096_v53, %v1918_v52 }
  0x44   : > { %1083 = vmatmul.bf16.gmra.mxu3 %v1835_v55  ;;  %v1920_v55 = vld [vmem:[%s3229_s1 + $0xf0] sm:$0xf0] }
  0x45   : > { %v1923_v61 = vor.u32 %v2094_v54, %v1920_v55  ;;  %v1966_v54 = vld [vmem:[%s3229_s1 + $0x140] sm:$0xf] }
  0x51   : > { %821 = vmatmul.bf16.gmra.mxu0 %v1839_v0  ;;  %v1934_v0 = vld [vmem:[%s3229_s1 + $0x100] sm:$0xf] }
  0x52   : > { %910 = vmatmul.bf16.gmra.mxu1 %v1843_v1  ;;  %v2100_v1 = vld [vmem:[%s3229_s1 + $0x10c] sm:$0xf0] }
  0x53   : > { %999 = vmatmul.bf16.gmra.mxu2 %v1847_v2  ;;  %v2098_v2 = vld [vmem:[%s3229_s1 + $0x104] sm:$0xf]  ;;  %v1935_v8 = vor.u32 %v2100_v1, %v1934_v0  ;;  %v2107_v0 = vld [vmem:[%s3229_s1 + $0x14c] sm:$0xf]  ;;  %v1976_v1 = vld [vmem:[%s3229_s1 + $0x158] sm:$0xf0] }
  0x54   : > { %1088 = vmatmul.bf16.gmra.mxu3 %v1851_v3  ;;  %v1936_v3 = vld [vmem:[%s3229_s1 + $0x110] sm:$0xf0] }
  0x55   : > { %v1939_v10 = vor.u32 %v2098_v2, %v1936_v3  ;;  %v1967_v3 = vor.u32 %v2108_v58, %v1966_v54 }
  0x61   : > { %826 = vmatmul.bf16.gmra.mxu0 %v1855_v12 }
  0x62   : > { %915 = vmatmul.bf16.gmra.mxu1 %v1859_v13  ;;  %v1947_v13 = vor.u32 %v2099_v6, %v1944_v7 }
  0x63   : > { %1004 = vmatmul.bf16.gmra.mxu2 %v1863_v14 }
  0x64   : > { %1093 = vmatmul.bf16.gmra.mxu3 %v1867_v15 }
  0x71   : > { %831 = vmatmul.bf16.gmra.mxu0 %v1871_v24 }
  0x72   : > { %920 = vmatmul.bf16.gmra.mxu1 %v1875_v25 }
  0x73   : > { %1009 = vmatmul.bf16.gmra.mxu2 %v1879_v26  ;;  %v2102_v26 = vld [vmem:[%s3229_s1 + $0x124] sm:$0xf] }
  0x74   : > { %1098 = vmatmul.bf16.gmra.mxu3 %v1883_v27  ;;  %v1952_v27 = vld [vmem:[%s3229_s1 + $0x130] sm:$0xf0] }
  0x81   : > { %836 = vmatmul.bf16.gmra.mxu0 %v1887_v36 }
  0x82   : > { %925 = vmatmul.bf16.gmra.mxu1 %v1891_v37 }
  0x83   : > { %1014 = vmatmul.bf16.gmra.mxu2 %v1895_v38 }
  0x84   : > { %1103 = vmatmul.bf16.gmra.mxu3 %v1899_v39  ;;  %v1955_v39 = vor.u32 %v2102_v26, %v1952_v27 }
  0x91   : > { %841 = vmatmul.bf16.gmra.mxu0 %v1903_v48 }
  0x92   : > { %930 = vmatmul.bf16.gmra.mxu1 %v1907_v49 }
  0x93   : > { %1019 = vmatmul.bf16.gmra.mxu2 %v1911_v50 }
  0x94   : > { %1108 = vmatmul.bf16.gmra.mxu3 %v1915_v51 }
  0xa1   : > { %846 = vmatmul.bf16.gmra.mxu0 %v1919_v60  ;;  %v1968_v60 = vld [vmem:[%s3229_s1 + $0x150] sm:$0xf0] }
  0xa2   : > { %935 = vmatmul.bf16.gmra.mxu1 %v1923_v61  ;;  %v1974_v61 = vld [vmem:[%s3229_s1 + $0x148] sm:$0xf]  ;;  %v1971_v7 = vor.u32 %v2106_v59, %v1968_v60  ;;  %v1998_v59 = vld [vmem:[%s3229_s1 + $0x180] sm:$0xf]  ;;  %v2116_v60 = vld [vmem:[%s3229_s1 + $0x18c] sm:$0xf0] }
  0xa3   : > { %1024 = vmatmul.bf16.gmra.mxu2 %v1927_v62  ;;  %v2109_v62 = vld [vmem:[%s3229_s1 + $0x154] sm:$0xf0] }
  0xa4   : > { %1113 = vmatmul.bf16.gmra.mxu3 %v1931_v63 }
  0xae   : > { %v812_v9 = vpop.f32.mrf.mxu0 }
  0xaf   : > { %v901_v12 = vpop.f32.mrf.mxu1 }
  0xb0   : > { %v902_v14 = vadd.f32 %v901_v12, %v812_v9 }
  0xb1   : > { %851 = vmatmul.bf16.gmra.mxu0 %v1935_v8  ;;  %v1975_v8 = vor.u32 %v2109_v62, %v1974_v61 }
  0xb2   : > { %940 = vmatmul.bf16.gmra.mxu1 %v1939_v10 }
  0xb3   : > { %1029 = vmatmul.bf16.gmra.mxu2 %v1943_v11  ;;  %v1979_v11 = vor.u32 %v2107_v0, %v1976_v1  ;;  %v2114_v0 = vld [vmem:[%s3229_s1 + $0x184] sm:$0xf]  ;;  %v2000_v1 = vld [vmem:[%s3229_s1 + $0x190] sm:$0xf0] }
  0xb4   : > { %1118 = vmatmul.bf16.gmra.mxu3 %v1947_v13 }
  0xb6   : > { %v990_v15 = vpop.f32.mrf.mxu2  ;;  %v814_v18 = vpop.f32.mrf.mxu0 }
  0xb7   : > { %v991_v16 = vadd.f32 %v990_v15, %v902_v14  ;;  %v1079_v17 = vpop.f32.mrf.mxu3  ;;  %v903_v19 = vpop.f32.mrf.mxu1 }
  0xb8   : > { %v904_v31 = vadd.f32 %v903_v19, %v814_v18 }
  0xb9   : > { %v1080_v20 = vadd.f32 %v1079_v17, %v991_v16 }
  0xbb   : > { %v1159_v23 = vpack.c.bf16 %v1080_v20, %v1080_v20  ;;  %v1257_v24 = vsel %vm1256_vm0, %v1080_v20, 0.0  ;;  %v1450_v25 = vmul.f32 %v1080_v20, %v1080_v20 }
  0xbc   : > { %1258 = vadd.xlane.f32.xlu0 %v1257_v24  ;;  %v1982_v24 = vld [vmem:[%s3229_s1 + $0x160] sm:$0xf] }
  0xbd   : > { %1192 = vst.msk [vmem:[%s2515_s12] sm:$0xf] %vm1191_vm1, %v1159_v23  ;;  %v1482_v32 = vsel %vm1256_vm0, %v1450_v25, 0.0  ;;  %v2112_v25 = vld [vmem:[%s3229_s1 + $0x16c] sm:$0xf0] }
  0xbe   : > { %v992_v34 = vpop.f32.mrf.mxu2  ;;  %1483 = vadd.xlane.f32.xlu2 %v1482_v32  ;;  %v817_v38 = vpop.f32.mrf.mxu0  ;;  %v2113_v32 = vld [vmem:[%s3229_s1 + $0x174] sm:$0xf0] }
  0xbf   : > { %v993_v36 = vadd.f32 %v992_v34, %v904_v31  ;;  %v1081_v37 = vpop.f32.mrf.mxu3  ;;  %v906_v41 = vpop.f32.mrf.mxu1  ;;  %v1990_v31 = vld [vmem:[%s3229_s1 + $0x168] sm:$0xf] }
  0xc0   : > { %v907_v45 = vadd.f32 %v906_v41, %v817_v38 }
  0xc1   : > { %v1082_v43 = vadd.f32 %v1081_v37, %v993_v36  ;;  %856 = vmatmul.bf16.gmra.mxu0 %v1951_v35  ;;  %v1992_v37 = vld [vmem:[%s3229_s1 + $0x178] sm:$0xf0] }
  0xc2   : > { %945 = vmatmul.bf16.gmra.mxu1 %v1955_v39  ;;  %v1983_v39 = vor.u32 %v2112_v25, %v1982_v24 }
  0xc3   : > { %v1160_v44 = vpack.c.bf16 %v1082_v43, %v1082_v43  ;;  %1034 = vmatmul.bf16.gmra.mxu2 %v1959_v40  ;;  %v1260_v46 = vsel %vm1256_vm0, %v1082_v43, 0.0  ;;  %v1451_v51 = vmul.f32 %v1082_v43, %v1082_v43  ;;  %v1987_v43 = vor.u32 %v2110_v29, %v1984_v30  ;;  %v2014_v29 = vld [vmem:[%s3229_s1 + $0x1a0] sm:$0xf]  ;;  %v2120_v30 = vld [vmem:[%s3229_s1 + $0x1ac] sm:$0xf0] }
  0xc4   : > { %1123 = vmatmul.bf16.gmra.mxu3 %v1963_v42  ;;  %1261 = vadd.xlane.f32.xlu0 %v1260_v46  ;;  %v1995_v46 = vor.u32 %v2111_v33, %v1992_v37  ;;  %v2121_v37 = vld [vmem:[%s3229_s1 + $0x1b4] sm:$0xf0] }
  0xc5   : > { %1193 = vst.msk [vmem:[%s2515_s12 + $0x4] sm:$0xf] %vm1191_vm1, %v1160_v44  ;;  %v1485_v56 = vsel %vm1256_vm0, %v1451_v51, 0.0  ;;  %v1991_v44 = vor.u32 %v2113_v32, %v1990_v31 }
  0xc6   : > { %v995_v47 = vpop.f32.mrf.mxu2  ;;  %v819_v50 = vpop.f32.mrf.mxu0 }
  0xc7   : > { %v996_v48 = vadd.f32 %v995_v47, %v907_v45  ;;  %v1084_v49 = vpop.f32.mrf.mxu3  ;;  %v908_v52 = vpop.f32.mrf.mxu1 }
  0xc8   : > { %v909_v63 = vadd.f32 %v908_v52, %v819_v50 }
  0xc9   : > { %v1085_v53 = vadd.f32 %v1084_v49, %v996_v48 }
  0xcb   : > { %v1161_v55 = vpack.c.bf16 %v1085_v53, %v1085_v53  ;;  %v1263_v57 = vsel %vm1256_vm0, %v1085_v53, 0.0  ;;  %v1452_v9 = vmul.f32 %v1085_v53, %v1085_v53 }
  0xcc   : > { %1486 = vadd.xlane.f32.xlu0 %v1485_v56  ;;  %1264 = vadd.xlane.f32.xlu1 %v1263_v57 }
  0xcd   : > { %1194 = vst.msk [vmem:[%s2515_s12 + $0x8] sm:$0xf] %vm1191_vm1, %v1161_v55  ;;  %v1488_v15 = vsel %vm1256_vm0, %v1452_v9, 0.0  ;;  %v1999_v9 = vor.u32 %v2116_v60, %v1998_v59 }
  0xce   : > { %v997_v2 = vpop.f32.mrf.mxu2  ;;  %v822_v6 = vpop.f32.mrf.mxu0 }
  0xcf   : > { %v998_v4 = vadd.f32 %v997_v2, %v909_v63  ;;  %v1086_v5 = vpop.f32.mrf.mxu3  ;;  %v911_v10 = vpop.f32.mrf.mxu1  ;;  %v2006_v2 = vld [vmem:[%s3229_s1 + $0x188] sm:$0xf] }
  0xd0   : > { %v912_v14 = vadd.f32 %v911_v10, %v822_v6 }
  0xd1   : > { %v1087_v12 = vadd.f32 %v1086_v5, %v998_v4  ;;  %861 = vmatmul.bf16.gmra.mxu0 %v1967_v3  ;;  %v2117_v3 = vld [vmem:[%s3229_s1 + $0x194] sm:$0xf0]  ;;  %v2115_v4 = vld [vmem:[%s3229_s1 + $0x18c] sm:$0xf] }
  0xd2   : > { %950 = vmatmul.bf16.gmra.mxu1 %v1971_v7  ;;  %v2008_v7 = vld [vmem:[%s3229_s1 + $0x198] sm:$0xf0] }
  0xd3   : > { %v1162_v13 = vpack.c.bf16 %v1087_v12, %v1087_v12  ;;  %1039 = vmatmul.bf16.gmra.mxu2 %v1975_v8  ;;  %v1453_v16 = vmul.f32 %v1087_v12, %v1087_v12  ;;  %v1266_v27 = vsel %vm1256_vm0, %v1087_v12, 0.0 }
  0xd4   : > { %1128 = vmatmul.bf16.gmra.mxu3 %v1979_v11  ;;  %1489 = vadd.xlane.f32.xlu1 %v1488_v15 }
  0xd5   : > { %1195 = vst.msk [vmem:[%s2515_s12 + $0xc] sm:$0xf] %vm1191_vm1, %v1162_v13  ;;  %v1491_v17 = vsel %vm1256_vm0, %v1453_v16, 0.0  ;;  %v2003_v13 = vor.u32 %v2114_v0, %v2000_v1  ;;  %v2011_v16 = vor.u32 %v2115_v4, %v2008_v7  ;;  %v2179_v0 = vmov 0.0   ;;  %v2124_v1 = vld [vmem:[%s3229_s1 + $0x1cc] sm:$0xf0] }
  0xd6   : > { %v1000_v18 = vpop.f32.mrf.mxu2  ;;  %1492 = vadd.xlane.f32.xlu2 %v1491_v17  ;;  %v824_v21 = vpop.f32.mrf.mxu0  ;;  %259 = vst.msk [vmem:[%s2683_s11] sm:$0xff] %vm258_vm2, %v2179_v0  ;;  %v2038_v7 = vld [vmem:[%s3229_s1 + $0x1c8] sm:$0xf] }
  0xd7   : > { %v1001_v19 = vadd.f32 %v1000_v18, %v912_v14  ;;  %v1089_v20 = vpop.f32.mrf.mxu3  ;;  %v913_v22 = vpop.f32.mrf.mxu1  ;;  %v2007_v14 = vor.u32 %v2117_v3, %v2006_v2  ;;  %v2122_v2 = vld [vmem:[%s3229_s1 + $0x1c4] sm:$0xf]  ;;  %260 = vst.msk [vmem:[%s2683_s11 + $0x8] sm:$0xff] %vm258_vm2, %v2179_v0 }
  0xd8   : > { %v914_v34 = vadd.f32 %v913_v22, %v824_v21  ;;  %261 = vst.msk [vmem:[%s2683_s11 + $0x10] sm:$0xff] %vm258_vm2, %v2179_v0 }
  0xd9   : > { %v1090_v23 = vadd.f32 %v1089_v20, %v1001_v19  ;;  %262 = vst.msk [vmem:[%s2683_s11 + $0x18] sm:$0xff] %vm258_vm2, %v2179_v0 }
  0xda   : > { %263 = vst.msk [vmem:[%s2683_s11 + $0x20] sm:$0xff] %vm258_vm2, %v2179_v0 }
  0xdb   : > { %v1163_v26 = vpack.c.bf16 %v1090_v23, %v1090_v23  ;;  %v1454_v28 = vmul.f32 %v1090_v23, %v1090_v23  ;;  %v1269_v36 = vsel %vm1256_vm0, %v1090_v23, 0.0  ;;  %264 = vst.msk [vmem:[%s2683_s11 + $0x28] sm:$0xff] %vm258_vm2, %v2179_v0 }
  0xdc   : > { %1267 = vadd.xlane.f32.xlu1 %v1266_v27  ;;  %265 = vst.msk [vmem:[%s2683_s11 + $0x30] sm:$0xff] %vm258_vm2, %v2179_v0 }
  0xdd   : > { %1196 = vst.msk [vmem:[%s2515_s12 + $0x10] sm:$0xf] %vm1191_vm1, %v1163_v26  ;;  %v1494_v35 = vsel %vm1256_vm0, %v1454_v28, 0.0 }
  0xde   : > { %v1002_v38 = vpop.f32.mrf.mxu2  ;;  %1495 = vadd.xlane.f32.xlu0 %v1494_v35  ;;  %1270 = vadd.xlane.f32.xlu2 %v1269_v36  ;;  %v827_v42 = vpop.f32.mrf.mxu0  ;;  %v2016_v35 = vld [vmem:[%s3229_s1 + $0x1b0] sm:$0xf0]  ;;  %v2022_v36 = vld [vmem:[%s3229_s1 + $0x1a8] sm:$0xf]  ;;  %266 = vst.msk [vmem:[%s2683_s11 + $0x38] sm:$0xff] %vm258_vm2, %v2179_v0 }
  0xdf   : > { %v1003_v40 = vadd.f32 %v1002_v38, %v914_v34  ;;  %v1091_v41 = vpop.f32.mrf.mxu3  ;;  %v916_v45 = vpop.f32.mrf.mxu1  ;;  %v2118_v34 = vld [vmem:[%s3229_s1 + $0x1a4] sm:$0xf]  ;;  %v2119_v38 = vld [vmem:[%s3229_s1 + $0x1ac] sm:$0xf]  ;;  %267 = vst.msk [vmem:[%s2683_s11 + $0x40] sm:$0xff] %vm258_vm2, %v2179_v0 }
  0xe0   : > { %v917_v49 = vadd.f32 %v916_v45, %v827_v42  ;;  %268 = vst.msk [vmem:[%s2683_s11 + $0x48] sm:$0xff] %vm258_vm2, %v2179_v0 }
  0xe1   : > { %v1092_v47 = vadd.f32 %v1091_v41, %v1003_v40  ;;  %866 = vmatmul.bf16.gmra.mxu0 %v1983_v39  ;;  %v2024_v41 = vld [vmem:[%s3229_s1 + $0x1b8] sm:$0xf0]  ;;  %269 = vst.msk [vmem:[%s2683_s11 + $0x50] sm:$0xff] %vm258_vm2, %v2179_v0 }
  0xe2   : > { %955 = vmatmul.bf16.gmra.mxu1 %v1987_v43  ;;  %v2015_v43 = vor.u32 %v2120_v30, %v2014_v29  ;;  %270 = vst.msk [vmem:[%s2683_s11 + $0x58] sm:$0xff] %vm258_vm2, %v2179_v0 }
  0xe3   : > { %v1164_v48 = vpack.c.bf16 %v1092_v47, %v1092_v47  ;;  %1044 = vmatmul.bf16.gmra.mxu2 %v1991_v44  ;;  %v1455_v50 = vmul.f32 %v1092_v47, %v1092_v47  ;;  %v1272_v52 = vsel %vm1256_vm0, %v1092_v47, 0.0  ;;  %v2019_v47 = vor.u32 %v2118_v34, %v2016_v35  ;;  %271 = vst.msk [vmem:[%s2683_s11 + $0x60] sm:$0xff] %vm258_vm2, %v2179_v0  ;;  %v2046_v34 = vld [vmem:[%s3229_s1 + $0x1e0] sm:$0xf]  ;;  %v2128_v35 = vld [vmem:[%s3229_s1 + $0x1ec] sm:$0xf0] }
  0xe4   : > { %1133 = vmatmul.bf16.gmra.mxu3 %v1995_v46  ;;  %272 = vst.msk [vmem:[%s2683_s11 + $0x68] sm:$0xff] %vm258_vm2, %v2179_v0 }
  0xe5   : > { %1197 = vst.msk [vmem:[%s2515_s12 + $0x14] sm:$0xf] %vm1191_vm1, %v1164_v48  ;;  %v1497_v51 = vsel %vm1256_vm0, %v1455_v50, 0.0  ;;  %v2023_v48 = vor.u32 %v2121_v37, %v2022_v36  ;;  %v2027_v50 = vor.u32 %v2119_v38, %v2024_v41  ;;  %v2126_v36 = vld [vmem:[%s3229_s1 + $0x1e4] sm:$0xf] }
  0xe6   : > { %v1005_v53 = vpop.f32.mrf.mxu2  ;;  %1498 = vadd.xlane.f32.xlu1 %v1497_v51  ;;  %1273 = vadd.xlane.f32.xlu2 %v1272_v52  ;;  %v829_v56 = vpop.f32.mrf.mxu0  ;;  %273 = vst.msk [vmem:[%s2683_s11 + $0x70] sm:$0xff] %vm258_vm2, %v2179_v0  ;;  %v2054_v41 = vld [vmem:[%s3229_s1 + $0x1e8] sm:$0xf] }
  0xe7   : > { %v1006_v54 = vadd.f32 %v1005_v53, %v917_v49  ;;  %v1094_v55 = vpop.f32.mrf.mxu3  ;;  %v918_v57 = vpop.f32.mrf.mxu1  ;;  %274 = vst.msk [vmem:[%s2683_s11 + $0x78] sm:$0xff] %vm258_vm2, %v2179_v0 }
  0xe8   : > { %v919_v5 = vadd.f32 %v918_v57, %v829_v56  ;;  %275 = vst.msk [vmem:[%s2683_s11 + $0x80] sm:$0xff] %vm258_vm2, %v2179_v0 }
  0xe9   : > { %v1095_v58 = vadd.f32 %v1094_v55, %v1006_v54  ;;  %276 = vst.msk [vmem:[%s2683_s11 + $0x88] sm:$0xff] %vm258_vm2, %v2179_v0 }
  0xea   : > { %277 = vst.msk [vmem:[%s2683_s11 + $0x90] sm:$0xff] %vm258_vm2, %v2179_v0 }
  0xeb   : > { %v1165_v61 = vpack.c.bf16 %v1095_v58, %v1095_v58  ;;  %v1275_v62 = vsel %vm1256_vm0, %v1095_v58, 0.0  ;;  %v1456_v63 = vmul.f32 %v1095_v58, %v1095_v58  ;;  %278 = vst.msk [vmem:[%s2683_s11 + $0x98] sm:$0xff] %vm258_vm2, %v2179_v0 }
  0xec   : > { %1276 = vadd.xlane.f32.xlu0 %v1275_v62  ;;  %279 = vst.msk [vmem:[%s2683_s11 + $0xa0] sm:$0xff] %vm258_vm2, %v2179_v0 }
  0xed   : > { %1198 = vst.msk [vmem:[%s2515_s12 + $0x18] sm:$0xf] %vm1191_vm1, %v1165_v61  ;;  %v1500_v6 = vsel %vm1256_vm0, %v1456_v63, 0.0  ;;  %v2030_v63 = vld [vmem:[%s3229_s1 + $0x1c0] sm:$0xf] }
  0xee   : > { %v1007_v8 = vpop.f32.mrf.mxu2  ;;  %1501 = vadd.xlane.f32.xlu2 %v1500_v6  ;;  %v832_v12 = vpop.f32.mrf.mxu0  ;;  %v2032_v6 = vld [vmem:[%s3229_s1 + $0x1d0] sm:$0xf0]  ;;  %280 = vst.msk [vmem:[%s2683_s11 + $0xa8] sm:$0xff] %vm258_vm2, %v2179_v0 }
  0xef   : > { %v1008_v10 = vadd.f32 %v1007_v8, %v919_v5  ;;  %v1096_v11 = vpop.f32.mrf.mxu3  ;;  %v921_v15 = vpop.f32.mrf.mxu1  ;;  %v2125_v8 = vld [vmem:[%s3229_s1 + $0x1d4] sm:$0xf0]  ;;  %281 = vst.msk [vmem:[%s2683_s11 + $0xb0] sm:$0xff] %vm258_vm2, %v2179_v0 }
  0xf0   : > { %v922_v19 = vadd.f32 %v921_v15, %v832_v12  ;;  %v2040_v12 = vld [vmem:[%s3229_s1 + $0x1d8] sm:$0xf0]  ;;  %282 = vst.msk [vmem:[%s2683_s11 + $0xb8] sm:$0xff] %vm258_vm2, %v2179_v0 }
  0xf1   : > { %v1097_v17 = vadd.f32 %v1096_v11, %v1008_v10  ;;  %871 = vmatmul.bf16.gmra.mxu0 %v1999_v9  ;;  %v2123_v9 = vld [vmem:[%s3229_s1 + $0x1cc] sm:$0xf]  ;;  %283 = vst.msk [vmem:[%s2683_s11 + $0xc0] sm:$0xff] %vm258_vm2, %v2179_v0 }
  0xf2   : > { %960 = vmatmul.bf16.gmra.mxu1 %v2003_v13  ;;  %284 = vst.msk [vmem:[%s2683_s11 + $0xc8] sm:$0xff] %vm258_vm2, %v2179_v0 }
  0xf3   : > { %v1166_v18 = vpack.c.bf16 %v1097_v17, %v1097_v17  ;;  %1049 = vmatmul.bf16.gmra.mxu2 %v2007_v14  ;;  %v1278_v20 = vsel %vm1256_vm0, %v1097_v17, 0.0  ;;  %v1457_v21 = vmul.f32 %v1097_v17, %v1097_v17  ;;  %v2031_v14 = vor.u32 %v2124_v1, %v2030_v63  ;;  %285 = vst.msk [vmem:[%s2683_s11 + $0xd0] sm:$0xff] %vm258_vm2, %v2179_v0 }
  0xf4   : > { %1138 = vmatmul.bf16.gmra.mxu3 %v2011_v16  ;;  %1279 = vadd.xlane.f32.xlu1 %v1278_v20  ;;  %286 = vst.msk [vmem:[%s2683_s11 + $0xd8] sm:$0xff] %vm258_vm2, %v2179_v0 }
  0xf5   : > { %1199 = vst.msk [vmem:[%s2515_s12 + $0x1c] sm:$0xf] %vm1191_vm1, %v1166_v18  ;;  %v1503_v22 = vsel %vm1256_vm0, %v1457_v21, 0.0  ;;  %v2035_v18 = vor.u32 %v2122_v2, %v2032_v6  ;;  %v2043_v21 = vor.u32 %v2123_v9, %v2040_v12 }
  0xf6   : > { %v1010_v23 = vpop.f32.mrf.mxu2  ;;  %1504 = vadd.xlane.f32.xlu0 %v1503_v22  ;;  %v834_v26 = vpop.f32.mrf.mxu0  ;;  %287 = vst.msk [vmem:[%s2683_s11 + $0xe0] sm:$0xff] %vm258_vm2, %v2179_v0 }
  0xf7   : > { %v1011_v24 = vadd.f32 %v1010_v23, %v922_v19  ;;  %v1099_v25 = vpop.f32.mrf.mxu3  ;;  %v923_v27 = vpop.f32.mrf.mxu1  ;;  %v2039_v19 = vor.u32 %v2125_v8, %v2038_v7  ;;  %288 = vst.msk [vmem:[%s2683_s11 + $0xe8] sm:$0xff] %vm258_vm2, %v2179_v0 }
  0xf8   : > { %v924_v39 = vadd.f32 %v923_v27, %v834_v26  ;;  %289 = vst.msk [vmem:[%s2683_s11 + $0xf0] sm:$0xff] %vm258_vm2, %v2179_v0 }
  0xf9   : > { %v1100_v28 = vadd.f32 %v1099_v25, %v1011_v24  ;;  %290 = vst.msk [vmem:[%s2683_s11 + $0xf8] sm:$0xff] %vm258_vm2, %v2179_v0 }
  0xfa   : > { %291 = vst.msk [vmem:[%s2848_s6] sm:$0xff] %vm258_vm2, %v2179_v0 }
  0xfb   : > { %v1167_v31 = vpack.c.bf16 %v1100_v28, %v1100_v28  ;;  %v1281_v32 = vsel %vm1256_vm0, %v1100_v28, 0.0  ;;  %v1458_v33 = vmul.f32 %v1100_v28, %v1100_v28  ;;  %292 = vst.msk [vmem:[%s2848_s6 + $0x8] sm:$0xff] %vm258_vm2, %v2179_v0 }
  0xfc   : > { %1282 = vadd.xlane.f32.xlu2 %v1281_v32  ;;  %293 = vst.msk [vmem:[%s2848_s6 + $0x10] sm:$0xff] %vm258_vm2, %v2179_v0 }
  0xfd   : > { %1200 = vst.msk [vmem:[%s2515_s12 + $0x20] sm:$0xf] %vm1191_vm1, %v1167_v31  ;;  %v1506_v40 = vsel %vm1256_vm0, %v1458_v33, 0.0 }
  0xfe   : > { %v1012_v42 = vpop.f32.mrf.mxu2  ;;  %1507 = vadd.xlane.f32.xlu1 %v1506_v40  ;;  %v837_v46 = vpop.f32.mrf.mxu0  ;;  %v2048_v40 = vld [vmem:[%s3229_s1 + $0x1f0] sm:$0xf0]  ;;  %294 = vst.msk [vmem:[%s2848_s6 + $0x18] sm:$0xff] %vm258_vm2, %v2179_v0 }
  0xff   : > { %v1013_v44 = vadd.f32 %v1012_v42, %v924_v39  ;;  %v1101_v45 = vpop.f32.mrf.mxu3  ;;  %v926_v49 = vpop.f32.mrf.mxu1  ;;  %v2129_v42 = vld [vmem:[%s3229_s1 + $0x1f4] sm:$0xf0]  ;;  %295 = vst.msk [vmem:[%s2848_s6 + $0x20] sm:$0xff] %vm258_vm2, %v2179_v0 }
 0x100   : > { %v927_v53 = vadd.f32 %v926_v49, %v837_v46  ;;  %v2056_v46 = vld [vmem:[%s3229_s1 + $0x1f8] sm:$0xf0]  ;;  %296 = vst.msk [vmem:[%s2848_s6 + $0x28] sm:$0xff] %vm258_vm2, %v2179_v0 }
 0x101   : > { %v1102_v51 = vadd.f32 %v1101_v45, %v1013_v44  ;;  %876 = vmatmul.bf16.gmra.mxu0 %v2015_v43  ;;  %v2127_v43 = vld [vmem:[%s3229_s1 + $0x1ec] sm:$0xf]  ;;  %297 = vst.msk [vmem:[%s2848_s6 + $0x30] sm:$0xff] %vm258_vm2, %v2179_v0 }
 0x102   : > { %965 = vmatmul.bf16.gmra.mxu1 %v2019_v47  ;;  %298 = vst.msk [vmem:[%s2848_s6 + $0x38] sm:$0xff] %vm258_vm2, %v2179_v0 }
 0x103   : > { %v1168_v52 = vpack.c.bf16 %v1102_v51, %v1102_v51  ;;  %1054 = vmatmul.bf16.gmra.mxu2 %v2023_v48  ;;  %v1284_v54 = vsel %vm1256_vm0, %v1102_v51, 0.0  ;;  %v1459_v55 = vmul.f32 %v1102_v51, %v1102_v51  ;;  %v2047_v48 = vor.u32 %v2128_v35, %v2046_v34  ;;  %299 = vst.msk [vmem:[%s2848_s6 + $0x40] sm:$0xff] %vm258_vm2, %v2179_v0 }
 0x104   : > { %1143 = vmatmul.bf16.gmra.mxu3 %v2027_v50  ;;  %1285 = vadd.xlane.f32.xlu0 %v1284_v54  ;;  %300 = vst.msk [vmem:[%s2848_s6 + $0x48] sm:$0xff] %vm258_vm2, %v2179_v0 }
 0x105   : > { %1201 = vst.msk [vmem:[%s2515_s12 + $0x24] sm:$0xf] %vm1191_vm1, %v1168_v52  ;;  %v1509_v56 = vsel %vm1256_vm0, %v1459_v55, 0.0  ;;  %v2051_v52 = vor.u32 %v2126_v36, %v2048_v40  ;;  %v2059_v55 = vor.u32 %v2127_v43, %v2056_v46 }
 0x106   : > { %v1015_v57 = vpop.f32.mrf.mxu2  ;;  %1510 = vadd.xlane.f32.xlu2 %v1509_v56  ;;  %v839_v60 = vpop.f32.mrf.mxu0  ;;  %301 = vst.msk [vmem:[%s2848_s6 + $0x50] sm:$0xff] %vm258_vm2, %v2179_v0 }
 0x107   : > { %v1016_v58 = vadd.f32 %v1015_v57, %v927_v53  ;;  %v1104_v59 = vpop.f32.mrf.mxu3  ;;  %v928_v61 = vpop.f32.mrf.mxu1  ;;  %v2055_v53 = vor.u32 %v2129_v42, %v2054_v41  ;;  %302 = vst.msk [vmem:[%s2848_s6 + $0x58] sm:$0xff] %vm258_vm2, %v2179_v0 }
 0x108   : > { %v929_v10 = vadd.f32 %v928_v61, %v839_v60  ;;  %303 = vst.msk [vmem:[%s2848_s6 + $0x60] sm:$0xff] %vm258_vm2, %v2179_v0 }
 0x109   : > { %v1105_v62 = vadd.f32 %v1104_v59, %v1016_v58  ;;  %304 = vst.msk [vmem:[%s2848_s6 + $0x68] sm:$0xff] %vm258_vm2, %v2179_v0 }
 0x10a   : > { %305 = vst.msk [vmem:[%s2848_s6 + $0x70] sm:$0xff] %vm258_vm2, %v2179_v0 }
 0x10b   : > { %v1169_v3 = vpack.c.bf16 %v1105_v62, %v1105_v62  ;;  %v1287_v4 = vsel %vm1256_vm0, %v1105_v62, 0.0  ;;  %v1460_v5 = vmul.f32 %v1105_v62, %v1105_v62  ;;  %306 = vst.msk [vmem:[%s2848_s6 + $0x78] sm:$0xff] %vm258_vm2, %v2179_v0 }
 0x10c   : > { %1288 = vadd.xlane.f32.xlu1 %v1287_v4  ;;  %307 = vst.msk [vmem:[%s2848_s6 + $0x80] sm:$0xff] %vm258_vm2, %v2179_v0 }
 0x10d   : > { %1202 = vst.msk [vmem:[%s2515_s12 + $0x28] sm:$0xf] %vm1191_vm1, %v1169_v3  ;;  %v1512_v11 = vsel %vm1256_vm0, %v1460_v5, 0.0 }
 0x10e   : > { %v1017_v13 = vpop.f32.mrf.mxu2  ;;  %1513 = vadd.xlane.f32.xlu0 %v1512_v11  ;;  %v842_v17 = vpop.f32.mrf.mxu0  ;;  %308 = vst.msk [vmem:[%s2848_s6 + $0x88] sm:$0xff] %vm258_vm2, %v2179_v0 }
 0x10f   : > { %v1018_v15 = vadd.f32 %v1017_v13, %v929_v10  ;;  %v1106_v16 = vpop.f32.mrf.mxu3  ;;  %v931_v20 = vpop.f32.mrf.mxu1  ;;  %v1224_v10 = vld [vmem:[%s2683_s11] sm:$0xff]  ;;  %309 = vst.msk [vmem:[%s2848_s6 + $0x90] sm:$0xff] %vm258_vm2, %v2179_v0 }
 0x110   : > { %v932_v23 = vadd.f32 %v931_v20, %v842_v17  ;;  %310 = vst.msk [vmem:[%s2848_s6 + $0x98] sm:$0xff] %vm258_vm2, %v2179_v0 }
 0x111   : > { %v1107_v22 = vadd.f32 %v1106_v16, %v1018_v15  ;;  %881 = vmatmul.bf16.gmra.mxu0 %v2031_v14  ;;  %311 = vst.msk [vmem:[%s2848_s6 + $0xa0] sm:$0xff] %vm258_vm2, %v2179_v0 }
 0x112   : > { %970 = vmatmul.bf16.gmra.mxu1 %v2035_v18  ;;  %312 = vst.msk [vmem:[%s2848_s6 + $0xa8] sm:$0xff] %vm258_vm2, %v2179_v0 }
 0x113   : > { %v1170_v24 = vpack.c.bf16 %v1107_v22, %v1107_v22  ;;  %1059 = vmatmul.bf16.gmra.mxu2 %v2039_v19  ;;  %v1290_v25 = vsel %vm1256_vm0, %v1107_v22, 0.0  ;;  %v1461_v26 = vmul.f32 %v1107_v22, %v1107_v22  ;;  %313 = vst.msk [vmem:[%s2848_s6 + $0xb0] sm:$0xff] %vm258_vm2, %v2179_v0 }
 0x114   : > { %1148 = vmatmul.bf16.gmra.mxu3 %v2043_v21  ;;  %1291 = vadd.xlane.f32.xlu2 %v1290_v25  ;;  %314 = vst.msk [vmem:[%s2848_s6 + $0xb8] sm:$0xff] %vm258_vm2, %v2179_v0 }
 0x115   : > { %1203 = vst.msk [vmem:[%s2515_s12 + $0x2c] sm:$0xf] %vm1191_vm1, %v1170_v24  ;;  %v1515_v27 = vsel %vm1256_vm0, %v1461_v26, 0.0  ;;  %v1418_v24 = vld [vmem:[%s2848_s6] sm:$0xff] }
 0x116   : > { %v1020_v28 = vpop.f32.mrf.mxu2  ;;  %1516 = vadd.xlane.f32.xlu1 %v1515_v27  ;;  %v844_v31 = vpop.f32.mrf.mxu0  ;;  %315 = vst.msk [vmem:[%s2848_s6 + $0xc0] sm:$0xff] %vm258_vm2, %v2179_v0 }
 0x117   : > { %v1021_v29 = vadd.f32 %v1020_v28, %v932_v23  ;;  %v1109_v30 = vpop.f32.mrf.mxu3  ;;  %v933_v32 = vpop.f32.mrf.mxu1  ;;  %316 = vst.msk [vmem:[%s2848_s6 + $0xc8] sm:$0xff] %vm258_vm2, %v2179_v0 }
 0x118   : > { %v934_v44 = vadd.f32 %v933_v32, %v844_v31  ;;  %317 = vst.msk [vmem:[%s2848_s6 + $0xd0] sm:$0xff] %vm258_vm2, %v2179_v0 }
 0x119   : > { %v1110_v33 = vadd.f32 %v1109_v30, %v1021_v29  ;;  %318 = vst.msk [vmem:[%s2848_s6 + $0xd8] sm:$0xff] %vm258_vm2, %v2179_v0 }
 0x11a   : > { %319 = vst.msk [vmem:[%s2848_s6 + $0xe0] sm:$0xff] %vm258_vm2, %v2179_v0 }
 0x11b   : > { %v1171_v37 = vpack.c.bf16 %v1110_v33, %v1110_v33  ;;  %v1293_v38 = vsel %vm1256_vm0, %v1110_v33, 0.0  ;;  %v1462_v39 = vmul.f32 %v1110_v33, %v1110_v33  ;;  %320 = vst.msk [vmem:[%s2848_s6 + $0xe8] sm:$0xff] %vm258_vm2, %v2179_v0 }
 0x11c   : > { %1294 = vadd.xlane.f32.xlu0 %v1293_v38  ;;  %321 = vst.msk [vmem:[%s2848_s6 + $0xf0] sm:$0xff] %vm258_vm2, %v2179_v0 }
 0x11d   : > { %1204 = vst.msk [vmem:[%s2515_s12 + $0x30] sm:$0xf] %vm1191_vm1, %v1171_v37  ;;  %v1518_v45 = vsel %vm1256_vm0, %v1462_v39, 0.0 }
 0x11e   : > { %v1022_v47 = vpop.f32.mrf.mxu2  ;;  %1519 = vadd.xlane.f32.xlu2 %v1518_v45  ;;  %v847_v51 = vpop.f32.mrf.mxu0  ;;  %322 = vst.msk [vmem:[%s2848_s6 + $0xf8] sm:$0xff] %vm258_vm2, %v2179_v0 }
 0x11f   : > { %v1023_v49 = vadd.f32 %v1022_v47, %v934_v44  ;;  %v1111_v50 = vpop.f32.mrf.mxu3  ;;  %v936_v54 = vpop.f32.mrf.mxu1 }
 0x120   : > { %v937_v57 = vadd.f32 %v936_v54, %v847_v51 }
 0x121   : > { %v1112_v56 = vadd.f32 %v1111_v50, %v1023_v49  ;;  %886 = vmatmul.bf16.gmra.mxu0 %v2047_v48 }
 0x122   : > { %975 = vmatmul.bf16.gmra.mxu1 %v2051_v52 }
 0x123   : > { %v1172_v58 = vpack.c.bf16 %v1112_v56, %v1112_v56  ;;  %1064 = vmatmul.bf16.gmra.mxu2 %v2055_v53  ;;  %v1296_v59 = vsel %vm1256_vm0, %v1112_v56, 0.0  ;;  %v1463_v60 = vmul.f32 %v1112_v56, %v1112_v56 }
 0x124   : > { %1153 = vmatmul.bf16.gmra.mxu3 %v2059_v55  ;;  %1297 = vadd.xlane.f32.xlu1 %v1296_v59 }
 0x125   : > { %1205 = vst.msk [vmem:[%s2515_s12 + $0x34] sm:$0xf] %vm1191_vm1, %v1172_v58  ;;  %v1521_v61 = vsel %vm1256_vm0, %v1463_v60, 0.0 }
 0x126   : > { %v1025_v62 = vpop.f32.mrf.mxu2  ;;  %1522 = vadd.xlane.f32.xlu0 %v1521_v61  ;;  %v849_v2 = vpop.f32.mrf.mxu0 }
 0x127   : > { %v1026_v63 = vadd.f32 %v1025_v62, %v937_v57  ;;  %v1114_v1 = vpop.f32.mrf.mxu3  ;;  %v938_v3 = vpop.f32.mrf.mxu1  ;;  %v1225_v57 = vld [vmem:[%s2683_s11 + $0x8] sm:$0xff] }
 0x128   : > { %v939_v8 = vadd.f32 %v938_v3, %v849_v2  ;;  %v1419_v62 = vld [vmem:[%s2848_s6 + $0x8] sm:$0xff]  ;;  %v1226_v3 = vld [vmem:[%s2683_s11 + $0x10] sm:$0xff] }
 0x129   : > { %v1115_v4 = vadd.f32 %v1114_v1, %v1026_v63 }
 0x12b   : > { %v1173_v5 = vpack.c.bf16 %v1115_v4, %v1115_v4  ;;  %v1299_v6 = vsel %vm1256_vm0, %v1115_v4, 0.0  ;;  %v1464_v7 = vmul.f32 %v1115_v4, %v1115_v4 }
 0x12c   : > { %1300 = vadd.xlane.f32.xlu2 %v1299_v6 }
 0x12d   : > { %1206 = vst.msk [vmem:[%s2515_s12 + $0x38] sm:$0xf] %vm1191_vm1, %v1173_v5  ;;  %v1524_v9 = vsel %vm1256_vm0, %v1464_v7, 0.0 }
 0x12e   : > { %v1027_v11 = vpop.f32.mrf.mxu2  ;;  %1525 = vadd.xlane.f32.xlu1 %v1524_v9  ;;  %v852_v16 = vpop.f32.mrf.mxu0  ;;  %v1420_v9 = vld [vmem:[%s2848_s6 + $0x10] sm:$0xff] }
 0x12f   : > { %v1028_v12 = vadd.f32 %v1027_v11, %v939_v8  ;;  %v1116_v13 = vpop.f32.mrf.mxu3  ;;  %v1259_v14 = vpop.xlane.xlu0 %1258 }
 0x130   : > { %v1353_v15 = vadd.f32 %v1259_v14, %v1224_v10  ;;  %v941_v17 = vpop.f32.mrf.mxu1 }
 0x131   : > { %v1117_v18 = vadd.f32 %v1116_v13, %v1028_v12  ;;  %v942_v20 = vadd.f32 %v941_v17, %v852_v16  ;;  %v1484_v21 = vpop.xlane.xlu2 %1483  ;;  %v1421_v12 = vld [vmem:[%s2848_s6 + $0x18] sm:$0xff] }
 0x132   : > { %1386 = vst.msk [vmem:[%s2683_s11] sm:$0xff] %vm258_vm2, %v1353_v15  ;;  %v1578_v26 = vadd.f32 %v1484_v21, %v1418_v24 }
 0x133   : > { %v1174_v19 = vpack.c.bf16 %v1117_v18, %v1117_v18  ;;  %v1302_v22 = vsel %vm1256_vm0, %v1117_v18, 0.0  ;;  %v1465_v23 = vmul.f32 %v1117_v18, %v1117_v18  ;;  %v1227_v18 = vld [vmem:[%s2683_s11 + $0x18] sm:$0xff] }
 0x134   : > { %1303 = vadd.xlane.f32.xlu0 %v1302_v22  ;;  %1610 = vst.msk [vmem:[%s2848_s6] sm:$0xff] %vm258_vm2, %v1578_v26  ;;  %v1228_v26 = vld [vmem:[%s2683_s11 + $0x20] sm:$0xff] }
 0x135   : > { %1207 = vst.msk [vmem:[%s2515_s12 + $0x3c] sm:$0xf] %vm1191_vm1, %v1174_v19  ;;  %v1527_v25 = vsel %vm1256_vm0, %v1465_v23, 0.0  ;;  %v1422_v23 = vld [vmem:[%s2848_s6 + $0x20] sm:$0xff] }
 0x136   : > { %v1030_v27 = vpop.f32.mrf.mxu2  ;;  %1528 = vadd.xlane.f32.xlu2 %v1527_v25  ;;  %v854_v30 = vpop.f32.mrf.mxu0 }
 0x137   : > { %v1031_v28 = vadd.f32 %v1030_v27, %v942_v20  ;;  %v1119_v29 = vpop.f32.mrf.mxu3  ;;  %v1262_v44 = vpop.xlane.xlu0 %1261 }
 0x138   : > { %v943_v31 = vpop.f32.mrf.mxu1  ;;  %v1354_v2 = vadd.f32 %v1262_v44, %v1225_v57 }
 0x139   : > { %v2893_v32 = vadd.f32 %v1119_v29, %v1031_v28  ;;  %v944_v35 = vadd.f32 %v943_v31, %v854_v30 }
 0x13a   : > { %1387 = vst.msk [vmem:[%s2683_s11 + $0x8] sm:$0xff] %vm258_vm2, %v1354_v2  ;;  %v1231_v2 = vld [vmem:[%s2683_s11 + $0x38] sm:$0xff] }
 0x13b   : > { %v1305_v33 = vsel %vm1256_vm0, %v2893_v32, 0.0  ;;  %v1466_v34 = vmul.f32 %v2893_v32, %v2893_v32  ;;  %v1175_v61 = vpack.c.bf16 %v2893_v32, %v2893_v32 }
 0x13c   : > { %1306 = vadd.xlane.f32.xlu1 %v1305_v33  ;;  %v1423_v33 = vld [vmem:[%s2848_s6 + $0x28] sm:$0xff] }
 0x13d   : > { %v1530_v36 = vsel %vm1256_vm0, %v1466_v34, 0.0  ;;  %1208 = vst.msk [vmem:[%s2515_s12 + $0x40] sm:$0xf] %vm1191_vm1, %v1175_v61 }
 0x13e   : > { %v1032_v37 = vpop.f32.mrf.mxu2  ;;  %1531 = vadd.xlane.f32.xlu0 %v1530_v36  ;;  %v857_v41 = vpop.f32.mrf.mxu0  ;;  %v1229_v36 = vld [vmem:[%s2683_s11 + $0x28] sm:$0xff] }
 0x13f   : > { %v1033_v38 = vadd.f32 %v1032_v37, %v944_v35  ;;  %v1121_v39 = vpop.f32.mrf.mxu3  ;;  %v1265_v40 = vpop.xlane.xlu1 %1264 }
 0x140   : > { %v946_v43 = vpop.f32.mrf.mxu1  ;;  %v1487_v60 = vpop.xlane.xlu0 %1486  ;;  %v1355_v11 = vadd.f32 %v1265_v40, %v1226_v3 }
 0x141   : > { %v1122_v42 = vadd.f32 %v1121_v39, %v1033_v38  ;;  %v947_v45 = vadd.f32 %v946_v43, %v857_v41  ;;  %v1579_v8 = vadd.f32 %v1487_v60, %v1419_v62 }
 0x142   : > { %1388 = vst.msk [vmem:[%s2683_s11 + $0x10] sm:$0xff] %vm258_vm2, %v1355_v11 }
 0x143   : > { %v1308_v46 = vsel %vm1256_vm0, %v1122_v42, 0.0  ;;  %v1467_v47 = vmul.f32 %v1122_v42, %v1122_v42  ;;  %v1176_v5 = vpack.c.bf16 %v1122_v42, %v1122_v42  ;;  %1611 = vst.msk [vmem:[%s2848_s6 + $0x8] sm:$0xff] %vm258_vm2, %v1579_v8 }
 0x144   : > { %1309 = vadd.xlane.f32.xlu2 %v1308_v46 }
 0x145   : > { %v1533_v48 = vsel %vm1256_vm0, %v1467_v47, 0.0  ;;  %1209 = vst.msk [vmem:[%s2515_s12 + $0x44] sm:$0xf] %vm1191_vm1, %v1176_v5 }
 0x146   : > { %v1035_v49 = vpop.f32.mrf.mxu2  ;;  %1534 = vadd.xlane.f32.xlu1 %v1533_v48  ;;  %v859_v53 = vpop.f32.mrf.mxu0  ;;  %v1230_v48 = vld [vmem:[%s2683_s11 + $0x30] sm:$0xff] }
 0x147   : > { %v1036_v50 = vadd.f32 %v1035_v49, %v947_v45  ;;  %v1124_v51 = vpop.f32.mrf.mxu3  ;;  %v1490_v52 = vpop.xlane.xlu1 %1489 }
 0x148   : > { %v948_v55 = vpop.f32.mrf.mxu1  ;;  %v1580_v0 = vadd.f32 %v1490_v52, %v1420_v9 }
 0x149   : > { %v1125_v54 = vadd.f32 %v1124_v51, %v1036_v50  ;;  %v1493_v56 = vpop.xlane.xlu2 %1492  ;;  %v949_v63 = vadd.f32 %v948_v55, %v859_v53  ;;  %v1424_v55 = vld [vmem:[%s2848_s6 + $0x30] sm:$0xff] }
 0x14a   : > { %v1581_v22 = vadd.f32 %v1493_v56, %v1421_v12  ;;  %1612 = vst.msk [vmem:[%s2848_s6 + $0x10] sm:$0xff] %vm258_vm2, %v1580_v0 }
 0x14b   : > { %v1311_v58 = vsel %vm1256_vm0, %v1125_v54, 0.0  ;;  %v1468_v59 = vmul.f32 %v1125_v54, %v1125_v54  ;;  %v1177_v16 = vpack.c.bf16 %v1125_v54, %v1125_v54 }
 0x14c   : > { %1312 = vadd.xlane.f32.xlu0 %v1311_v58  ;;  %1613 = vst.msk [vmem:[%s2848_s6 + $0x18] sm:$0xff] %vm258_vm2, %v1581_v22 }
 0x14d   : > { %v1536_v1 = vsel %vm1256_vm0, %v1468_v59, 0.0  ;;  %1210 = vst.msk [vmem:[%s2515_s12 + $0x48] sm:$0xf] %vm1191_vm1, %v1177_v16 }
 0x14e   : > { %v1037_v4 = vpop.f32.mrf.mxu2  ;;  %1537 = vadd.xlane.f32.xlu2 %v1536_v1  ;;  %v862_v10 = vpop.f32.mrf.mxu0 }
 0x14f   : > { %v1038_v6 = vadd.f32 %v1037_v4, %v949_v63  ;;  %v1126_v7 = vpop.f32.mrf.mxu3  ;;  %v1268_v14 = vpop.xlane.xlu1 %1267 }
 0x150   : > { %v951_v15 = vpop.f32.mrf.mxu1  ;;  %v1356_v28 = vadd.f32 %v1268_v14, %v1227_v18  ;;  %v1232_v18 = vld [vmem:[%s2683_s11 + $0x40] sm:$0xff] }
 0x151   : > { %v1127_v13 = vadd.f32 %v1126_v7, %v1038_v6  ;;  %v1271_v17 = vpop.xlane.xlu2 %1270  ;;  %v952_v19 = vadd.f32 %v951_v15, %v862_v10  ;;  %v1496_v24 = vpop.xlane.xlu0 %1495  ;;  %v1425_v7 = vld [vmem:[%s2848_s6 + $0x38] sm:$0xff] }
 0x152   : > { %v1582_v30 = vadd.f32 %v1496_v24, %v1422_v23  ;;  %v1357_v34 = vadd.f32 %v1271_v17, %v1228_v26  ;;  %1389 = vst.msk [vmem:[%s2683_s11 + $0x18] sm:$0xff] %vm258_vm2, %v1356_v28  ;;  %v1426_v23 = vld [vmem:[%s2848_s6 + $0x40] sm:$0xff] }
 0x153   : > { %v1314_v20 = vsel %vm1256_vm0, %v1127_v13, 0.0  ;;  %v1469_v21 = vmul.f32 %v1127_v13, %v1127_v13  ;;  %v1178_v25 = vpack.c.bf16 %v1127_v13, %v1127_v13 }
 0x154   : > { %1315 = vadd.xlane.f32.xlu1 %v1314_v20  ;;  %1614 = vst.msk [vmem:[%s2848_s6 + $0x20] sm:$0xff] %vm258_vm2, %v1582_v30 }
 0x155   : > { %v1539_v27 = vsel %vm1256_vm0, %v1469_v21, 0.0  ;;  %1211 = vst.msk [vmem:[%s2515_s12 + $0x4c] sm:$0xf] %vm1191_vm1, %v1178_v25 }
 0x156   : > { %v1040_v29 = vpop.f32.mrf.mxu2  ;;  %1540 = vadd.xlane.f32.xlu0 %v1539_v27  ;;  %v864_v35 = vpop.f32.mrf.mxu0  ;;  %1390 = vst.msk [vmem:[%s2683_s11 + $0x20] sm:$0xff] %vm258_vm2, %v1357_v34 }
 0x157   : > { %v1041_v31 = vadd.f32 %v1040_v29, %v952_v19  ;;  %v1129_v32 = vpop.f32.mrf.mxu3 }
 0x158   : > { %v953_v38 = vpop.f32.mrf.mxu1 }
 0x159   : > { %v1130_v37 = vadd.f32 %v1129_v32, %v1041_v31  ;;  %v1499_v39 = vpop.xlane.xlu1 %1498  ;;  %v1274_v41 = vpop.xlane.xlu2 %1273  ;;  %v954_v46 = vadd.f32 %v953_v38, %v864_v35  ;;  %v1233_v35 = vld [vmem:[%s2683_s11 + $0x48] sm:$0xff] }
 0x15a   : > { %v1583_v40 = vadd.f32 %v1499_v39, %v1423_v33  ;;  %v1358_v43 = vadd.f32 %v1274_v41, %v1229_v36 }
 0x15b   : > { %v1179_v42 = vpack.c.bf16 %v1130_v37, %v1130_v37  ;;  %v1317_v44 = vsel %vm1256_vm0, %v1130_v37, 0.0  ;;  %v1470_v45 = vmul.f32 %v1130_v37, %v1130_v37 }
 0x15c   : > { %1318 = vadd.xlane.f32.xlu2 %v1317_v44  ;;  %1615 = vst.msk [vmem:[%s2848_s6 + $0x28] sm:$0xff] %vm258_vm2, %v1583_v40  ;;  %v1427_v40 = vld [vmem:[%s2848_s6 + $0x48] sm:$0xff] }
 0x15d   : > { %1212 = vst.msk [vmem:[%s2515_s12 + $0x50] sm:$0xf] %vm1191_vm1, %v1179_v42  ;;  %v1542_v47 = vsel %vm1256_vm0, %v1470_v45, 0.0 }
 0x15e   : > { %v1042_v49 = vpop.f32.mrf.mxu2  ;;  %1543 = vadd.xlane.f32.xlu1 %v1542_v47  ;;  %1391 = vst.msk [vmem:[%s2683_s11 + $0x28] sm:$0xff] %vm258_vm2, %v1358_v43  ;;  %v867_v54 = vpop.f32.mrf.mxu0 }
 0x15f   : > { %v1043_v50 = vadd.f32 %v1042_v49, %v954_v46  ;;  %v1131_v51 = vpop.f32.mrf.mxu3  ;;  %v1277_v52 = vpop.xlane.xlu0 %1276 }
 0x160   : > { %v1359_v53 = vadd.f32 %v1277_v52, %v1230_v48  ;;  %v956_v57 = vpop.f32.mrf.mxu1  ;;  %v1234_v52 = vld [vmem:[%s2683_s11 + $0x50] sm:$0xff] }
 0x161   : > { %v1132_v56 = vadd.f32 %v1131_v51, %v1043_v50  ;;  %v957_v58 = vadd.f32 %v956_v57, %v867_v54  ;;  %v1502_v59 = vpop.xlane.xlu2 %1501  ;;  %v1428_v57 = vld [vmem:[%s2848_s6 + $0x50] sm:$0xff] }
 0x162   : > { %1392 = vst.msk [vmem:[%s2683_s11 + $0x30] sm:$0xff] %vm258_vm2, %v1359_v53  ;;  %v1584_v61 = vadd.f32 %v1502_v59, %v1424_v55 }
 0x163   : > { %v1180_v60 = vpack.c.bf16 %v1132_v56, %v1132_v56  ;;  %v1320_v62 = vsel %vm1256_vm0, %v1132_v56, 0.0  ;;  %v1471_v63 = vmul.f32 %v1132_v56, %v1132_v56 }
 0x164   : > { %1321 = vadd.xlane.f32.xlu0 %v1320_v62  ;;  %1616 = vst.msk [vmem:[%s2848_s6 + $0x30] sm:$0xff] %vm258_vm2, %v1584_v61 }
 0x165   : > { %1213 = vst.msk [vmem:[%s2515_s12 + $0x54] sm:$0xf] %vm1191_vm1, %v1180_v60  ;;  %v1545_v1 = vsel %vm1256_vm0, %v1471_v63, 0.0 }
 0x166   : > { %v1045_v3 = vpop.f32.mrf.mxu2  ;;  %1546 = vadd.xlane.f32.xlu2 %v1545_v1  ;;  %v869_v9 = vpop.f32.mrf.mxu0 }
 0x167   : > { %v1046_v4 = vadd.f32 %v1045_v3, %v957_v58  ;;  %v1134_v5 = vpop.f32.mrf.mxu3  ;;  %v1280_v6 = vpop.xlane.xlu1 %1279 }
 0x168   : > { %v1360_v8 = vadd.f32 %v1280_v6, %v1231_v2  ;;  %v958_v11 = vpop.f32.mrf.mxu1  ;;  %v1235_v6 = vld [vmem:[%s2683_s11 + $0x58] sm:$0xff] }
 0x169   : > { %v1135_v10 = vadd.f32 %v1134_v5, %v1046_v4  ;;  %v1505_v12 = vpop.xlane.xlu0 %1504  ;;  %v959_v17 = vadd.f32 %v958_v11, %v869_v9  ;;  %v1429_v11 = vld [vmem:[%s2848_s6 + $0x58] sm:$0xff] }
 0x16a   : > { %1393 = vst.msk [vmem:[%s2683_s11 + $0x38] sm:$0xff] %vm258_vm2, %v1360_v8  ;;  %v1585_v13 = vadd.f32 %v1505_v12, %v1425_v7 }
 0x16b   : > { %v1181_v14 = vpack.c.bf16 %v1135_v10, %v1135_v10  ;;  %v1323_v15 = vsel %vm1256_vm0, %v1135_v10, 0.0  ;;  %v1472_v16 = vmul.f32 %v1135_v10, %v1135_v10 }
 0x16c   : > { %1617 = vst.msk [vmem:[%s2848_s6 + $0x38] sm:$0xff] %vm258_vm2, %v1585_v13  ;;  %1324 = vadd.xlane.f32.xlu1 %v1323_v15 }
 0x16d   : > { %1214 = vst.msk [vmem:[%s2515_s12 + $0x58] sm:$0xf] %vm1191_vm1, %v1181_v14  ;;  %v1548_v0 = vsel %vm1256_vm0, %v1472_v16, 0.0 }
 0x16e   : > { %v1047_v19 = vpop.f32.mrf.mxu2  ;;  %1549 = vadd.xlane.f32.xlu0 %v1548_v0  ;;  %v872_v25 = vpop.f32.mrf.mxu0 }
 0x16f   : > { %v1048_v20 = vadd.f32 %v1047_v19, %v959_v17  ;;  %v1136_v21 = vpop.f32.mrf.mxu3  ;;  %v1283_v22 = vpop.xlane.xlu2 %1282 }
 0x170   : > { %v1361_v24 = vadd.f32 %v1283_v22, %v1232_v18  ;;  %v961_v27 = vpop.f32.mrf.mxu1  ;;  %v1236_v22 = vld [vmem:[%s2683_s11 + $0x60] sm:$0xff] }
 0x171   : > { %v1137_v26 = vadd.f32 %v1136_v21, %v1048_v20  ;;  %v1508_v28 = vpop.xlane.xlu1 %1507  ;;  %v962_v31 = vadd.f32 %v961_v27, %v872_v25  ;;  %v1430_v27 = vld [vmem:[%s2848_s6 + $0x60] sm:$0xff] }
 0x172   : > { %1394 = vst.msk [vmem:[%s2683_s11 + $0x40] sm:$0xff] %vm258_vm2, %v1361_v24  ;;  %v1586_v29 = vadd.f32 %v1508_v28, %v1426_v23 }
 0x173   : > { %v1182_v30 = vpack.c.bf16 %v1137_v26, %v1137_v26  ;;  %v1326_v32 = vsel %vm1256_vm0, %v1137_v26, 0.0  ;;  %v1473_v33 = vmul.f32 %v1137_v26, %v1137_v26 }
 0x174   : > { %1618 = vst.msk [vmem:[%s2848_s6 + $0x40] sm:$0xff] %vm258_vm2, %v1586_v29  ;;  %1327 = vadd.xlane.f32.xlu2 %v1326_v32 }
 0x175   : > { %1215 = vst.msk [vmem:[%s2515_s12 + $0x5c] sm:$0xf] %vm1191_vm1, %v1182_v30  ;;  %v1551_v34 = vsel %vm1256_vm0, %v1473_v33, 0.0 }
 0x176   : > { %v1050_v36 = vpop.f32.mrf.mxu2  ;;  %1552 = vadd.xlane.f32.xlu1 %v1551_v34  ;;  %v874_v42 = vpop.f32.mrf.mxu0 }
 0x177   : > { %v1051_v37 = vadd.f32 %v1050_v36, %v962_v31  ;;  %v1139_v38 = vpop.f32.mrf.mxu3  ;;  %v1286_v39 = vpop.xlane.xlu0 %1285 }
 0x178   : > { %v1362_v41 = vadd.f32 %v1286_v39, %v1233_v35  ;;  %v963_v44 = vpop.f32.mrf.mxu1  ;;  %v1237_v39 = vld [vmem:[%s2683_s11 + $0x68] sm:$0xff] }
 0x179   : > { %v1140_v43 = vadd.f32 %v1139_v38, %v1051_v37  ;;  %v1511_v45 = vpop.xlane.xlu2 %1510  ;;  %v964_v50 = vadd.f32 %v963_v44, %v874_v42  ;;  %v1431_v44 = vld [vmem:[%s2848_s6 + $0x68] sm:$0xff] }
 0x17a   : > { %1395 = vst.msk [vmem:[%s2683_s11 + $0x48] sm:$0xff] %vm258_vm2, %v1362_v41  ;;  %v1587_v46 = vadd.f32 %v1511_v45, %v1427_v40 }
 0x17b   : > { %v1183_v47 = vpack.c.bf16 %v1140_v43, %v1140_v43  ;;  %v1329_v48 = vsel %vm1256_vm0, %v1140_v43, 0.0  ;;  %v1474_v49 = vmul.f32 %v1140_v43, %v1140_v43 }
 0x17c   : > { %1619 = vst.msk [vmem:[%s2848_s6 + $0x48] sm:$0xff] %vm258_vm2, %v1587_v46  ;;  %1330 = vadd.xlane.f32.xlu0 %v1329_v48 }
 0x17d   : > { %1216 = vst.msk [vmem:[%s2515_s12 + $0x60] sm:$0xf] %vm1191_vm1, %v1183_v47  ;;  %v1554_v51 = vsel %vm1256_vm0, %v1474_v49, 0.0 }
 0x17e   : > { %v1052_v53 = vpop.f32.mrf.mxu2  ;;  %1555 = vadd.xlane.f32.xlu2 %v1554_v51  ;;  %v877_v59 = vpop.f32.mrf.mxu0 }
 0x17f   : > { %v1053_v54 = vadd.f32 %v1052_v53, %v964_v50  ;;  %v1141_v55 = vpop.f32.mrf.mxu3  ;;  %v1289_v56 = vpop.xlane.xlu1 %1288 }
 0x180   : > { %v1363_v58 = vadd.f32 %v1289_v56, %v1234_v52  ;;  %v966_v61 = vpop.f32.mrf.mxu1  ;;  %v1238_v56 = vld [vmem:[%s2683_s11 + $0x70] sm:$0xff] }
 0x181   : > { %v1142_v60 = vadd.f32 %v1141_v55, %v1053_v54  ;;  %v1514_v62 = vpop.xlane.xlu0 %1513  ;;  %v967_v2 = vadd.f32 %v966_v61, %v877_v59  ;;  %v1432_v61 = vld [vmem:[%s2848_s6 + $0x70] sm:$0xff] }
 0x182   : > { %1396 = vst.msk [vmem:[%s2683_s11 + $0x50] sm:$0xff] %vm258_vm2, %v1363_v58  ;;  %v1588_v63 = vadd.f32 %v1514_v62, %v1428_v57 }
 0x183   : > { %v1184_v1 = vpack.c.bf16 %v1142_v60, %v1142_v60  ;;  %v1332_v3 = vsel %vm1256_vm0, %v1142_v60, 0.0  ;;  %v1475_v4 = vmul.f32 %v1142_v60, %v1142_v60 }
 0x184   : > { %1620 = vst.msk [vmem:[%s2848_s6 + $0x50] sm:$0xff] %vm258_vm2, %v1588_v63  ;;  %1333 = vadd.xlane.f32.xlu1 %v1332_v3 }
 0x185   : > { %1217 = vst.msk [vmem:[%s2515_s12 + $0x64] sm:$0xf] %vm1191_vm1, %v1184_v1  ;;  %v1557_v5 = vsel %vm1256_vm0, %v1475_v4, 0.0 }
 0x186   : > { %v1055_v7 = vpop.f32.mrf.mxu2  ;;  %1558 = vadd.xlane.f32.xlu0 %v1557_v5  ;;  %v879_v13 = vpop.f32.mrf.mxu0 }
 0x187   : > { %v1056_v8 = vadd.f32 %v1055_v7, %v967_v2  ;;  %v1144_v9 = vpop.f32.mrf.mxu3  ;;  %v1292_v10 = vpop.xlane.xlu2 %1291 }
 0x188   : > { %v1364_v12 = vadd.f32 %v1292_v10, %v1235_v6  ;;  %v968_v15 = vpop.f32.mrf.mxu1 }
 0x189   : > { %v1145_v14 = vadd.f32 %v1144_v9, %v1056_v8  ;;  %v1517_v16 = vpop.xlane.xlu1 %1516  ;;  %v969_v20 = vadd.f32 %v968_v15, %v879_v13  ;;  %v1239_v8 = vld [vmem:[%s2683_s11 + $0x78] sm:$0xff] }
 0x18a   : > { %1397 = vst.msk [vmem:[%s2683_s11 + $0x58] sm:$0xff] %vm258_vm2, %v1364_v12  ;;  %v1589_v17 = vadd.f32 %v1517_v16, %v1429_v11  ;;  %v1433_v13 = vld [vmem:[%s2848_s6 + $0x78] sm:$0xff] }
 0x18b   : > { %v1185_v0 = vpack.c.bf16 %v1145_v14, %v1145_v14  ;;  %v1335_v18 = vsel %vm1256_vm0, %v1145_v14, 0.0  ;;  %v1476_v19 = vmul.f32 %v1145_v14, %v1145_v14 }
 0x18c   : > { %1621 = vst.msk [vmem:[%s2848_s6 + $0x58] sm:$0xff] %vm258_vm2, %v1589_v17  ;;  %1336 = vadd.xlane.f32.xlu2 %v1335_v18 }
 0x18d   : > { %1218 = vst.msk [vmem:[%s2515_s12 + $0x68] sm:$0xf] %vm1191_vm1, %v1185_v0  ;;  %v1560_v21 = vsel %vm1256_vm0, %v1476_v19, 0.0 }
 0x18e   : > { %v1057_v23 = vpop.f32.mrf.mxu2  ;;  %1561 = vadd.xlane.f32.xlu1 %v1560_v21  ;;  %v882_v29 = vpop.f32.mrf.mxu0 }
 0x18f   : > { %v1058_v24 = vadd.f32 %v1057_v23, %v969_v20  ;;  %v1146_v25 = vpop.f32.mrf.mxu3  ;;  %v1295_v26 = vpop.xlane.xlu0 %1294 }
 0x190   : > { %v1365_v28 = vadd.f32 %v1295_v26, %v1236_v22  ;;  %v971_v31 = vpop.f32.mrf.mxu1 }
 0x191   : > { %v1147_v30 = vadd.f32 %v1146_v25, %v1058_v24  ;;  %v1520_v32 = vpop.xlane.xlu2 %1519  ;;  %v972_v35 = vadd.f32 %v971_v31, %v882_v29  ;;  %v1240_v24 = vld [vmem:[%s2683_s11 + $0x80] sm:$0xff] }
 0x192   : > { %1398 = vst.msk [vmem:[%s2683_s11 + $0x60] sm:$0xff] %vm258_vm2, %v1365_v28  ;;  %v1590_v33 = vadd.f32 %v1520_v32, %v1430_v27  ;;  %v1434_v28 = vld [vmem:[%s2848_s6 + $0x80] sm:$0xff] }
 0x193   : > { %v1186_v34 = vpack.c.bf16 %v1147_v30, %v1147_v30  ;;  %v1338_v36 = vsel %vm1256_vm0, %v1147_v30, 0.0  ;;  %v1477_v37 = vmul.f32 %v1147_v30, %v1147_v30 }
 0x194   : > { %1622 = vst.msk [vmem:[%s2848_s6 + $0x60] sm:$0xff] %vm258_vm2, %v1590_v33  ;;  %1339 = vadd.xlane.f32.xlu0 %v1338_v36 }
 0x195   : > { %1219 = vst.msk [vmem:[%s2515_s12 + $0x6c] sm:$0xf] %vm1191_vm1, %v1186_v34  ;;  %v1563_v38 = vsel %vm1256_vm0, %v1477_v37, 0.0 }
 0x196   : > { %v1060_v40 = vpop.f32.mrf.mxu2  ;;  %1564 = vadd.xlane.f32.xlu2 %v1563_v38  ;;  %v884_v46 = vpop.f32.mrf.mxu0  ;;  %v1241_v38 = vld [vmem:[%s2683_s11 + $0x88] sm:$0xff] }
 0x197   : > { %v1061_v41 = vadd.f32 %v1060_v40, %v972_v35  ;;  %v1149_v42 = vpop.f32.mrf.mxu3  ;;  %v1298_v43 = vpop.xlane.xlu1 %1297  ;;  %v1435_v40 = vld [vmem:[%s2848_s6 + $0x88] sm:$0xff] }
 0x198   : > { %v1366_v45 = vadd.f32 %v1298_v43, %v1237_v39  ;;  %v973_v48 = vpop.f32.mrf.mxu1 }
 0x199   : > { %v1150_v47 = vadd.f32 %v1149_v42, %v1061_v41  ;;  %v1523_v49 = vpop.xlane.xlu0 %1522  ;;  %v974_v54 = vadd.f32 %v973_v48, %v884_v46  ;;  %v1242_v46 = vld [vmem:[%s2683_s11 + $0x90] sm:$0xff] }
 0x19a   : > { %1399 = vst.msk [vmem:[%s2683_s11 + $0x68] sm:$0xff] %vm258_vm2, %v1366_v45  ;;  %v1591_v50 = vadd.f32 %v1523_v49, %v1431_v44  ;;  %v1436_v48 = vld [vmem:[%s2848_s6 + $0x90] sm:$0xff] }
 0x19b   : > { %v1187_v51 = vpack.c.bf16 %v1150_v47, %v1150_v47  ;;  %v1341_v52 = vsel %vm1256_vm0, %v1150_v47, 0.0  ;;  %v1478_v53 = vmul.f32 %v1150_v47, %v1150_v47 }
 0x19c   : > { %1623 = vst.msk [vmem:[%s2848_s6 + $0x68] sm:$0xff] %vm258_vm2, %v1591_v50  ;;  %1342 = vadd.xlane.f32.xlu1 %v1341_v52  ;;  %v1243_v52 = vld [vmem:[%s2683_s11 + $0x98] sm:$0xff] }
 0x19d   : > { %1220 = vst.msk [vmem:[%s2515_s12 + $0x70] sm:$0xf] %vm1191_vm1, %v1187_v51  ;;  %v1566_v55 = vsel %vm1256_vm0, %v1478_v53, 0.0 }
 0x19e   : > { %v1062_v57 = vpop.f32.mrf.mxu2  ;;  %1567 = vadd.xlane.f32.xlu0 %v1566_v55  ;;  %v887_v63 = vpop.f32.mrf.mxu0 }
 0x19f   : > { %v1063_v58 = vadd.f32 %v1062_v57, %v974_v54  ;;  %v1151_v59 = vpop.f32.mrf.mxu3  ;;  %v1301_v60 = vpop.xlane.xlu2 %1300  ;;  %v1437_v54 = vld [vmem:[%s2848_s6 + $0x98] sm:$0xff] }
 0x1a0   : > { %v1367_v62 = vadd.f32 %v1301_v60, %v1238_v56  ;;  %v976_v2 = vpop.f32.mrf.mxu1  ;;  %v1438_v60 = vld [vmem:[%s2848_s6 + $0xa0] sm:$0xff] }
 0x1a1   : > { %v1152_v1 = vadd.f32 %v1151_v59, %v1063_v58  ;;  %v1526_v3 = vpop.xlane.xlu1 %1525  ;;  %v977_v6 = vadd.f32 %v976_v2, %v887_v63  ;;  %v1244_v58 = vld [vmem:[%s2683_s11 + $0xa0] sm:$0xff] }
 0x1a2   : > { %1400 = vst.msk [vmem:[%s2683_s11 + $0x70] sm:$0xff] %vm258_vm2, %v1367_v62  ;;  %v1592_v4 = vadd.f32 %v1526_v3, %v1432_v61  ;;  %v1439_v3 = vld [vmem:[%s2848_s6 + $0xa8] sm:$0xff] }
 0x1a3   : > { %v1188_v5 = vpack.c.bf16 %v1152_v1, %v1152_v1  ;;  %v1344_v7 = vsel %vm1256_vm0, %v1152_v1, 0.0  ;;  %v1479_v41 = vmul.f32 %v1152_v1, %v1152_v1  ;;  %v1245_v1 = vld [vmem:[%s2683_s11 + $0xa8] sm:$0xff] }
 0x1a4   : > { %1624 = vst.msk [vmem:[%s2848_s6 + $0x70] sm:$0xff] %vm258_vm2, %v1592_v4  ;;  %1345 = vadd.xlane.f32.xlu2 %v1344_v7  ;;  %v1246_v7 = vld [vmem:[%s2683_s11 + $0xb0] sm:$0xff] }
 0x1a5   : > { %1221 = vst.msk [vmem:[%s2515_s12 + $0x74] sm:$0xf] %vm1191_vm1, %v1188_v5  ;;  %v1569_v45 = vsel %vm1256_vm0, %v1479_v41, 0.0 }
 0x1a6   : > { %v1065_v9 = vpop.f32.mrf.mxu2  ;;  %v889_v17 = vpop.f32.mrf.mxu0 }
 0x1a7   : > { %v1066_v10 = vadd.f32 %v1065_v9, %v977_v6  ;;  %v1154_v11 = vpop.f32.mrf.mxu3  ;;  %v1304_v12 = vpop.xlane.xlu0 %1303  ;;  %v1440_v9 = vld [vmem:[%s2848_s6 + $0xb0] sm:$0xff] }
 0x1a8   : > { %v1368_v14 = vadd.f32 %v1304_v12, %v1239_v8  ;;  %v978_v0 = vpop.f32.mrf.mxu1 }
 0x1a9   : > { %v1155_v15 = vadd.f32 %v1154_v11, %v1066_v10  ;;  %v1529_v16 = vpop.xlane.xlu2 %1528  ;;  %v979_v22 = vadd.f32 %v978_v0, %v889_v17 }
 0x1aa   : > { %1401 = vst.msk [vmem:[%s2683_s11 + $0x78] sm:$0xff] %vm258_vm2, %v1368_v14  ;;  %v1593_v18 = vadd.f32 %v1529_v16, %v1433_v13  ;;  %v1247_v13 = vld [vmem:[%s2683_s11 + $0xb8] sm:$0xff] }
 0x1ab   : > { %v1189_v19 = vpack.c.bf16 %v1155_v15, %v1155_v15  ;;  %v1347_v20 = vsel %vm1256_vm0, %v1155_v15, 0.0  ;;  %v1480_v21 = vmul.f32 %v1155_v15, %v1155_v15  ;;  %v1441_v15 = vld [vmem:[%s2848_s6 + $0xb8] sm:$0xff] }
 0x1ac   : > { %1625 = vst.msk [vmem:[%s2848_s6 + $0x78] sm:$0xff] %vm258_vm2, %v1593_v18  ;;  %1348 = vadd.xlane.f32.xlu0 %v1347_v20  ;;  %v1248_v18 = vld [vmem:[%s2683_s11 + $0xc0] sm:$0xff] }
 0x1ad   : > { %1222 = vst.msk [vmem:[%s2515_s12 + $0x78] sm:$0xf] %vm1191_vm1, %v1189_v19  ;;  %v1572_v23 = vsel %vm1256_vm0, %v1480_v21, 0.0  ;;  %v1442_v20 = vld [vmem:[%s2848_s6 + $0xc0] sm:$0xff] }
 0x1ae   : > { %v1067_v25 = vpop.f32.mrf.mxu2  ;;  %1573 = vadd.xlane.f32.xlu2 %v1572_v23 }
 0x1af   : > { %v1068_v26 = vadd.f32 %v1067_v25, %v979_v22  ;;  %v1307_v27 = vpop.xlane.xlu1 %1306  ;;  %v1156_v29 = vpop.f32.mrf.mxu3 }
 0x1b0   : > { %v1369_v30 = vadd.f32 %v1307_v27, %v1240_v24  ;;  %v1249_v24 = vld [vmem:[%s2683_s11 + $0xc8] sm:$0xff] }
 0x1b1   : > { %v1157_v31 = vadd.f32 %v1156_v29, %v1068_v26  ;;  %v1532_v32 = vpop.xlane.xlu0 %1531  ;;  %v1443_v26 = vld [vmem:[%s2848_s6 + $0xc8] sm:$0xff] }
 0x1b2   : > { %1402 = vst.msk [vmem:[%s2683_s11 + $0x80] sm:$0xff] %vm258_vm2, %v1369_v30  ;;  %v1594_v33 = vadd.f32 %v1532_v32, %v1434_v28  ;;  %v1250_v30 = vld [vmem:[%s2683_s11 + $0xd0] sm:$0xff] }
 0x1b3   : > { %v1190_v34 = vpack.c.bf16 %v1157_v31, %v1157_v31  ;;  %v1350_v35 = vsel %vm1256_vm0, %v1157_v31, 0.0  ;;  %v1481_v36 = vmul.f32 %v1157_v31, %v1157_v31  ;;  %v1444_v32 = vld [vmem:[%s2848_s6 + $0xd0] sm:$0xff] }
 0x1b4   : > { %1626 = vst.msk [vmem:[%s2848_s6 + $0x80] sm:$0xff] %vm258_vm2, %v1594_v33  ;;  %1351 = vadd.xlane.f32.xlu1 %v1350_v35 }
 0x1b5   : > { %1223 = vst.msk [vmem:[%s2515_s12 + $0x7c] sm:$0xf] %vm1191_vm1, %v1190_v34  ;;  %v1575_v37 = vsel %vm1256_vm0, %v1481_v36, 0.0  ;;  %v1251_v36 = vld [vmem:[%s2683_s11 + $0xd8] sm:$0xff] }
 0x1b6   : > { %1576 = vadd.xlane.f32.xlu0 %v1575_v37 }
 0x1b7   : > { %v1310_v39 = vpop.xlane.xlu2 %1309 }
 0x1b8   : > { %v1370_v42 = vadd.f32 %v1310_v39, %v1241_v38  ;;  %v1445_v38 = vld [vmem:[%s2848_s6 + $0xd8] sm:$0xff] }
 0x1b9   : > { %v1535_v43 = vpop.xlane.xlu1 %1534 }
 0x1ba   : > { %1403 = vst.msk [vmem:[%s2683_s11 + $0x88] sm:$0xff] %vm258_vm2, %v1370_v42  ;;  %v1595_v44 = vadd.f32 %v1535_v43, %v1435_v40  ;;  %v1252_v42 = vld [vmem:[%s2683_s11 + $0xe0] sm:$0xff] }
 0x1bc   : > { %1627 = vst.msk [vmem:[%s2848_s6 + $0x88] sm:$0xff] %vm258_vm2, %v1595_v44  ;;  %1570 = vadd.xlane.f32.xlu1 %v1569_v45  ;;  %v1446_v44 = vld [vmem:[%s2848_s6 + $0xe0] sm:$0xff] }
 0x1bf   : > { %v1313_v47 = vpop.xlane.xlu0 %1312 }
 0x1c0   : > { %v1371_v49 = vadd.f32 %v1313_v47, %v1242_v46 }
 0x1c1   : > { %v1538_v50 = vpop.xlane.xlu2 %1537 }
 0x1c2   : > { %1404 = vst.msk [vmem:[%s2683_s11 + $0x90] sm:$0xff] %vm258_vm2, %v1371_v49  ;;  %v1596_v51 = vadd.f32 %v1538_v50, %v1436_v48  ;;  %v1253_v48 = vld [vmem:[%s2683_s11 + $0xe8] sm:$0xff] }
 0x1c4   : > { %1628 = vst.msk [vmem:[%s2848_s6 + $0x90] sm:$0xff] %vm258_vm2, %v1596_v51  ;;  %v1254_v51 = vld [vmem:[%s2683_s11 + $0xf0] sm:$0xff] }
 0x1c7   : > { %v1316_v53 = vpop.xlane.xlu1 %1315 }
 0x1c8   : > { %v1372_v55 = vadd.f32 %v1316_v53, %v1243_v52  ;;  %v1448_v53 = vld [vmem:[%s2848_s6 + $0xf0] sm:$0xff] }
 0x1c9   : > { %v1541_v56 = vpop.xlane.xlu0 %1540 }
 0x1ca   : > { %1405 = vst.msk [vmem:[%s2683_s11 + $0x98] sm:$0xff] %vm258_vm2, %v1372_v55  ;;  %v1597_v57 = vadd.f32 %v1541_v56, %v1437_v54 }
 0x1cc   : > { %1629 = vst.msk [vmem:[%s2848_s6 + $0x98] sm:$0xff] %vm258_vm2, %v1597_v57  ;;  %v1255_v57 = vld [vmem:[%s2683_s11 + $0xf8] sm:$0xff] }
 0x1cf   : > { %v1319_v59 = vpop.xlane.xlu2 %1318 }
 0x1d0   : > { %v1373_v61 = vadd.f32 %v1319_v59, %v1244_v58  ;;  %v1449_v59 = vld [vmem:[%s2848_s6 + $0xf8] sm:$0xff] }
 0x1d1   : > { %v1544_v62 = vpop.xlane.xlu1 %1543 }
 0x1d2   : > { %1406 = vst.msk [vmem:[%s2683_s11 + $0xa0] sm:$0xff] %vm258_vm2, %v1373_v61  ;;  %v1598_v63 = vadd.f32 %v1544_v62, %v1438_v60 }
 0x1d4   : > { %1630 = vst.msk [vmem:[%s2848_s6 + $0xa0] sm:$0xff] %vm258_vm2, %v1598_v63  ;;  %v1447_v63 = vld [vmem:[%s2848_s6 + $0xe8] sm:$0xff] }
 0x1d7   : > { %v1322_v2 = vpop.xlane.xlu0 %1321 }
 0x1d8   : > { %v1374_v4 = vadd.f32 %v1322_v2, %v1245_v1 }
 0x1d9   : > { %v1547_v5 = vpop.xlane.xlu2 %1546 }
 0x1da   : > { %1407 = vst.msk [vmem:[%s2683_s11 + $0xa8] sm:$0xff] %vm258_vm2, %v1374_v4  ;;  %v1599_v6 = vadd.f32 %v1547_v5, %v1439_v3 }
 0x1dc   : > { %1631 = vst.msk [vmem:[%s2848_s6 + $0xa8] sm:$0xff] %vm258_vm2, %v1599_v6 }
 0x1df   : > { %v1325_v8 = vpop.xlane.xlu1 %1324 }
 0x1e0   : > { %v1375_v10 = vadd.f32 %v1325_v8, %v1246_v7 }
 0x1e1   : > { %v1550_v11 = vpop.xlane.xlu0 %1549 }
 0x1e2   : > { %1408 = vst.msk [vmem:[%s2683_s11 + $0xb0] sm:$0xff] %vm258_vm2, %v1375_v10  ;;  %v1600_v12 = vadd.f32 %v1550_v11, %v1440_v9 }
 0x1e4   : > { %1632 = vst.msk [vmem:[%s2848_s6 + $0xb0] sm:$0xff] %vm258_vm2, %v1600_v12 }
 0x1e7   : > { %v1328_v14 = vpop.xlane.xlu2 %1327 }
 0x1e8   : > { %v1376_v16 = vadd.f32 %v1328_v14, %v1247_v13 }
 0x1e9   : > { %v1553_v17 = vpop.xlane.xlu1 %1552 }
 0x1ea   : > { %1409 = vst.msk [vmem:[%s2683_s11 + $0xb8] sm:$0xff] %vm258_vm2, %v1376_v16  ;;  %v1601_v0 = vadd.f32 %v1553_v17, %v1441_v15 }
 0x1ec   : > { %1633 = vst.msk [vmem:[%s2848_s6 + $0xb8] sm:$0xff] %vm258_vm2, %v1601_v0 }
 0x1ef   : > { %v1331_v19 = vpop.xlane.xlu0 %1330 }
 0x1f0   : > { %v1377_v21 = vadd.f32 %v1331_v19, %v1248_v18 }
 0x1f1   : > { %v1556_v22 = vpop.xlane.xlu2 %1555 }
 0x1f2   : > { %1410 = vst.msk [vmem:[%s2683_s11 + $0xc0] sm:$0xff] %vm258_vm2, %v1377_v21  ;;  %v1602_v23 = vadd.f32 %v1556_v22, %v1442_v20 }
 0x1f4   : > { %1634 = vst.msk [vmem:[%s2848_s6 + $0xc0] sm:$0xff] %vm258_vm2, %v1602_v23 }
 0x1f7   : > { %v1334_v25 = vpop.xlane.xlu1 %1333 }
 0x1f8   : > { %v1378_v27 = vadd.f32 %v1334_v25, %v1249_v24 }
 0x1f9   : > { %v1559_v28 = vpop.xlane.xlu0 %1558 }
 0x1fa   : > { %1411 = vst.msk [vmem:[%s2683_s11 + $0xc8] sm:$0xff] %vm258_vm2, %v1378_v27  ;;  %v1603_v29 = vadd.f32 %v1559_v28, %v1443_v26 }
 0x1fc   : > { %1635 = vst.msk [vmem:[%s2848_s6 + $0xc8] sm:$0xff] %vm258_vm2, %v1603_v29 }
 0x1ff   : > { %v1337_v31 = vpop.xlane.xlu2 %1336 }
 0x200   : > { %v1379_v33 = vadd.f32 %v1337_v31, %v1250_v30 }
 0x201   : > { %v1562_v34 = vpop.xlane.xlu1 %1561 }
 0x202   : > { %1412 = vst.msk [vmem:[%s2683_s11 + $0xd0] sm:$0xff] %vm258_vm2, %v1379_v33  ;;  %v1604_v35 = vadd.f32 %v1562_v34, %v1444_v32 }
 0x204   : > { %1636 = vst.msk [vmem:[%s2848_s6 + $0xd0] sm:$0xff] %vm258_vm2, %v1604_v35 }
 0x207   : > { %v1340_v37 = vpop.xlane.xlu0 %1339 }
 0x208   : > { %v1380_v39 = vadd.f32 %v1340_v37, %v1251_v36 }
 0x209   : > { %v1565_v40 = vpop.xlane.xlu2 %1564 }
 0x20a   : > { %1413 = vst.msk [vmem:[%s2683_s11 + $0xd8] sm:$0xff] %vm258_vm2, %v1380_v39  ;;  %v1605_v41 = vadd.f32 %v1565_v40, %v1445_v38 }
 0x20c   : > { %1637 = vst.msk [vmem:[%s2848_s6 + $0xd8] sm:$0xff] %vm258_vm2, %v1605_v41 }
 0x20f   : > { %v1343_v43 = vpop.xlane.xlu1 %1342 }
 0x210   : > { %v1381_v45 = vadd.f32 %v1343_v43, %v1252_v42 }
 0x211   : > { %v1568_v46 = vpop.xlane.xlu0 %1567 }
 0x212   : > { %1414 = vst.msk [vmem:[%s2683_s11 + $0xe0] sm:$0xff] %vm258_vm2, %v1381_v45  ;;  %v1606_v47 = vadd.f32 %v1568_v46, %v1446_v44 }
 0x214   : > { %1638 = vst.msk [vmem:[%s2848_s6 + $0xe0] sm:$0xff] %vm258_vm2, %v1606_v47 }
 0x217   : > { %v1346_v49 = vpop.xlane.xlu2 %1345 }
 0x218   : > { %v1382_v50 = vadd.f32 %v1346_v49, %v1253_v48 }
 0x21a   : > { %1415 = vst.msk [vmem:[%s2683_s11 + $0xe8] sm:$0xff] %vm258_vm2, %v1382_v50 }
 0x21f   : > { %v1349_v52 = vpop.xlane.xlu0 %1348 }
 0x220   : > { %v1383_v54 = vadd.f32 %v1349_v52, %v1254_v51 }
 0x221   : > { %v1574_v55 = vpop.xlane.xlu2 %1573 }
 0x222   : > { %1416 = vst.msk [vmem:[%s2683_s11 + $0xf0] sm:$0xff] %vm258_vm2, %v1383_v54  ;;  %v1608_v56 = vadd.f32 %v1574_v55, %v1448_v53 }
 0x224   : > { %1640 = vst.msk [vmem:[%s2848_s6 + $0xf0] sm:$0xff] %vm258_vm2, %v1608_v56 }
 0x227   : > { %v1352_v58 = vpop.xlane.xlu1 %1351 }
 0x228   : > { %v1384_v60 = vadd.f32 %v1352_v58, %v1255_v57 }
 0x229   : > { %v1577_v61 = vpop.xlane.xlu0 %1576 }
 0x22a   : > { %1417 = vst.msk [vmem:[%s2683_s11 + $0xf8] sm:$0xff] %vm258_vm2, %v1384_v60  ;;  %v1609_v62 = vadd.f32 %v1577_v61, %v1449_v59 }
 0x22c   : > { %1641 = vst.msk [vmem:[%s2848_s6 + $0xf8] sm:$0xff] %vm258_vm2, %v1609_v62 }
 0x22f   : > { %v1571_v1 = vpop.xlane.xlu1 %1570 }
 0x230   : > { %v1607_v2 = vadd.f32 %v1571_v1, %v1447_v63 }
 0x232   : > { %1639 = vst.msk [vmem:[%s2848_s6 + $0xe8] sm:$0xff] %vm258_vm2, %v1607_v2 }
 0x233 PF: > { %s15_s17 = sadd.s32 1, %s2177_s17   ;;  %s3233_s15 = smov %s2173_s16 }
 0x234   : > { %p12_p5 = scmp.ge.s32.totalorder %s15_s17, 4   ;;  %s3234_s16 = smov %s3236_s18 }
 0x236   :  { %14 = sbr.rel (!%p12_p5) target bundleno = 2 (0x2), region = 86 }

</bundles_post_ra>
